<compile_context>
chip_gen: v5e
topology: v5e:2x2
jax: 0.10.0
libtpu: 0.0.40
codegen_flags: <defaults>
</compile_context>

<pallas_src>
import functools

import jax
import jax.numpy as jnp
from jax.experimental import pallas as pl
from jax.experimental.pallas import tpu as pltpu  # noqa: F401  (TPU backend)

EPS = 1e-12  # F.normalize default eps


# ----------------------------- Pallas kernel ---------------------------------

def _aea_kernel(x_ref, fx_ref, w1_ref, b1_ref, w2_ref, b2_ref, o_ref, *,
                scale_value, from_value, value_interval):
    """Fused AEAModule forward for one row-block.

    x_ref : (R, C)      flattened (b*hw, c) features
    fx_ref: (R, M)      flattened (b*hw, m) matching scores f_x
    w1_ref: (C, C16)    first Linear weight, pre-transposed
    b1_ref: (1, C16)
    w2_ref: (1, C16)    second Linear (out-dim 1) as a lane-wise reduce
    b2_ref: (1, 1)
    o_ref : (R, M)      attention mask (L1-normalized over last dim)
    """
    x = x_ref[...]                                              # (R, C)

    # f_psi: Linear(C -> C//16) -> LeakyReLU(0.2) -> Linear(C//16 -> 1) -> Sigmoid
    h1 = jnp.dot(x, w1_ref[...], preferred_element_type=jnp.float32) + b1_ref[...]
    h1 = jnp.where(h1 >= 0, h1, 0.2 * h1)
    logit = jnp.sum(h1 * w2_ref[...], axis=-1, keepdims=True) + b2_ref[...]
    psi = jax.nn.sigmoid(logit)                                 # (R, 1)

    clamp_value = psi * value_interval + from_value             # (R, 1)
    clamp_fx = jax.nn.sigmoid(scale_value * (fx_ref[...] - clamp_value))

    # F.normalize(clamp_fx, p=1, dim=-1)
    l1 = jnp.maximum(jnp.sum(jnp.abs(clamp_fx), axis=-1, keepdims=True), EPS)
    o_ref[...] = clamp_fx / l1


# ------------------------------ wrapper ---------------------------------------

def aea_forward(x, f_x, params, *, scale_value=50.0, from_value=0.4,
                value_interval=0.5, block_rows=None):
    """AEAModule.forward(x, f_x) -> attention_mask.

    x   : (b, hw, c)   features
    f_x : (b, hw, m)   matching scores
    params: dict with PyTorch-layout weights:
        w1 (c//16, c), b1 (c//16,), w2 (1, c//16), b2 (1,)
    """
    b, hw, c = x.shape
    m = f_x.shape[-1]
    rows = b * hw
    if block_rows is None or block_rows >= rows:
        block_rows = rows                       # single grid step (everything in VMEM)
    assert rows % block_rows == 0, "rows must be divisible by block_rows"

    c16 = params["w1"].shape[0]
    x2d = x.reshape(rows, c).astype(jnp.float32)
    fx2d = f_x.reshape(rows, m).astype(jnp.float32)
    w1t = jnp.asarray(params["w1"], jnp.float32).T              # (c, c16)
    b1 = jnp.asarray(params["b1"], jnp.float32).reshape(1, c16)
    w2 = jnp.asarray(params["w2"], jnp.float32).reshape(1, c16)
    b2 = jnp.asarray(params["b2"], jnp.float32).reshape(1, 1)

    kernel = functools.partial(
        _aea_kernel,
        scale_value=float(scale_value),
        from_value=float(from_value),
        value_interval=float(value_interval),
    )

    out = pl.pallas_call(
        kernel,
        out_shape=jax.ShapeDtypeStruct((rows, m), jnp.float32),
        grid=(rows // block_rows,),
        in_specs=[
            pl.BlockSpec((block_rows, c), lambda i: (i, 0)),
            pl.BlockSpec((block_rows, m), lambda i: (i, 0)),
            pl.BlockSpec((c, c16), lambda i: (0, 0)),
            pl.BlockSpec((1, c16), lambda i: (0, 0)),
            pl.BlockSpec((1, c16), lambda i: (0, 0)),
            pl.BlockSpec((1, 1), lambda i: (0, 0)),
        ],
        out_specs=pl.BlockSpec((block_rows, m), lambda i: (i, 0)),
    )(x2d, fx2d, w1t, b1, w2, b2)
    return out.reshape(b, hw, m)


# --------------------------- pure-JAX reference --------------------------------

def aea_reference(x, f_x, params, scale_value=50.0, from_value=0.4,
                  value_interval=0.5):
    b, hw, c = x.shape
    xf = x.reshape(b * hw, c)
    h1 = xf @ params["w1"].T + params["b1"]
    h1 = jnp.where(h1 >= 0, h1, 0.2 * h1)
    psi = jax.nn.sigmoid(h1 @ params["w2"].T + params["b2"])
    clamp_value = (psi * value_interval + from_value).reshape(b, hw, 1)
    clamp_fx = jax.nn.sigmoid(scale_value * (f_x - clamp_value))
    return clamp_fx / jnp.maximum(
        jnp.sum(jnp.abs(clamp_fx), axis=-1, keepdims=True), EPS)


# ----------------------------------- main ---------------------------------------

if __name__ == "__main__":
    # Small shapes consistent with the module's use inside DCRNet:
    # b queries, hw = 8x8 spatial locations, c = inplanes feature channels,
    # f_x last dim = (num_support_images * hw) matching scores.
    INPLANES = 64                     # must be >= 16 for Linear(inplanes, inplanes//16)
    B = 4
    H = W = 8
    HW = H * W
    N_SUPPORT = 4
    M = N_SUPPORT * HW                # 256 -> lane-dense output (multiple of 128)

    key = jax.random.PRNGKey(0)
    kx, kf, k1, k2, k3, k4 = jax.random.split(key, 6)
    c16 = INPLANES // 16
    params = dict(
        w1=0.2 * jax.random.normal(k1, (c16, INPLANES), jnp.float32),
        b1=0.05 * jax.random.normal(k2, (c16,), jnp.float32),
        w2=0.2 * jax.random.normal(k3, (1, c16), jnp.float32),
        b2=0.05 * jax.random.normal(k4, (1,), jnp.float32),
    )

    x = jax.random.normal(kx, (B, HW, INPLANES), jnp.float32)
    # cosine-similarity-like matching scores in [-1, 1]
    f_x = jax.random.uniform(kf, (B, HW, M), jnp.float32, minval=-1.0, maxval=1.0)

    fwd = jax.jit(lambda xx, ff: aea_forward(xx, ff, params))
    att = fwd(x, f_x)
    jax.block_until_ready(att)

    ref = aea_reference(x, f_x, params)
    assert att.shape == (B, HW, M)
    assert bool(jnp.all(jnp.isfinite(att)))
    assert bool(jnp.allclose(att, ref, atol=1e-3, rtol=1e-3)), float(
        jnp.max(jnp.abs(att - ref)))
    print("KERNEL_OK")
</pallas_src>

<mosaic_0001>
module attributes {stable_mosaic.version = 11 : i64} {
  func.func @_aea_kernel(%arg0: i32, %arg1: memref<256x64xf32, #tpu.memory_space<vmem>>, %arg2: memref<256x256xf32, #tpu.memory_space<vmem>>, %arg3: memref<64x4xf32, #tpu.memory_space<vmem>>, %arg4: memref<1x4xf32, #tpu.memory_space<vmem>>, %arg5: memref<1x4xf32, #tpu.memory_space<vmem>>, %arg6: memref<1x1xf32, #tpu.memory_space<vmem>>, %arg7: memref<256x256xf32, #tpu.memory_space<vmem>>) attributes {dimension_semantics = [#tpu.dimension_semantics<arbitrary>], iteration_bounds = array<i64: 1>, scalar_prefetch = 0 : i64, scratch_operands = 0 : i64, tpu.core_type = #tpu.core_type<tc>, window_params = [{transform_indices = @transform_0, window_bounds = array<i64: 256, 64>}, {transform_indices = @transform_1, window_bounds = array<i64: 256, 256>}, {pipeline_mode = #tpu.pipeline_mode<synchronous>, transform_indices = @transform_2, window_bounds = array<i64: 64, 4>}, {pipeline_mode = #tpu.pipeline_mode<synchronous>, transform_indices = @transform_3, window_bounds = array<i64: 1, 4>}, {pipeline_mode = #tpu.pipeline_mode<synchronous>, transform_indices = @transform_4, window_bounds = array<i64: 1, 4>}, {pipeline_mode = #tpu.pipeline_mode<synchronous>, transform_indices = @transform_5, window_bounds = array<i64: 1, 1>}, {transform_indices = @transform_6, window_bounds = array<i64: 256, 256>}]} {
    %c0 = arith.constant 0 : index
    %c0_0 = arith.constant 0 : index
    %0 = vector.load %arg1[%c0, %c0_0] : memref<256x64xf32, #tpu.memory_space<vmem>>, vector<256x64xf32>
    %c0_1 = arith.constant 0 : index
    %c0_2 = arith.constant 0 : index
    %1 = vector.load %arg3[%c0_1, %c0_2] : memref<64x4xf32, #tpu.memory_space<vmem>>, vector<64x4xf32>
    %cst = arith.constant dense<0.000000e+00> : vector<256x4xf32>
    %2 = tpu.matmul %0, %1, %cst {dimension_numbers = #tpu.dot_dimension_numbers<[1], [0], [0], [1], [0, 0, 1, 1], [], []>} : vector<256x64xf32>, vector<64x4xf32>, vector<256x4xf32> -> vector<256x4xf32>
    %c0_3 = arith.constant 0 : index
    %c0_4 = arith.constant 0 : index
    %3 = vector.load %arg4[%c0_3, %c0_4] : memref<1x4xf32, #tpu.memory_space<vmem>>, vector<1x4xf32>
    %4 = vector.broadcast %3 : vector<1x4xf32> to vector<256x4xf32>
    %5 = arith.addf %2, %4 : vector<256x4xf32>
    %cst_5 = arith.constant 0.000000e+00 : f32
    %6 = vector.broadcast %cst_5 : f32 to vector<256x4xf32>
    %7 = arith.cmpf oge, %5, %6 : vector<256x4xf32>
    %cst_6 = arith.constant 2.000000e-01 : f32
    %8 = vector.broadcast %cst_6 : f32 to vector<256x4xf32>
    %9 = arith.mulf %8, %5 : vector<256x4xf32>
    %10 = arith.select %7, %5, %9 : vector<256x4xi1>, vector<256x4xf32>
    %c0_7 = arith.constant 0 : index
    %c0_8 = arith.constant 0 : index
    %11 = vector.load %arg5[%c0_7, %c0_8] : memref<1x4xf32, #tpu.memory_space<vmem>>, vector<1x4xf32>
    %12 = vector.broadcast %11 : vector<1x4xf32> to vector<256x4xf32>
    %13 = arith.mulf %10, %12 : vector<256x4xf32>
    %cst_9 = arith.constant dense<0.000000e+00> : vector<256xf32>
    %14 = vector.multi_reduction <add>, %13, %cst_9 [1] : vector<256x4xf32> to vector<256xf32>
    %15 = vector.shape_cast %14 : vector<256xf32> to vector<256x1xf32>
    %c0_10 = arith.constant 0 : index
    %c0_11 = arith.constant 0 : index
    %16 = vector.load %arg6[%c0_10, %c0_11] : memref<1x1xf32, #tpu.memory_space<vmem>>, vector<1x1xf32>
    %17 = vector.broadcast %16 : vector<1x1xf32> to vector<256x1xf32>
    %18 = arith.addf %15, %17 : vector<256x1xf32>
    %19 = arith.negf %18 : vector<256x1xf32>
    %20 = math.exp %19 : vector<256x1xf32>
    %cst_12 = arith.constant 1.000000e+00 : f32
    %21 = vector.broadcast %cst_12 : f32 to vector<256x1xf32>
    %22 = arith.addf %21, %20 : vector<256x1xf32>
    %23 = arith.divf %21, %22 : vector<256x1xf32>
    %cst_13 = arith.constant 5.000000e-01 : f32
    %24 = vector.broadcast %cst_13 : f32 to vector<256x1xf32>
    %25 = arith.mulf %23, %24 : vector<256x1xf32>
    %cst_14 = arith.constant 4.000000e-01 : f32
    %26 = vector.broadcast %cst_14 : f32 to vector<256x1xf32>
    %27 = arith.addf %25, %26 : vector<256x1xf32>
    %c0_15 = arith.constant 0 : index
    %c0_16 = arith.constant 0 : index
    %28 = vector.load %arg2[%c0_15, %c0_16] : memref<256x256xf32, #tpu.memory_space<vmem>>, vector<256x256xf32>
    %29 = vector.broadcast %27 : vector<256x1xf32> to vector<256x256xf32>
    %30 = arith.subf %28, %29 : vector<256x256xf32>
    %cst_17 = arith.constant 5.000000e+01 : f32
    %31 = vector.broadcast %cst_17 : f32 to vector<256x256xf32>
    %32 = arith.mulf %31, %30 : vector<256x256xf32>
    %33 = arith.negf %32 : vector<256x256xf32>
    %34 = math.exp %33 : vector<256x256xf32>
    %cst_18 = arith.constant 1.000000e+00 : f32
    %35 = vector.broadcast %cst_18 : f32 to vector<256x256xf32>
    %36 = arith.addf %35, %34 : vector<256x256xf32>
    %37 = arith.divf %35, %36 : vector<256x256xf32>
    %38 = math.absf %37 : vector<256x256xf32>
    %cst_19 = arith.constant dense<0.000000e+00> : vector<256xf32>
    %39 = vector.multi_reduction <add>, %38, %cst_19 [1] : vector<256x256xf32> to vector<256xf32>
    %40 = vector.shape_cast %39 : vector<256xf32> to vector<256x1xf32>
    %cst_20 = arith.constant 9.99999996E-13 : f32
    %41 = vector.broadcast %cst_20 : f32 to vector<256x1xf32>
    %42 = arith.maximumf %40, %41 : vector<256x1xf32>
    %43 = vector.broadcast %42 : vector<256x1xf32> to vector<256x256xf32>
    %44 = arith.divf %37, %43 : vector<256x256xf32>
    %c0_21 = arith.constant 0 : index
    %c0_22 = arith.constant 0 : index
    %45 = vector.load %arg7[%c0_21, %c0_22] : memref<256x256xf32, #tpu.memory_space<vmem>>, vector<256x256xf32>
    tpu.vector_store %arg7[%c0_21, %c0_22], %44 {strides = array<i32>} : memref<256x256xf32, #tpu.memory_space<vmem>>, vector<256x256xf32>,
    return
  }
  func.func @transform_0(%arg0: i32) -> (i32, i32) {
    %c0_i32 = arith.constant 0 : i32
    %c0_i32_0 = arith.constant 0 : i32
    return %arg0, %c0_i32 : i32, i32
  }
  func.func @transform_1(%arg0: i32) -> (i32, i32) {
    %c0_i32 = arith.constant 0 : i32
    %c0_i32_0 = arith.constant 0 : i32
    return %arg0, %c0_i32 : i32, i32
  }
  func.func @transform_2(%arg0: i32) -> (i32, i32) {
    %c0_i32 = arith.constant 0 : i32
    %c0_i32_0 = arith.constant 0 : i32
    %c0_i32_1 = arith.constant 0 : i32
    return %c0_i32, %c0_i32_0 : i32, i32
  }
  func.func @transform_3(%arg0: i32) -> (i32, i32) {
    %c0_i32 = arith.constant 0 : i32
    %c0_i32_0 = arith.constant 0 : i32
    %c0_i32_1 = arith.constant 0 : i32
    return %c0_i32, %c0_i32_0 : i32, i32
  }
  func.func @transform_4(%arg0: i32) -> (i32, i32) {
    %c0_i32 = arith.constant 0 : i32
    %c0_i32_0 = arith.constant 0 : i32
    %c0_i32_1 = arith.constant 0 : i32
    return %c0_i32, %c0_i32_0 : i32, i32
  }
  func.func @transform_5(%arg0: i32) -> (i32, i32) {
    %c0_i32 = arith.constant 0 : i32
    %c0_i32_0 = arith.constant 0 : i32
    %c0_i32_1 = arith.constant 0 : i32
    return %c0_i32, %c0_i32_0 : i32, i32
  }
  func.func @transform_6(%arg0: i32) -> (i32, i32) {
    %c0_i32 = arith.constant 0 : i32
    %c0_i32_0 = arith.constant 0 : i32
    return %arg0, %c0_i32 : i32, i32
  }
}

</mosaic_0001>

<bundles_post_ra>
// kernel: _lambda_.1
= control target key start
LH: loop header
LB: loop body
LE: loop exit
PB: predicated region body
PF: predicated region fallthrough
CT: control target
= control target key end

     0   :  { %s7206_s0 = inlined_call_operand.hbm [shape: f32[256,64], index: 0, kind: input, shape index: {}]   ;;  %s7207_s1 = inlined_call_operand.hbm [shape: f32[256,256], index: 1, kind: input, shape index: {}]   ;;  %s7208_s2 = inlined_call_operand.hbm [shape: f32[64,4], index: 2, kind: input, shape index: {}]   ;;  %s7209_s3 = inlined_call_operand.vmem [shape: f32[1,4], index: 3, kind: input, shape index: {}]   ;;  %s7210_s4 = inlined_call_operand.vmem [shape: f32[1,4], index: 4, kind: input, shape index: {}]   ;;  %s7211_s5 = inlined_call_operand.<no memory space> [shape: f32[1,1], index: 5, kind: input, shape index: {}]   ;;  %s7212_s6 = inlined_call_operand.hbm [shape: f32[256,256], index: 6, kind: output, shape index: {}]  }
   0x1   :  { %v11_v0 = vstv %s7211_s5 }
   0x2   :  { %12 = vst [vmem:[#allocation2] sm:$0x1] %v11_v0 }
   0x3   :  { %13 = vsyncpa [#allocation4], 0 }
   0x4   :  { %14 = vsyncpa [#allocation7], 0  ;;  %s33_s25 = sshll.u32 %s7207_s1, 4  ;;  %s34_s25 = int_to_ptr.hbm [resolvable:$true] %s33_s25 }
   0x5   :  { %15 = vsyncpa [#allocation5], 0  ;;  %s4338_s26 = smov [#allocation6]   ;;  %s20_s30 = sshll.u32 %s7206_s0, 4  ;;  %s21_s30 = int_to_ptr.hbm [resolvable:$true] %s20_s30 }
   0x6   :  { %s35_s27 = sshll.u32 %s4338_s26, 4  ;;  %s4339_s7 = smov 256   ;;  %s36_s27 = int_to_ptr.vmem [resolvable:$true] %s35_s27 }
   0x7   :  { %s4340_s8 = smov 16   ;;  %s4341_s5 = smov [#allocation3]  }
   0x8   :  { %41 = dma.hbm_to_vmem [thread:$0]  %s34_s25, 8192, %s36_s27, [#allocation7], %s4339_s7, %s4339_s7, %s4340_s8  }
   0x9   :  { %s22_s9 = sshll.u32 %s4341_s5, 4  ;;  %s4342_s1 = smov 128   ;;  %s23_s9 = int_to_ptr.vmem [resolvable:$true] %s22_s9 }
   0xa   :  { %s4343_s10 = smov 8   ;;  %s46_s13 = sshll.u32 %s7208_s2, 4  ;;  %s47_s13 = int_to_ptr.hbm [resolvable:$true] %s46_s13 }
   0xb   :  { %28 = dma.hbm_to_vmem [thread:$0]  %s21_s30, 4096, %s23_s9, [#allocation4], %s4342_s1, %s4342_s1, %s4343_s10  }
   0xc   :  { %s4344_s14 = smov [#allocation8]  }
   0xd   :  { %s48_s0 = sshll.u32 %s4344_s14, 4  ;;  %s49_s0 = int_to_ptr.vmem [resolvable:$true] %s48_s0 }
   0xe   :  { %54 = dma.hbm_to_vmem [thread:$0]  %s47_s13, 1024, %s49_s0, [#allocation7], %s4342_s1, %s4342_s1, %s4343_s10  }
   0xf   :  { %4332 = dma.done.wait [#allocation4], 4096  }
  0x10   :  { %4333 = vsyncadd [#allocation4], 4294963200 }
  0x11   :  { %4334 = dma.done.wait [#allocation7], 9216  }
  0x12   :  { %4335 = vsyncadd [#allocation7], 4294958080  ;;  %v112_v1 = vld [vmem:[#allocation8 + $0x38] sm:$0xff]  ;;  %v111_v2 = vld [vmem:[#allocation8 + $0x30] sm:$0xff]  ;;  %vm117_vm0 = vcmask 523264   ;;  %vm459_vm3 = vcmask 31744  }
  0x13   :  { %222 = vmatpush.msra.mxu0 %v112_v1  ;;  %3748 = vmatpush.msra.mxu1 %v112_v1  ;;  %v110_v3 = vld [vmem:[#allocation8 + $0x28] sm:$0xff]  ;;  %v109_v4 = vld [vmem:[#allocation8 + $0x20] sm:$0xff]  ;;  %v108_v5 = vld [vmem:[#allocation8 + $0x18] sm:$0xff]  ;;  %s3606_s20 = sshll.u32 %s7212_s6, 4  ;;  %s3607_s20 = int_to_ptr.hbm [resolvable:$true] %s3606_s20 }
  0x14   :  { %3749 = vmatpush.msra.mxu2 %v112_v1  ;;  %3750 = vmatpush.msra.mxu3 %v112_v1  ;;  %v107_v6 = vld [vmem:[#allocation8 + $0x10] sm:$0xff]  ;;  %v106_v7 = vld [vmem:[#allocation8 + $0x8] sm:$0xff]  ;;  %v105_v8 = vld [vmem:[#allocation8] sm:$0xff] }
  0x15   :  { %223 = vmatpush.msra.mxu0 %v111_v2  ;;  %3751 = vmatpush.msra.mxu1 %v111_v2  ;;  %v73_v9 = vld [vmem:[#allocation3] sm:$0xff]  ;;  %v74_v13 = vld [vmem:[#allocation3 + $0x8] sm:$0xff]  ;;  %v75_v17 = vld [vmem:[#allocation3 + $0x10] sm:$0xff] }
  0x16   :  { %3752 = vmatpush.msra.mxu2 %v111_v2  ;;  %3753 = vmatpush.msra.mxu3 %v111_v2  ;;  %v81_v10 = vld [vmem:[#allocation3 + $0x40] sm:$0xff]  ;;  %v82_v14 = vld [vmem:[#allocation3 + $0x48] sm:$0xff]  ;;  %v83_v18 = vld [vmem:[#allocation3 + $0x50] sm:$0xff] }
  0x17   :  { %224 = vmatpush.msra.mxu0 %v110_v3  ;;  %3754 = vmatpush.msra.mxu1 %v110_v3  ;;  %v89_v11 = vld [vmem:[#allocation3 + $0x80] sm:$0xff]  ;;  %v90_v15 = vld [vmem:[#allocation3 + $0x88] sm:$0xff]  ;;  %v99_v19 = vld [vmem:[#allocation3 + $0xd0] sm:$0xff] }
  0x18   :  { %3755 = vmatpush.msra.mxu2 %v110_v3  ;;  %3756 = vmatpush.msra.mxu3 %v110_v3  ;;  %v97_v12 = vld [vmem:[#allocation3 + $0xc0] sm:$0xff]  ;;  %v98_v16 = vld [vmem:[#allocation3 + $0xc8] sm:$0xff]  ;;  %v91_v20 = vld [vmem:[#allocation3 + $0x90] sm:$0xff] }
  0x19   :  { %225 = vmatpush.msra.mxu0 %v109_v4  ;;  %3757 = vmatpush.msra.mxu1 %v109_v4  ;;  %v76_v21 = vld [vmem:[#allocation3 + $0x18] sm:$0xff]  ;;  %v77_v25 = vld [vmem:[#allocation3 + $0x20] sm:$0xff]  ;;  %v78_v29 = vld [vmem:[#allocation3 + $0x28] sm:$0xff] }
  0x1a   :  { %3758 = vmatpush.msra.mxu2 %v109_v4  ;;  %3759 = vmatpush.msra.mxu3 %v109_v4  ;;  %v84_v22 = vld [vmem:[#allocation3 + $0x58] sm:$0xff]  ;;  %v85_v26 = vld [vmem:[#allocation3 + $0x60] sm:$0xff]  ;;  %v86_v30 = vld [vmem:[#allocation3 + $0x68] sm:$0xff] }
  0x1b   :  { %226 = vmatpush.msra.mxu0 %v108_v5  ;;  %3760 = vmatpush.msra.mxu1 %v108_v5  ;;  %v92_v23 = vld [vmem:[#allocation3 + $0x98] sm:$0xff]  ;;  %v93_v27 = vld [vmem:[#allocation3 + $0xa0] sm:$0xff]  ;;  %v94_v31 = vld [vmem:[#allocation3 + $0xa8] sm:$0xff] }
  0x1c   :  { %3761 = vmatpush.msra.mxu2 %v108_v5  ;;  %3762 = vmatpush.msra.mxu3 %v108_v5  ;;  %v100_v24 = vld [vmem:[#allocation3 + $0xd8] sm:$0xff]  ;;  %v101_v28 = vld [vmem:[#allocation3 + $0xe0] sm:$0xff]  ;;  %v102_v32 = vld [vmem:[#allocation3 + $0xe8] sm:$0xff] }
  0x1d   :  { %227 = vmatpush.msra.mxu0 %v107_v6  ;;  %3763 = vmatpush.msra.mxu1 %v107_v6  ;;  %v79_v33 = vld [vmem:[#allocation3 + $0x30] sm:$0xff]  ;;  %v80_v37 = vld [vmem:[#allocation3 + $0x38] sm:$0xff] }
  0x1e   :  { %3764 = vmatpush.msra.mxu2 %v107_v6  ;;  %3765 = vmatpush.msra.mxu3 %v107_v6  ;;  %v87_v34 = vld [vmem:[#allocation3 + $0x70] sm:$0xff]  ;;  %v88_v38 = vld [vmem:[#allocation3 + $0x78] sm:$0xff] }
  0x1f   :  { %228 = vmatpush.msra.mxu0 %v106_v7  ;;  %3766 = vmatpush.msra.mxu1 %v106_v7  ;;  %v95_v35 = vld [vmem:[#allocation3 + $0xb0] sm:$0xff]  ;;  %v96_v39 = vld [vmem:[#allocation3 + $0xb8] sm:$0xff] }
  0x20   :  { %3767 = vmatpush.msra.mxu2 %v106_v7  ;;  %3768 = vmatpush.msra.mxu3 %v106_v7  ;;  %v103_v36 = vld [vmem:[#allocation3 + $0xf0] sm:$0xff]  ;;  %v104_v40 = vld [vmem:[#allocation3 + $0xf8] sm:$0xff] }
  0x21   :  { %229 = vmatpush.msra.mxu0 %v105_v8  ;;  %3769 = vmatpush.msra.mxu1 %v105_v8  ;;  %v4432_v41 = vld [vmem:[%s7209_s3] ss:$0 sm:$0xff]  ;;  %s4346_s3 = smov [#allocation9]  }
  0x22   :  { %3770 = vmatpush.msra.mxu2 %v105_v8  ;;  %3771 = vmatpush.msra.mxu3 %v105_v8  ;;  %v4439_v46 = vld [vmem:[%s7210_s4] ss:$0 sm:$0xff]  ;;  %s3604_s4 = sshll.u32 %s4346_s3, 4  ;;  %s3605_s4 = int_to_ptr.vmem [resolvable:$true] %s3604_s4 }
  0x23   :  { %3620 = vmatmul.msk.f32.vlgmr.msra.gmra.mxu0 %vm117_vm0, %v73_v9  ;;  %3628 = vmatmul.msk.f32.vlgmr.msra.gmra.mxu1 %vm117_vm0, %v81_v10 }
  0x24   :  { %3636 = vmatmul.msk.f32.vlgmr.msra.gmra.mxu2 %vm117_vm0, %v89_v11  ;;  %3644 = vmatmul.msk.f32.vlgmr.msra.gmra.mxu3 %vm117_vm0, %v97_v12 }
  0x2b   :  { %3621 = vmatmul.msk.f32.gmra.mxu0 %vm117_vm0, %v74_v13  ;;  %3629 = vmatmul.msk.f32.gmra.mxu1 %vm117_vm0, %v82_v14 }
  0x2c   :  { %3637 = vmatmul.msk.f32.gmra.mxu2 %vm117_vm0, %v90_v15  ;;  %3645 = vmatmul.msk.f32.gmra.mxu3 %vm117_vm0, %v98_v16 }
  0x33   :  { %3622 = vmatmul.msk.f32.gmra.mxu0 %vm117_vm0, %v75_v17  ;;  %3630 = vmatmul.msk.f32.gmra.mxu1 %vm117_vm0, %v83_v18 }
  0x34   :  { %3646 = vmatmul.msk.f32.gmra.mxu3 %vm117_vm0, %v99_v19  ;;  %3638 = vmatmul.msk.f32.gmra.mxu2 %vm117_vm0, %v91_v20 }
  0x3b   :  { %3623 = vmatmul.msk.f32.gmra.mxu0 %vm117_vm0, %v76_v21  ;;  %3631 = vmatmul.msk.f32.gmra.mxu1 %vm117_vm0, %v84_v22 }
  0x3c   :  { %3639 = vmatmul.msk.f32.gmra.mxu2 %vm117_vm0, %v92_v23  ;;  %3647 = vmatmul.msk.f32.gmra.mxu3 %vm117_vm0, %v100_v24 }
  0x43   :  { %3624 = vmatmul.msk.f32.gmra.mxu0 %vm117_vm0, %v77_v25  ;;  %3632 = vmatmul.msk.f32.gmra.mxu1 %vm117_vm0, %v85_v26 }
  0x44   :  { %3640 = vmatmul.msk.f32.gmra.mxu2 %vm117_vm0, %v93_v27  ;;  %3648 = vmatmul.msk.f32.gmra.mxu3 %vm117_vm0, %v101_v28 }
  0x4b   :  { %3625 = vmatmul.msk.f32.gmra.mxu0 %vm117_vm0, %v78_v29  ;;  %3633 = vmatmul.msk.f32.gmra.mxu1 %vm117_vm0, %v86_v30 }
  0x4c   :  { %3641 = vmatmul.msk.f32.gmra.mxu2 %vm117_vm0, %v94_v31  ;;  %3649 = vmatmul.msk.f32.gmra.mxu3 %vm117_vm0, %v102_v32 }
  0x53   :  { %3626 = vmatmul.msk.f32.gmra.mxu0 %vm117_vm0, %v79_v33  ;;  %3634 = vmatmul.msk.f32.gmra.mxu1 %vm117_vm0, %v87_v34 }
  0x54   :  { %3642 = vmatmul.msk.f32.gmra.mxu2 %vm117_vm0, %v95_v35  ;;  %3650 = vmatmul.msk.f32.gmra.mxu3 %vm117_vm0, %v103_v36 }
  0x5b   :  { %3627 = vmatmul.msk.f32.gmra.mxu0 %vm117_vm0, %v80_v37  ;;  %3635 = vmatmul.msk.f32.gmra.mxu1 %vm117_vm0, %v88_v38 }
  0x5c   :  { %3643 = vmatmul.msk.f32.gmra.mxu2 %vm117_vm0, %v96_v39  ;;  %3651 = vmatmul.msk.f32.gmra.mxu3 %vm117_vm0, %v104_v40 }
  0xa0   :  { %v231_v42 = vpop.f32.mrf.mxu0  ;;  %v255_v43 = vpop.f32.mrf.mxu1 }
  0xa1   :  { %v232_v44 = vadd.f32 %v4432_v41, %v231_v42  ;;  %v256_v45 = vadd.f32 %v4432_v41, %v255_v43 }
  0xa3   :  { %v359_v47 = vmul.f32 0.2, %v232_v44  ;;  %v367_v48 = vmul.f32 0.2, %v256_v45  ;;  %vm335_vm1 = vcmp.ge.f32.partialorder %v256_v45, 0.0  ;;  %vm327_vm2 = vcmp.ge.f32.partialorder %v232_v44, 0.0 }
  0xa5   :  { %v399_v49 = vsel %vm335_vm1, %v256_v45, %v367_v48  ;;  %v391_v50 = vsel %vm327_vm2, %v232_v44, %v359_v47 }
  0xa6   :  { %v435_v51 = vmul.f32 %v4439_v46, %v399_v49  ;;  %v427_v52 = vmul.f32 %v4439_v46, %v391_v50 }
  0xa7   :  { %v279_v53 = vpop.f32.mrf.mxu2  ;;  %v303_v54 = vpop.f32.mrf.mxu3 }
  0xa8   :  { %v280_v55 = vadd.f32 %v4432_v41, %v279_v53  ;;  %v304_v56 = vadd.f32 %v4432_v41, %v303_v54  ;;  %v484_v57 = vsel %vm459_vm3, %v435_v51, 0.0  ;;  %v460_v58 = vsel %vm459_vm3, %v427_v52, 0.0  ;;  %v234_v59 = vpop.f32.mrf.mxu0  ;;  %v258_v60 = vpop.f32.mrf.mxu1 }
  0xa9   :  { %485 = vadd.xlane.f32.xlu2 %v484_v57  ;;  %461 = vadd.xlane.f32.xlu0 %v460_v58  ;;  %v235_v61 = vadd.f32 %v4432_v41, %v234_v59  ;;  %v259_v13 = vadd.f32 %v4432_v41, %v258_v60 }
  0xaa   :  { %v375_v62 = vmul.f32 0.2, %v280_v55  ;;  %vm351_vm4 = vcmp.ge.f32.partialorder %v304_v56, 0.0  ;;  %v383_v63 = vmul.f32 0.2, %v304_v56  ;;  %vm343_vm5 = vcmp.ge.f32.partialorder %v280_v55, 0.0 }
  0xab   :  { %v360_v2 = vmul.f32 0.2, %v235_v61  ;;  %vm328_vm6 = vcmp.ge.f32.partialorder %v235_v61, 0.0  ;;  %v368_v22 = vmul.f32 0.2, %v259_v13  ;;  %vm336_vm10 = vcmp.ge.f32.partialorder %v259_v13, 0.0 }
  0xac   :  { %v407_v0 = vsel %vm343_vm5, %v280_v55, %v375_v62  ;;  %v415_v1 = vsel %vm351_vm4, %v304_v56, %v383_v63 }
  0xad   :  { %v443_v3 = vmul.f32 %v4439_v46, %v407_v0  ;;  %v451_v4 = vmul.f32 %v4439_v46, %v415_v1  ;;  %v392_v15 = vsel %vm328_vm6, %v235_v61, %v360_v2  ;;  %v400_v37 = vsel %vm336_vm10, %v259_v13, %v368_v22 }
  0xae   :  { %v428_v21 = vmul.f32 %v4439_v46, %v392_v15  ;;  %v436_v45 = vmul.f32 %v4439_v46, %v400_v37 }
  0xaf   :  { %v282_v5 = vpop.f32.mrf.mxu2  ;;  %v306_v6 = vpop.f32.mrf.mxu3  ;;  %v508_v7 = vsel %vm459_vm3, %v443_v3, 0.0  ;;  %v532_v10 = vsel %vm459_vm3, %v451_v4, 0.0 }
  0xb0   :  { %v283_v8 = vadd.f32 %v4432_v41, %v282_v5  ;;  %v307_v9 = vadd.f32 %v4432_v41, %v306_v6  ;;  %509 = vadd.xlane.f32.xlu1 %v508_v7  ;;  %v237_v11 = vpop.f32.mrf.mxu0  ;;  %v261_v12 = vpop.f32.mrf.mxu1  ;;  %v463_v31 = vsel %vm459_vm3, %v428_v21, 0.0  ;;  %v487_v55 = vsel %vm459_vm3, %v436_v45, 0.0 }
  0xb1   :  { %533 = vadd.xlane.f32.xlu0 %v532_v10  ;;  %v238_v14 = vadd.f32 %v4432_v41, %v237_v11  ;;  %v262_v25 = vadd.f32 %v4432_v41, %v261_v12 }
  0xb2   :  { %vm344_vm7 = vcmp.ge.f32.partialorder %v283_v8, 0.0  ;;  %v376_v16 = vmul.f32 0.2, %v283_v8  ;;  %vm352_vm8 = vcmp.ge.f32.partialorder %v307_v9, 0.0  ;;  %v384_v17 = vmul.f32 0.2, %v307_v9 }
  0xb3   :  { %v361_v18 = vmul.f32 0.2, %v238_v14  ;;  %vm329_vm9 = vcmp.ge.f32.partialorder %v238_v14, 0.0  ;;  %v369_v43 = vmul.f32 0.2, %v262_v25  ;;  %vm337_vm14 = vcmp.ge.f32.partialorder %v262_v25, 0.0 }
  0xb4   :  { %v416_v19 = vsel %vm352_vm8, %v307_v9, %v384_v17  ;;  %v408_v20 = vsel %vm344_vm7, %v283_v8, %v376_v16 }
  0xb5   :  { %v452_v23 = vmul.f32 %v4439_v46, %v416_v19  ;;  %v444_v24 = vmul.f32 %v4439_v46, %v408_v20  ;;  %v393_v35 = vsel %vm329_vm9, %v238_v14, %v361_v18  ;;  %v401_v57 = vsel %vm337_vm14, %v262_v25, %v369_v43 }
  0xb6   :  { %v429_v42 = vmul.f32 %v4439_v46, %v393_v35  ;;  %v437_v0 = vmul.f32 %v4439_v46, %v401_v57 }
  0xb7   :  { %v309_v26 = vpop.f32.mrf.mxu3  ;;  %v535_v27 = vsel %vm459_vm3, %v452_v23, 0.0  ;;  %v511_v28 = vsel %vm459_vm3, %v444_v24, 0.0  ;;  %v285_v29 = vpop.f32.mrf.mxu2 }
  0xb8   :  { %v310_v30 = vadd.f32 %v4432_v41, %v309_v26  ;;  %536 = vadd.xlane.f32.xlu1 %v535_v27  ;;  %512 = vadd.xlane.f32.xlu2 %v511_v28  ;;  %v240_v32 = vpop.f32.mrf.mxu0  ;;  %v264_v33 = vpop.f32.mrf.mxu1  ;;  %v286_v34 = vadd.f32 %v4432_v41, %v285_v29  ;;  %v466_v50 = vsel %vm459_vm3, %v429_v42, 0.0  ;;  %v490_v8 = vsel %vm459_vm3, %v437_v0, 0.0 }
  0xb9   :  { %464 = vadd.xlane.f32.xlu0 %v463_v31  ;;  %v265_v36 = vadd.f32 %v4432_v41, %v264_v33  ;;  %v241_v54 = vadd.f32 %v4432_v41, %v240_v32 }
  0xba   :  { %vm353_vm11 = vcmp.ge.f32.partialorder %v310_v30, 0.0  ;;  %v385_v38 = vmul.f32 0.2, %v310_v30  ;;  %v377_v40 = vmul.f32 0.2, %v286_v34  ;;  %vm345_vm13 = vcmp.ge.f32.partialorder %v286_v34, 0.0 }
  0xbb   :  { %vm338_vm12 = vcmp.ge.f32.partialorder %v265_v36, 0.0  ;;  %v370_v39 = vmul.f32 0.2, %v265_v36  ;;  %v362_v2 = vmul.f32 0.2, %v241_v54  ;;  %vm330_vm1 = vcmp.ge.f32.partialorder %v241_v54, 0.0 }
  0xbc   :  { %v417_v44 = vsel %vm353_vm11, %v310_v30, %v385_v38  ;;  %v409_v53 = vsel %vm345_vm13, %v286_v34, %v377_v40 }
  0xbd   :  { %v453_v47 = vmul.f32 %v4439_v46, %v417_v44  ;;  %v402_v48 = vsel %vm338_vm12, %v265_v36, %v370_v39  ;;  %v445_v62 = vmul.f32 %v4439_v46, %v409_v53  ;;  %v394_v14 = vsel %vm330_vm1, %v241_v54, %v362_v2 }
  0xbe   :  { %v438_v61 = vmul.f32 %v4439_v46, %v402_v48  ;;  %v430_v22 = vmul.f32 %v4439_v46, %v394_v14 }
  0xbf   :  { %v538_v49 = vsel %vm459_vm3, %v453_v47, 0.0  ;;  %v288_v51 = vpop.f32.mrf.mxu2  ;;  %v312_v52 = vpop.f32.mrf.mxu3  ;;  %v514_v6 = vsel %vm459_vm3, %v445_v62, 0.0 }
  0xc0   :  { %539 = vadd.xlane.f32.xlu2 %v538_v49  ;;  %467 = vadd.xlane.f32.xlu1 %v466_v50  ;;  %v243_v56 = vpop.f32.mrf.mxu0  ;;  %v313_v58 = vadd.f32 %v4432_v41, %v312_v52  ;;  %v267_v59 = vpop.f32.mrf.mxu1  ;;  %v289_v3 = vadd.f32 %v4432_v41, %v288_v51  ;;  %v493_v5 = vsel %vm459_vm3, %v438_v61, 0.0  ;;  %v469_v33 = vsel %vm459_vm3, %v430_v22, 0.0 }
  0xc1   :  { %488 = vadd.xlane.f32.xlu0 %v487_v55  ;;  %v244_v60 = vadd.f32 %v4432_v41, %v243_v56  ;;  %v268_v4 = vadd.f32 %v4432_v41, %v267_v59 }
  0xc2   :  { %v386_v1 = vmul.f32 0.2, %v313_v58  ;;  %vm354_vm0 = vcmp.ge.f32.partialorder %v313_v58, 0.0  ;;  %v378_v12 = vmul.f32 0.2, %v289_v3  ;;  %vm346_vm2 = vcmp.ge.f32.partialorder %v289_v3, 0.0 }
  0xc3   :  { %vm331_vm15 = vcmp.ge.f32.partialorder %v244_v60, 0.0  ;;  %v363_v63 = vmul.f32 0.2, %v244_v60  ;;  %v371_v15 = vmul.f32 0.2, %v268_v4  ;;  %vm339_vm4 = vcmp.ge.f32.partialorder %v268_v4, 0.0 }
  0xc4   :  { %v418_v10 = vsel %vm354_vm0, %v313_v58, %v386_v1  ;;  %v410_v26 = vsel %vm346_vm2, %v289_v3, %v378_v12 }
  0xc5   :  { %v395_v7 = vsel %vm331_vm15, %v244_v60, %v363_v63  ;;  %v454_v21 = vmul.f32 %v4439_v46, %v418_v10  ;;  %v403_v27 = vsel %vm339_vm4, %v268_v4, %v371_v15  ;;  %v446_v34 = vmul.f32 %v4439_v46, %v410_v26 }
  0xc6   :  { %v431_v18 = vmul.f32 %v4439_v46, %v395_v7  ;;  %v439_v36 = vmul.f32 %v4439_v46, %v403_v27 }
  0xc7   :  { %v291_v9 = vpop.f32.mrf.mxu2  ;;  %v315_v11 = vpop.f32.mrf.mxu3  ;;  %v541_v30 = vsel %vm459_vm3, %v454_v21, 0.0  ;;  %v517_v63 = vsel %vm459_vm3, %v446_v34, 0.0 }
  0xc8   :  { %494 = vadd.xlane.f32.xlu2 %v493_v5  ;;  %491 = vadd.xlane.f32.xlu1 %v490_v8  ;;  %v292_v13 = vadd.f32 %v4432_v41, %v291_v9  ;;  %v246_v16 = vpop.f32.mrf.mxu0  ;;  %v270_v17 = vpop.f32.mrf.mxu1  ;;  %v316_v24 = vadd.f32 %v4432_v41, %v315_v11  ;;  %v472_v28 = vsel %vm459_vm3, %v431_v18, 0.0  ;;  %v496_v59 = vsel %vm459_vm3, %v439_v36, 0.0 }
  0xc9   :  { %515 = vadd.xlane.f32.xlu0 %v514_v6  ;;  %v271_v19 = vadd.f32 %v4432_v41, %v270_v17  ;;  %v247_v25 = vadd.f32 %v4432_v41, %v246_v16 }
  0xca   :  { %v379_v20 = vmul.f32 0.2, %v292_v13  ;;  %vm347_vm5 = vcmp.ge.f32.partialorder %v292_v13, 0.0  ;;  %v387_v38 = vmul.f32 0.2, %v316_v24  ;;  %vm355_vm12 = vcmp.ge.f32.partialorder %v316_v24, 0.0 }
  0xcb   :  { %vm340_vm6 = vcmp.ge.f32.partialorder %v271_v19, 0.0  ;;  %v372_v23 = vmul.f32 0.2, %v271_v19  ;;  %v364_v39 = vmul.f32 0.2, %v247_v25  ;;  %vm332_vm7 = vcmp.ge.f32.partialorder %v247_v25, 0.0 }
  0xcc   :  { %v411_v31 = vsel %vm347_vm5, %v292_v13, %v379_v20  ;;  %v419_v1 = vsel %vm355_vm12, %v316_v24, %v387_v38 }
  0xcd   :  { %v404_v29 = vsel %vm340_vm6, %v271_v19, %v372_v23  ;;  %v447_v45 = vmul.f32 %v4439_v46, %v411_v31  ;;  %v396_v53 = vsel %vm332_vm7, %v247_v25, %v364_v39  ;;  %v455_v15 = vmul.f32 %v4439_v46, %v419_v1 }
  0xce   :  { %v4495_v32 = vmul.f32 %v4439_v46, %v404_v29  ;;  %v432_v0 = vmul.f32 %v4439_v46, %v396_v53 }
  0xcf   :  { %v294_v35 = vpop.f32.mrf.mxu2  ;;  %v318_v37 = vpop.f32.mrf.mxu3  ;;  %v520_v55 = vsel %vm459_vm3, %v447_v45, 0.0  ;;  %v544_v26 = vsel %vm459_vm3, %v455_v15, 0.0 }
  0xd0   :  { %473 = vadd.xlane.f32.xlu2 %v472_v28  ;;  %470 = vadd.xlane.f32.xlu1 %v469_v33  ;;  %v295_v40 = vadd.f32 %v4432_v41, %v294_v35  ;;  %v319_v42 = vadd.f32 %v4432_v41, %v318_v37  ;;  %v249_v43 = vpop.f32.mrf.mxu0  ;;  %v273_v44 = vpop.f32.mrf.mxu1  ;;  %v475_v17 = vsel %vm459_vm3, %v432_v0, 0.0 }
  0xd1   :  { %542 = vadd.xlane.f32.xlu0 %v541_v30  ;;  %v250_v47 = vadd.f32 %v4432_v41, %v249_v43  ;;  %v274_v48 = vadd.f32 %v4432_v41, %v273_v44  ;;  %v499_v44 = vsel %vm459_vm3, %v4495_v32, 0.0 }
  0xd2   :  { %vm348_vm8 = vcmp.ge.f32.partialorder %v295_v40, 0.0  ;;  %v380_v49 = vmul.f32 0.2, %v295_v40  ;;  %vm356_vm9 = vcmp.ge.f32.partialorder %v319_v42, 0.0  ;;  %v388_v50 = vmul.f32 0.2, %v319_v42 }
  0xd3   :  { %vm333_vm10 = vcmp.ge.f32.partialorder %v250_v47, 0.0  ;;  %v365_v51 = vmul.f32 0.2, %v250_v47  ;;  %vm341_vm11 = vcmp.ge.f32.partialorder %v274_v48, 0.0  ;;  %v373_v52 = vmul.f32 0.2, %v274_v48 }
  0xd4   :  { %v420_v54 = vsel %vm356_vm9, %v319_v42, %v388_v50  ;;  %v412_v60 = vsel %vm348_vm8, %v295_v40, %v380_v49  ;;  %v4541_v49 = vld [vmem:[#allocation2] ss:$0 sm:$0xff] }
  0xd5   :  { %v456_v56 = vmul.f32 %v4439_v46, %v420_v54  ;;  %v397_v57 = vsel %vm333_vm10, %v250_v47, %v365_v51  ;;  %v405_v58 = vsel %vm341_vm11, %v274_v48, %v373_v52  ;;  %v448_v10 = vmul.f32 %v4439_v46, %v412_v60 }
  0xd6   :  { %v433_v61 = vmul.f32 %v4439_v46, %v397_v57  ;;  %v441_v62 = vmul.f32 %v4439_v46, %v405_v58  ;;  %v4345_v54 = vmov 0  }
  0xd7   :  { %v297_v2 = vpop.f32.mrf.mxu2  ;;  %v321_v3 = vpop.f32.mrf.mxu3  ;;  %v523_v24 = vsel %vm459_vm3, %v448_v10, 0.0  ;;  %v547_v43 = vsel %vm459_vm3, %v456_v56, 0.0  ;;  %3782 = vset.pattern.permute.xlu0 %v4345_v54  ;;  %3781 = vset.pattern.permute.xlu2 %v4345_v54 }
  0xd8   :  { %521 = vadd.xlane.f32.xlu2 %v520_v55  ;;  %518 = vadd.xlane.f32.xlu1 %v517_v63  ;;  %v298_v4 = vadd.f32 %v4432_v41, %v297_v2  ;;  %v322_v5 = vadd.f32 %v4432_v41, %v321_v3  ;;  %v478_v6 = vsel %vm459_vm3, %v433_v61, 0.0  ;;  %v252_v7 = vpop.f32.mrf.mxu0  ;;  %v502_v8 = vsel %vm459_vm3, %v441_v62, 0.0  ;;  %v276_v9 = vpop.f32.mrf.mxu1 }
  0xd9   :  { %497 = vadd.xlane.f32.xlu0 %v496_v59  ;;  %v253_v11 = vadd.f32 %v4432_v41, %v252_v7  ;;  %v277_v12 = vadd.f32 %v4432_v41, %v276_v9  ;;  %3783 = vset.pattern.permute.xlu1 %v4345_v54 }
  0xda   :  { %vm349_vm13 = vcmp.ge.f32.partialorder %v298_v4, 0.0  ;;  %v381_v13 = vmul.f32 0.2, %v298_v4  ;;  %vm357_vm14 = vcmp.ge.f32.partialorder %v322_v5, 0.0  ;;  %v389_v14 = vmul.f32 0.2, %v322_v5 }
  0xdb   :  { %vm334_vm15 = vcmp.ge.f32.partialorder %v253_v11, 0.0  ;;  %v366_v16 = vmul.f32 0.2, %v253_v11  ;;  %v374_v20 = vmul.f32 0.2, %v277_v12  ;;  %vm342_vm0 = vcmp.ge.f32.partialorder %v277_v12, 0.0 }
  0xdc   :  { %v413_v18 = vsel %vm349_vm13, %v298_v4, %v381_v13  ;;  %v421_v19 = vsel %vm357_vm14, %v322_v5, %v389_v14 }
  0xdd   :  { %v449_v21 = vmul.f32 %v4439_v46, %v413_v18  ;;  %v457_v22 = vmul.f32 %v4439_v46, %v421_v19  ;;  %v398_v23 = vsel %vm334_vm15, %v253_v11, %v366_v16  ;;  %v406_v35 = vsel %vm342_vm0, %v277_v12, %v374_v20 }
  0xde   :  { %v434_v25 = vmul.f32 %v4439_v46, %v398_v23  ;;  %v442_v36 = vmul.f32 %v4439_v46, %v406_v35 }
  0xdf   :  { %v300_v27 = vpop.f32.mrf.mxu2  ;;  %v526_v28 = vsel %vm459_vm3, %v449_v21, 0.0  ;;  %v550_v29 = vsel %vm459_vm3, %v457_v22, 0.0  ;;  %v324_v30 = vpop.f32.mrf.mxu3 }
  0xe0   :  { %476 = vadd.xlane.f32.xlu2 %v475_v17  ;;  %545 = vadd.xlane.f32.xlu1 %v544_v26  ;;  %v301_v31 = vadd.f32 %v4432_v41, %v300_v27  ;;  %v325_v33 = vadd.f32 %v4432_v41, %v324_v30  ;;  %v481_v34 = vsel %vm459_vm3, %v434_v25, 0.0  ;;  %v505_v39 = vsel %vm459_vm3, %v442_v36, 0.0 }
  0xe1   :  { %524 = vadd.xlane.f32.xlu0 %v523_v24 }
  0xe2   :  { %vm350_vm1 = vcmp.ge.f32.partialorder %v301_v31, 0.0  ;;  %v382_v37 = vmul.f32 0.2, %v301_v31  ;;  %vm358_vm2 = vcmp.ge.f32.partialorder %v325_v33, 0.0  ;;  %v390_v38 = vmul.f32 0.2, %v325_v33 }
  0xe4   :  { %v414_v40 = vsel %vm350_vm1, %v301_v31, %v382_v37  ;;  %v422_v42 = vsel %vm358_vm2, %v325_v33, %v390_v38 }
  0xe5   :  { %v450_v41 = vmul.f32 %v4439_v46, %v414_v40  ;;  %v458_v45 = vmul.f32 %v4439_v46, %v422_v42 }
  0xe7   :  { %v529_v47 = vsel %vm459_vm3, %v450_v41, 0.0  ;;  %v553_v48 = vsel %vm459_vm3, %v458_v45, 0.0 }
  0xe8   :  { %548 = vadd.xlane.f32.xlu2 %v547_v43  ;;  %500 = vadd.xlane.f32.xlu1 %v499_v44 }
  0xe9   :  { %479 = vadd.xlane.f32.xlu0 %v478_v6 }
  0xf0   :  { %503 = vadd.xlane.f32.xlu2 %v502_v8  ;;  %527 = vadd.xlane.f32.xlu1 %v526_v28 }
  0xf1   :  { %551 = vadd.xlane.f32.xlu0 %v550_v29 }
  0xf8   :  { %530 = vadd.xlane.f32.xlu2 %v529_v47  ;;  %482 = vadd.xlane.f32.xlu1 %v481_v34 }
  0xf9   :  { %506 = vadd.xlane.f32.xlu0 %v505_v39 }
 0x100   :  { %554 = vadd.xlane.f32.xlu1 %v553_v48 }
 0x11c   :  { %v486_v32 = vpop.xlane.xlu2 %485  ;;  %v462_v50 = vpop.xlane.xlu0 %461 }
 0x11d   :  { %v568_v46 = vadd.f32 %v4541_v49, %v486_v32  ;;  %v560_v51 = vadd.f32 %v4541_v49, %v462_v50 }
 0x11f   :  { %v3660_v52 = vmul.f32 -1.442695, %v568_v46  ;;  %v3652_v53 = vmul.f32 -1.442695, %v560_v51 }
 0x121   :  { %3787 = vpow2.f32 %v3660_v52 }
 0x122   :  { %3789 = vpow2.f32 %v3652_v53 }
 0x123   :  { %v510_v55 = vpop.xlane.xlu1 %509 }
 0x124   :  { %v576_v56 = vadd.f32 %v4541_v49, %v510_v55  ;;  %v534_v57 = vpop.xlane.xlu0 %533 }
 0x125   :  { %v584_v58 = vadd.f32 %v4541_v49, %v534_v57 }
 0x126   :  { %v3668_v59 = vmul.f32 -1.442695, %v576_v56 }
 0x127   :  { %v3788_v60 = vpop.eup %3787  ;;  %v3676_v61 = vmul.f32 -1.442695, %v584_v58 }
 0x128   :  { %v3790_v62 = vpop.eup %3789  ;;  %v696_v63 = vadd.f32 1.0, %v3788_v60  ;;  %3791 = vpow2.f32 %v3668_v59 }
 0x129   :  { %v4547_v0 = vadd.f32 1.0, %v3790_v62  ;;  %3793 = vpow2.f32 %v3676_v61 }
 0x12a   :  { %3795 = vrcp.f32 %v696_v63  ;;  %v849_v7 = vand.u32 2147483647, %v696_v63  ;;  %v851_v8 = vand.u32 2147483648, %v696_v63  ;;  %vm845_vm3 = vweird.f32 %v696_v63 }
 0x12b   :  { %3797 = vrcp.f32 %v4547_v0  ;;  %v537_v1 = vpop.xlane.xlu1 %536  ;;  %v513_v2 = vpop.xlane.xlu2 %512  ;;  %v729_v11 = vand.u32 2147483647, %v4547_v0  ;;  %v731_v12 = vand.u32 2147483648, %v4547_v0  ;;  %vm725_vm4 = vweird.f32 %v4547_v0 }
 0x12c   :  { %v585_v3 = vadd.f32 %v4541_v49, %v537_v1  ;;  %v577_v4 = vadd.f32 %v4541_v49, %v513_v2  ;;  %v465_v5 = vpop.xlane.xlu0 %464  ;;  %vm4561_vm5 = vcmp.eq.f32.partialorder %v849_v7, 8.507059e+37  ;;  %v852_v22 = vor.u32 1.1754944e-38, %v851_v8 }
 0x12d   :  { %v561_v6 = vadd.f32 %v4541_v49, %v465_v5  ;;  %vm4567_vm6 = vcmp.eq.f32.partialorder %v729_v11, 8.507059e+37  ;;  %v732_v25 = vor.u32 1.1754944e-38, %v731_v12 }
 0x12e   :  { %v3792_v9 = vpop.eup %3791  ;;  %v3677_v10 = vmul.f32 -1.442695, %v585_v3  ;;  %v3669_v15 = vmul.f32 -1.442695, %v577_v4 }
 0x12f   :  { %v3794_v13 = vpop.eup %3793  ;;  %v4555_v14 = vadd.f32 1.0, %v3792_v9  ;;  %v3653_v18 = vmul.f32 -1.442695, %v561_v6 }
 0x130   :  { %v3796_v16 = vpop.eup %3795  ;;  %v4557_v17 = vadd.f32 1.0, %v3794_v13  ;;  %3799 = vpow2.f32 %v3677_v10 }
 0x131   :  { %v3798_v19 = vpop.eup %3797  ;;  %v841_v20 = vmul.f32 %v3796_v16, %v696_v63  ;;  %3801 = vrcp.f32 %v4555_v14  ;;  %vm846_vm7 = vweird.f32 %v3796_v16  ;;  %v971_v29 = vand.u32 2147483648, %v4555_v14 }
 0x132   :  { %v721_v23 = vmul.f32 %v3798_v19, %v4547_v0  ;;  %3803 = vrcp.f32 %v4557_v17  ;;  %vm726_vm8 = vweird.f32 %v3798_v19  ;;  %v969_v37 = vand.u32 2147483647, %v4555_v14  ;;  %vm4577_vm9 = vmor %vm845_vm3, %vm846_vm7 }
 0x133   :  { %3805 = vpow2.f32 %v3669_v15  ;;  %v540_v26 = vpop.xlane.xlu2 %539  ;;  %v468_v27 = vpop.xlane.xlu1 %467  ;;  %v842_v28 = vsub.f32 1.0, %v841_v20  ;;  %v4581_v44 = vor.u32 1.1754944e-38, %v971_v29  ;;  %v1089_v32 = vand.u32 2147483647, %v4557_v17  ;;  %vm727_vm10 = vmor %vm725_vm4, %vm726_vm8 }
 0x134   :  { %3807 = vpow2.f32 %v3653_v18  ;;  %v586_v30 = vadd.f32 %v4541_v49, %v540_v26  ;;  %v562_v31 = vadd.f32 %v4541_v49, %v468_v27  ;;  %v489_v33 = vpop.xlane.xlu0 %488  ;;  %v722_v34 = vsub.f32 1.0, %v721_v23 }
 0x135   :  { %v569_v35 = vadd.f32 %v4541_v49, %v489_v33  ;;  %v843_v36 = vmul.f32 %v3796_v16, %v842_v28  ;;  %v1091_v52 = vand.u32 2147483648, %v4557_v17  ;;  %vm965_vm11 = vweird.f32 %v4555_v14 }
 0x136   :  { %v3800_v38 = vpop.eup %3799  ;;  %v3678_v39 = vmul.f32 -1.442695, %v586_v30  ;;  %v3654_v40 = vmul.f32 -1.442695, %v562_v31  ;;  %v723_v43 = vmul.f32 %v3798_v19, %v722_v34  ;;  %vm1085_vm13 = vweird.f32 %v4557_v17 }
 0x137   :  { %v4583_v41 = vpop.eup %3801  ;;  %v4585_v45 = vadd.f32 1.0, %v3800_v38  ;;  %v3661_v47 = vmul.f32 -1.442695, %v569_v35  ;;  %v844_v48 = vadd.f32 %v3796_v16, %v843_v36  ;;  %vm4615_vm14 = vcmp.eq.f32.partialorder %v969_v37, 8.507059e+37 }
 0x138   :  { %v4588_v50 = vpop.eup %3803  ;;  %v961_v46 = vmul.f32 %v4583_v41, %v4555_v14  ;;  %3809 = vpow2.f32 %v3678_v39  ;;  %v724_v51 = vadd.f32 %v3798_v19, %v723_v43  ;;  %vm966_vm12 = vweird.f32 %v4583_v41 }
 0x139   :  { %v3806_v53 = vpop.eup %3805  ;;  %v1081_v54 = vmul.f32 %v4588_v50, %v4557_v17  ;;  %3811 = vrcp.f32 %v4585_v45  ;;  %v848_v55 = vsel %vm4577_vm9, %v3796_v16, %v844_v48  ;;  %vm1086_vm15 = vweird.f32 %v4588_v50  ;;  %vm4647_vm2 = vmor %vm965_vm11, %vm966_vm12 }
 0x13a   :  { %v3808_v56 = vpop.eup %3807  ;;  %v4603_v57 = vadd.f32 1.0, %v3806_v53  ;;  %3813 = vpow2.f32 %v3654_v40  ;;  %v853_v58 = vsel %vm4561_vm5, %v852_v22, %v848_v55  ;;  %v728_v59 = vsel %vm727_vm10, %v3798_v19, %v724_v51  ;;  %vm1087_vm4 = vmor %vm1085_vm13, %vm1086_vm15 }
 0x13b   :  { %v4607_v60 = vadd.f32 1.0, %v3808_v56  ;;  %3815 = vpow2.f32 %v3661_v47  ;;  %v495_v61 = vpop.xlane.xlu2 %494  ;;  %v492_v62 = vpop.xlane.xlu1 %491  ;;  %v1208_v63 = vmul.f32 0.5, %v853_v58  ;;  %v733_v0 = vsel %vm4567_vm6, %v732_v25, %v728_v59 }
 0x13c   :  { %3817 = vrcp.f32 %v4603_v57  ;;  %v571_v1 = vadd.f32 %v4541_v49, %v495_v61  ;;  %v570_v2 = vadd.f32 %v4541_v49, %v492_v62  ;;  %v516_v3 = vpop.xlane.xlu0 %515  ;;  %v1200_v4 = vmul.f32 0.5, %v733_v0 }
 0x13d   :  { %3819 = vrcp.f32 %v4607_v60  ;;  %v578_v6 = vadd.f32 %v4541_v49, %v516_v3  ;;  %v1240_v7 = vadd.f32 0.4, %v1208_v63  ;;  %v962_v8 = vsub.f32 1.0, %v961_v46 }
 0x13e   :  { %v3810_v9 = vpop.eup %3809  ;;  %v3663_v10 = vmul.f32 -1.442695, %v571_v1  ;;  %v3662_v11 = vmul.f32 -1.442695, %v570_v2  ;;  %v1232_v12 = vadd.f32 0.4, %v1200_v4  ;;  %vm1100_vm1 = vweird.f32 %v4585_v45 }
 0x13f   :  { %v4622_v13 = vpop.eup %3811  ;;  %v4624_v15 = vadd.f32 1.0, %v3810_v9  ;;  %v3670_v16 = vmul.f32 -1.442695, %v578_v6  ;;  %1370 = vperm.xlu0 %3782, %v1240_v7   ;;  %v963_v18 = vmul.f32 %v4583_v41, %v962_v8  ;;  %v1082_v19 = vsub.f32 1.0, %v1081_v54 }
 0x140   :  { %v3814_v20 = vpop.eup %3813  ;;  %v1096_v21 = vmul.f32 %v4622_v13, %v4585_v45  ;;  %3821 = vpow2.f32 %v3663_v10  ;;  %1330 = vperm.xlu2 %3781, %v1232_v12   ;;  %vm4629_vm0 = vcmp.eq.f32.partialorder %v1089_v32, 8.507059e+37  ;;  %v1092_v23 = vor.u32 1.1754944e-38, %v1091_v52 }
 0x141   :  { %v3816_v24 = vpop.eup %3815  ;;  %3823 = vrcp.f32 %v4624_v15  ;;  %v4634_v25 = vadd.f32 1.0, %v3814_v20  ;;  %v964_v26 = vadd.f32 %v4583_v41, %v963_v18  ;;  %v1083_v27 = vmul.f32 %v4588_v50, %v1082_v19 }
 0x142   :  { %v4639_v28 = vpop.eup %3817  ;;  %v4641_v29 = vadd.f32 1.0, %v3816_v24  ;;  %3825 = vpow2.f32 %v3662_v11  ;;  %v1097_v31 = vsub.f32 1.0, %v1096_v21  ;;  %vm1101_vm3 = vweird.f32 %v4622_v13 }
 0x143   :  { %v4652_v33 = vpop.eup %3819  ;;  %v4656_v34 = vmul.f32 %v4639_v28, %v4603_v57  ;;  %3827 = vrcp.f32 %v4634_v25  ;;  %v474_v35 = vpop.xlane.xlu2 %473  ;;  %v968_v14 = vsel %vm4647_vm2, %v4583_v41, %v964_v26  ;;  %v1084_v37 = vadd.f32 %v4588_v50, %v1083_v27  ;;  %vm4705_vm5 = vmor %vm1100_vm1, %vm1101_vm3 }
 0x144   :  { %v471_v36 = vpop.xlane.xlu1 %470  ;;  %v736_v38 = vmul.f32 %v4652_v33, %v4607_v60  ;;  %3829 = vrcp.f32 %v4641_v29  ;;  %v564_v39 = vadd.f32 %v4541_v49, %v474_v35  ;;  %v543_v42 = vpop.xlane.xlu0 %542  ;;  %v973_v41 = vsel %vm4615_vm14, %v4581_v44, %v968_v14 }
 0x145   :  { %v563_v40 = vadd.f32 %v4541_v49, %v471_v36  ;;  %3831 = vpow2.f32 %v3670_v16  ;;  %v587_v43 = vadd.f32 %v4541_v49, %v543_v42  ;;  %v1088_v47 = vsel %vm1087_vm4, %v4588_v50, %v1084_v37 }
 0x146   :  { %v3822_v48 = vpop.eup %3821  ;;  %v3656_v32 = vmul.f32 -1.442695, %v564_v39  ;;  %v1216_v51 = vmul.f32 0.5, %v973_v41  ;;  %v1093_v52 = vsel %vm4629_vm0, %v1092_v23, %v1088_v47  ;;  %v1098_v56 = vmul.f32 %v4622_v13, %v1097_v31 }
 0x147   :  { %v3655_v46 = vmul.f32 -1.442695, %v563_v40  ;;  %v4679_v53 = vpop.eup %3823  ;;  %v4681_v17 = vadd.f32 1.0, %v3822_v48  ;;  %v3679_v54 = vmul.f32 -1.442695, %v587_v43  ;;  %v1224_v55 = vmul.f32 0.5, %v1093_v52 }
 0x148   :  { %v3826_v58 = vpop.eup %3825  ;;  %v4686_v44 = vmul.f32 %v4679_v53, %v4624_v15  ;;  %3833 = vpow2.f32 %v3656_v32  ;;  %v1248_v50 = vadd.f32 0.4, %v1216_v51  ;;  %v1104_v59 = vand.u32 2147483647, %v4585_v45 }
 0x149   :  { %v4689_v61 = vpop.eup %3827  ;;  %3835 = vrcp.f32 %v4681_v17  ;;  %v4692_v62 = vadd.f32 1.0, %v3826_v58  ;;  %v1256_v63 = vadd.f32 0.4, %v1224_v55  ;;  %v1099_v0 = vadd.f32 %v4622_v13, %v1098_v56 }
 0x14a   :  { %v4695_v1 = vpop.eup %3829  ;;  %v4699_v2 = vmul.f32 %v4689_v61, %v4634_v25  ;;  %3837 = vpow2.f32 %v3655_v46  ;;  %1410 = vperm.xlu1 %3783, %v1248_v50   ;;  %vm4709_vm6 = vcmp.eq.f32.partialorder %v1104_v59, 8.507059e+37  ;;  %v1106_v5 = vand.u32 2147483648, %v4585_v45 }
 0x14b   :  { %v3832_v6 = vpop.eup %3831  ;;  %v4716_v7 = vmul.f32 %v4695_v1, %v4641_v29  ;;  %3839 = vrcp.f32 %v4692_v62  ;;  %1450 = vperm.xlu2 %3781, %v1256_v63   ;;  %v522_v8 = vpop.xlane.xlu2 %521  ;;  %v1103_v10 = vsel %vm4705_vm5, %v4622_v13, %v1099_v0  ;;  %v737_v11 = vsub.f32 1.0, %v736_v38 }
 0x14c   :  { %v519_v9 = vpop.xlane.xlu1 %518  ;;  %v4722_v12 = vadd.f32 1.0, %v3832_v6  ;;  %3841 = vpow2.f32 %v3679_v54  ;;  %v580_v45 = vadd.f32 %v4541_v49, %v522_v8  ;;  %v498_v18 = vpop.xlane.xlu0 %497  ;;  %v1107_v20 = vor.u32 1.1754944e-38, %v1106_v5 }
 0x14d   :  { %v579_v16 = vadd.f32 %v4541_v49, %v519_v9  ;;  %v572_v19 = vadd.f32 %v4541_v49, %v498_v18  ;;  %v738_v21 = vmul.f32 %v4652_v33, %v737_v11  ;;  %vm740_vm7 = vweird.f32 %v4607_v60 }
 0x14e   :  { %v3834_v22 = vpop.eup %3833  ;;  %3843 = vrcp.f32 %v4722_v12  ;;  %v3672_v13 = vmul.f32 -1.442695, %v580_v45  ;;  %vm741_vm8 = vweird.f32 %v4652_v33  ;;  %v1108_v30 = vsel %vm4709_vm6, %v1107_v20, %v1103_v10 }
 0x14f   :  { %v3671_v23 = vmul.f32 -1.442695, %v579_v16  ;;  %v4731_v24 = vpop.eup %3835  ;;  %v4733_v26 = vadd.f32 1.0, %v3834_v22  ;;  %v3664_v27 = vmul.f32 -1.442695, %v572_v19  ;;  %v739_v31 = vadd.f32 %v4652_v33, %v738_v21  ;;  %vm4744_vm9 = vmor %vm740_vm7, %vm741_vm8 }
 0x150   :  { %v3838_v35 = vpop.eup %3837  ;;  %v4740_v36 = vmul.f32 %v4731_v24, %v4681_v17  ;;  %3845 = vpow2.f32 %v3672_v13  ;;  %v1225_v14 = vmul.f32 0.5, %v1108_v30  ;;  %v744_v38 = vand.u32 2147483647, %v4607_v60 }
 0x151   :  { %v4749_v39 = vpop.eup %3839  ;;  %3847 = vrcp.f32 %v4733_v26  ;;  %v4752_v40 = vadd.f32 1.0, %v3838_v35  ;;  %v743_v42 = vsel %vm4744_vm9, %v4652_v33, %v739_v31  ;;  %v746_v43 = vand.u32 2147483648, %v4607_v60 }
 0x152   :  { %v3842_v41 = vpop.eup %3841  ;;  %v4760_v47 = vmul.f32 %v4749_v39, %v4692_v62  ;;  %3849 = vpow2.f32 %v3671_v23  ;;  %v1257_v48 = vadd.f32 0.4, %v1225_v14  ;;  %vm4762_vm10 = vcmp.eq.f32.partialorder %v744_v38, 8.507059e+37 }
 0x153   :  { %3851 = vrcp.f32 %v4752_v40  ;;  %v4767_v46 = vadd.f32 1.0, %v3842_v41  ;;  %v747_v51 = vor.u32 1.1754944e-38, %v746_v43  ;;  %v477_v52 = vpop.xlane.xlu2 %476  ;;  %v752_v60 = vsub.f32 1.0, %v4699_v2 }
 0x154   :  { %v546_v33 = vpop.xlane.xlu1 %545  ;;  %v4770_v54 = vpop.eup %3843  ;;  %3853 = vpow2.f32 %v3664_v27  ;;  %1455 = vperm.xlu1 %3783, %v1257_v48   ;;  %v565_v55 = vadd.f32 %v4541_v49, %v477_v52  ;;  %vm755_vm11 = vweird.f32 %v4634_v25  ;;  %vm756_vm12 = vweird.f32 %v4689_v61 }
 0x155   :  { %v588_v56 = vadd.f32 %v4541_v49, %v546_v33  ;;  %v525_v58 = vpop.xlane.xlu0 %524  ;;  %v4777_v50 = vmul.f32 %v4770_v54, %v4722_v12  ;;  %3855 = vrcp.f32 %v4767_v46  ;;  %v748_v59 = vsel %vm4762_vm10, %v747_v51, %v743_v42  ;;  %vm4802_vm13 = vmor %vm755_vm11, %vm756_vm12 }
 0x156   :  { %v581_v63 = vadd.f32 %v4541_v49, %v525_v58  ;;  %v3846_v0 = vpop.eup %3845  ;;  %v1201_v2 = vmul.f32 0.5, %v748_v59  ;;  %v3657_v3 = vmul.f32 -1.442695, %v565_v55  ;;  %v753_v5 = vmul.f32 %v4689_v61, %v752_v60 }
 0x157   :  { %v3680_v4 = vmul.f32 -1.442695, %v588_v56  ;;  %v4784_v6 = vpop.eup %3847  ;;  %v4786_v8 = vadd.f32 1.0, %v3846_v0  ;;  %v759_v10 = vand.u32 2147483647, %v4634_v25  ;;  %v761_v13 = vand.u32 2147483648, %v4634_v25 }
 0x158   :  { %v3673_v9 = vmul.f32 -1.442695, %v581_v63  ;;  %v3850_v11 = vpop.eup %3849  ;;  %v4792_v45 = vmul.f32 %v4784_v6, %v4733_v26  ;;  %v1233_v16 = vadd.f32 0.4, %v1201_v2  ;;  %3857 = vpow2.f32 %v3657_v3 }
 0x159   :  { %v754_v18 = vadd.f32 %v4689_v61, %v753_v5  ;;  %v4795_v19 = vpop.eup %3851  ;;  %3859 = vrcp.f32 %v4786_v8  ;;  %v4798_v20 = vadd.f32 1.0, %v3850_v11  ;;  %vm4806_vm14 = vcmp.eq.f32.partialorder %v759_v10, 8.507059e+37 }
 0x15a   :  { %v3854_v23 = vpop.eup %3853  ;;  %v4813_v27 = vmul.f32 %v4795_v19, %v4752_v40  ;;  %1335 = vperm.xlu0 %3782, %v1233_v16   ;;  %3861 = vpow2.f32 %v3680_v4  ;;  %v977_v31 = vsub.f32 1.0, %v4656_v34  ;;  %v762_v25 = vor.u32 1.1754944e-38, %v761_v13 }
 0x15b   :  { %v758_v30 = vsel %vm4802_vm13, %v4689_v61, %v754_v18  ;;  %v4819_v35 = vpop.eup %3855  ;;  %3863 = vrcp.f32 %v4798_v20  ;;  %v4822_v14 = vadd.f32 1.0, %v3854_v23  ;;  %vm980_vm15 = vweird.f32 %v4603_v57  ;;  %v549_v59 = vpop.xlane.xlu2 %548 }
 0x15c   :  { %v4827_v37 = vmul.f32 %v4819_v35, %v4767_v46  ;;  %3865 = vpow2.f32 %v3673_v9  ;;  %v978_v38 = vmul.f32 %v4639_v28, %v977_v31  ;;  %vm981_vm0 = vweird.f32 %v4639_v28  ;;  %v501_v10 = vpop.xlane.xlu1 %500 }
 0x15d   :  { %3867 = vrcp.f32 %v4822_v14  ;;  %v763_v34 = vsel %vm4806_vm14, %v762_v25, %v758_v30  ;;  %v984_v61 = vand.u32 2147483647, %v4603_v57  ;;  %v986_v42 = vand.u32 2147483648, %v4603_v57  ;;  %vm982_vm2 = vmor %vm980_vm15, %vm981_vm0  ;;  %v480_v11 = vpop.xlane.xlu0 %479 }
 0x15e   :  { %v3858_v43 = vpop.eup %3857  ;;  %v1202_v41 = vmul.f32 0.5, %v763_v34  ;;  %v979_v48 = vadd.f32 %v4639_v28, %v978_v38  ;;  %v857_v32 = vsub.f32 1.0, %v4716_v7  ;;  %vm860_vm1 = vweird.f32 %v4641_v29 }
 0x15f   :  { %v4839_v51 = vpop.eup %3859  ;;  %v4841_v52 = vadd.f32 1.0, %v3858_v43  ;;  %vm985_vm3 = vcmp.eq.f32.partialorder %v984_v61, 8.507059e+37  ;;  %v987_v33 = vor.u32 1.1754944e-38, %v986_v42  ;;  %vm861_vm4 = vweird.f32 %v4695_v1 }
 0x160   :  { %v3862_v60 = vpop.eup %3861  ;;  %v4848_v55 = vmul.f32 %v4839_v51, %v4786_v8  ;;  %v1234_v56 = vadd.f32 0.4, %v1202_v41  ;;  %v983_v7 = vsel %vm982_vm2, %v4639_v28, %v979_v48  ;;  %v858_v58 = vmul.f32 %v4695_v1, %v857_v32  ;;  %vm862_vm5 = vmor %vm860_vm1, %vm861_vm4 }
 0x161   :  { %v4852_v63 = vpop.eup %3863  ;;  %3869 = vrcp.f32 %v4841_v52  ;;  %v4855_v57 = vadd.f32 1.0, %v3862_v60  ;;  %v988_v0 = vsel %vm985_vm3, %v987_v33, %v983_v7  ;;  %v864_v2 = vand.u32 2147483647, %v4641_v29 }
 0x162   :  { %v3866_v3 = vpop.eup %3865  ;;  %v4860_v4 = vmul.f32 %v4852_v63, %v4798_v20  ;;  %1340 = vperm.xlu1 %3783, %v1234_v56   ;;  %v1217_v5 = vmul.f32 0.5, %v988_v0  ;;  %v859_v28 = vadd.f32 %v4695_v1, %v858_v58  ;;  %v866_v9 = vand.u32 2147483648, %v4641_v29 }
 0x163   :  { %v4864_v16 = vpop.eup %3867  ;;  %3871 = vrcp.f32 %v4855_v57  ;;  %v4867_v18 = vadd.f32 1.0, %v3866_v3  ;;  %vm865_vm6 = vcmp.eq.f32.partialorder %v864_v2, 8.507059e+37  ;;  %v589_v21 = vadd.f32 %v4541_v49, %v549_v59 }
 0x164   :  { %v4876_v22 = vmul.f32 %v4864_v16, %v4822_v14  ;;  %v1249_v13 = vadd.f32 0.4, %v1217_v5  ;;  %v863_v23 = vsel %vm862_vm5, %v4695_v1, %v859_v28  ;;  %v867_v30 = vor.u32 1.1754944e-38, %v866_v9 }
 0x165   :  { %3873 = vrcp.f32 %v4867_v18  ;;  %v3681_v31 = vmul.f32 -1.442695, %v589_v21  ;;  %v573_v25 = vadd.f32 %v4541_v49, %v501_v10  ;;  %v566_v38 = vadd.f32 %v4541_v49, %v480_v11 }
 0x166   :  { %1415 = vperm.xlu0 %3782, %v1249_v13   ;;  %v868_v29 = vsel %vm865_vm6, %v867_v30, %v863_v23  ;;  %v872_v34 = vsub.f32 1.0, %v4760_v47  ;;  %vm875_vm7 = vweird.f32 %v4692_v62  ;;  %vm876_vm8 = vweird.f32 %v4749_v39 }
 0x167   :  { %v4885_v61 = vpop.eup %3869  ;;  %v1209_v42 = vmul.f32 0.5, %v868_v29  ;;  %3875 = vpow2.f32 %v3681_v31  ;;  %v3665_v1 = vmul.f32 -1.442695, %v573_v25  ;;  %v3658_v43 = vmul.f32 -1.442695, %v566_v38  ;;  %vm877_vm11 = vmor %vm875_vm7, %vm876_vm8  ;;  %v528_v31 = vpop.xlane.xlu1 %527 }
 0x168   :  { %v4889_v41 = vmul.f32 %v4885_v61, %v4841_v52  ;;  %v873_v48 = vmul.f32 %v4749_v39, %v872_v34  ;;  %v879_v32 = vand.u32 2147483647, %v4692_v62  ;;  %v881_v47 = vand.u32 2147483648, %v4692_v62 }
 0x169   :  { %v4894_v33 = vpop.eup %3871  ;;  %v1241_v60 = vadd.f32 0.4, %v1209_v42  ;;  %3877 = vpow2.f32 %v3665_v1  ;;  %v1112_v56 = vsub.f32 1.0, %v4686_v44  ;;  %vm1115_vm9 = vweird.f32 %v4624_v15 }
 0x16a   :  { %v4900_v7 = vmul.f32 %v4894_v33, %v4855_v57  ;;  %3879 = vpow2.f32 %v3658_v43  ;;  %v874_v58 = vadd.f32 %v4749_v39, %v873_v48  ;;  %vm880_vm10 = vcmp.eq.f32.partialorder %v879_v32, 8.507059e+37  ;;  %v552_v48 = vpop.xlane.xlu0 %551 }
 0x16b   :  { %v4903_v59 = vpop.eup %3873  ;;  %1375 = vperm.xlu2 %3781, %v1241_v60   ;;  %v882_v0 = vor.u32 1.1754944e-38, %v881_v47  ;;  %v1113_v44 = vmul.f32 %v4679_v53, %v1112_v56  ;;  %vm1116_vm12 = vweird.f32 %v4679_v53  ;;  %v1119_v2 = vand.u32 2147483647, %v4624_v15 }
 0x16c   :  { %v4914_v3 = vmul.f32 %v4903_v59, %v4867_v18  ;;  %v878_v5 = vsel %vm877_vm11, %v4749_v39, %v874_v58  ;;  %v1121_v28 = vand.u32 2147483648, %v4624_v15  ;;  %v992_v9 = vsub.f32 1.0, %v4777_v50  ;;  %vm1117_vm15 = vmor %vm1115_vm9, %vm1116_vm12  ;;  %v504_v50 = vpop.xlane.xlu2 %503 }
 0x16d   :  { %v3876_v10 = vpop.eup %3875  ;;  %v883_v62 = vsel %vm880_vm10, %v882_v0, %v878_v5  ;;  %v1114_v11 = vadd.f32 %v4679_v53, %v1113_v44  ;;  %vm4920_vm13 = vcmp.eq.f32.partialorder %v1119_v2, 8.507059e+37  ;;  %vm995_vm14 = vweird.f32 %v4722_v12 }
 0x16e   :  { %v4925_v13 = vadd.f32 1.0, %v3876_v10  ;;  %v1210_v23 = vmul.f32 0.5, %v883_v62  ;;  %v1122_v39 = vor.u32 1.1754944e-38, %v1121_v28  ;;  %v993_v30 = vmul.f32 %v4770_v54, %v992_v9 }
 0x16f   :  { %v3878_v25 = vpop.eup %3877  ;;  %v1118_v38 = vsel %vm1117_vm15, %v4679_v53, %v1114_v11  ;;  %vm996_vm0 = vweird.f32 %v4770_v54  ;;  %v999_v29 = vand.u32 2147483647, %v4722_v12  ;;  %v1001_v34 = vand.u32 2147483648, %v4722_v12 }
 0x170   :  { %v3880_v42 = vpop.eup %3879  ;;  %3881 = vrcp.f32 %v4925_v13  ;;  %v4935_v1 = vadd.f32 1.0, %v3878_v25  ;;  %v1242_v15 = vadd.f32 0.4, %v1210_v23  ;;  %v1123_v43 = vsel %vm4920_vm13, %v1122_v39, %v1118_v38  ;;  %vm997_vm2 = vmor %vm995_vm14, %vm996_vm0 }
 0x171   :  { %v4939_v32 = vadd.f32 1.0, %v3880_v42  ;;  %v1226_v47 = vmul.f32 0.5, %v1123_v43  ;;  %v994_v53 = vadd.f32 %v4770_v54, %v993_v30  ;;  %vm1000_vm1 = vcmp.eq.f32.partialorder %v999_v29, 8.507059e+37  ;;  %v483_v29 = vpop.xlane.xlu1 %482 }
 0x172   :  { %3883 = vrcp.f32 %v4935_v1  ;;  %1380 = vperm.xlu1 %3783, %v1242_v15   ;;  %v1002_v60 = vor.u32 1.1754944e-38, %v1001_v34  ;;  %v574_v56 = vadd.f32 %v4541_v49, %v504_v50  ;;  %v582_v58 = vadd.f32 %v4541_v49, %v528_v31 }
 0x173   :  { %3885 = vrcp.f32 %v4939_v32  ;;  %v1258_v0 = vadd.f32 0.4, %v1226_v47  ;;  %v998_v44 = vsel %vm997_vm2, %v4770_v54, %v994_v53  ;;  %v590_v2 = vadd.f32 %v4541_v49, %v552_v48 }
 0x174   :  { %v1003_v5 = vsel %vm1000_vm1, %v1002_v60, %v998_v44  ;;  %v3666_v28 = vmul.f32 -1.442695, %v574_v56  ;;  %v3674_v9 = vmul.f32 -1.442695, %v582_v58  ;;  %v887_v10 = vsub.f32 1.0, %v4740_v36  ;;  %v531_v38 = vpop.xlane.xlu2 %530 }
 0x175   :  { %1460 = vperm.xlu0 %3782, %v1258_v0   ;;  %v1218_v12 = vmul.f32 0.5, %v1003_v5  ;;  %v3682_v62 = vmul.f32 -1.442695, %v590_v2  ;;  %vm890_vm3 = vweird.f32 %v4681_v17  ;;  %vm891_vm4 = vweird.f32 %v4731_v24 }
 0x176   :  { %v4955_v11 = vpop.eup %3881  ;;  %3887 = vpow2.f32 %v3666_v28  ;;  %v888_v21 = vmul.f32 %v4731_v24, %v887_v10  ;;  %v894_v54 = vand.u32 2147483647, %v4681_v17  ;;  %v896_v23 = vand.u32 2147483648, %v4681_v17  ;;  %vm892_vm6 = vmor %vm890_vm3, %vm891_vm4 }
 0x177   :  { %v4962_v39 = vmul.f32 %v4955_v11, %v4925_v13  ;;  %v1250_v36 = vadd.f32 0.4, %v1218_v12  ;;  %3889 = vpow2.f32 %v3674_v9  ;;  %v767_v30 = vsub.f32 1.0, %v4813_v27 }
 0x178   :  { %v4965_v50 = vpop.eup %3883  ;;  %3891 = vpow2.f32 %v3682_v62  ;;  %v889_v31 = vadd.f32 %v4731_v24, %v888_v21  ;;  %vm895_vm5 = vcmp.eq.f32.partialorder %v894_v54, 8.507059e+37  ;;  %v897_v25 = vor.u32 1.1754944e-38, %v896_v23 }
 0x179   :  { %v4968_v34 = vpop.eup %3885  ;;  %v4972_v42 = vmul.f32 %v4965_v50, %v4935_v1  ;;  %1420 = vperm.xlu2 %3781, %v1250_v36   ;;  %v768_v27 = vmul.f32 %v4795_v19, %v767_v30  ;;  %vm770_vm7 = vweird.f32 %v4752_v40  ;;  %vm771_vm8 = vweird.f32 %v4795_v19 }
 0x17a   :  { %v4983_v15 = vmul.f32 %v4968_v34, %v4939_v32  ;;  %v893_v43 = vsel %vm892_vm6, %v4731_v24, %v889_v31  ;;  %v774_v48 = vand.u32 2147483647, %v4752_v40  ;;  %v776_v47 = vand.u32 2147483648, %v4752_v40  ;;  %vm772_vm9 = vmor %vm770_vm7, %vm771_vm8 }
 0x17b   :  { %v898_v53 = vsel %vm895_vm5, %v897_v25, %v893_v43  ;;  %v769_v17 = vadd.f32 %v4795_v19, %v768_v27  ;;  %v583_v60 = vadd.f32 %v4541_v49, %v531_v38  ;;  %v567_v56 = vadd.f32 %v4541_v49, %v483_v29 }
 0x17c   :  { %v3888_v58 = vpop.eup %3887  ;;  %v1211_v0 = vmul.f32 0.5, %v898_v53  ;;  %vm775_vm10 = vcmp.eq.f32.partialorder %v774_v48, 8.507059e+37  ;;  %v777_v44 = vor.u32 1.1754944e-38, %v776_v47  ;;  %v1007_v2 = vsub.f32 1.0, %v4860_v4 }
 0x17d   :  { %v3890_v5 = vpop.eup %3889  ;;  %v4992_v24 = vadd.f32 1.0, %v3888_v58  ;;  %v773_v28 = vsel %vm772_vm9, %v4795_v19, %v769_v17  ;;  %v3675_v40 = vmul.f32 -1.442695, %v583_v60  ;;  %v3659_v9 = vmul.f32 -1.442695, %v567_v56  ;;  %v555_v58 = vpop.xlane.xlu1 %554 }
 0x17e   :  { %v3892_v10 = vpop.eup %3891  ;;  %v4995_v12 = vadd.f32 1.0, %v3890_v5  ;;  %v1243_v62 = vadd.f32 0.4, %v1211_v0  ;;  %v778_v21 = vsel %vm775_vm10, %v777_v44, %v773_v28  ;;  %v1008_v49 = vmul.f32 %v4852_v63, %v1007_v2 }
 0x17f   :  { %3893 = vrcp.f32 %v4992_v24  ;;  %v4999_v54 = vadd.f32 1.0, %v3892_v10  ;;  %v1203_v23 = vmul.f32 0.5, %v778_v21  ;;  %vm1010_vm11 = vweird.f32 %v4798_v20 }
 0x180   :  { %3895 = vrcp.f32 %v4995_v12  ;;  %1385 = vperm.xlu0 %3782, %v1243_v62   ;;  %v1009_v19 = vadd.f32 %v4852_v63, %v1008_v49  ;;  %vm1011_vm12 = vweird.f32 %v4852_v63  ;;  %v1014_v4 = vand.u32 2147483647, %v4798_v20 }
 0x181   :  { %3897 = vrcp.f32 %v4999_v54  ;;  %v1235_v36 = vadd.f32 0.4, %v1203_v23  ;;  %vm5007_vm13 = vmor %vm1010_vm11, %vm1011_vm12  ;;  %v1016_v31 = vand.u32 2147483648, %v4798_v20  ;;  %v1022_v25 = vsub.f32 1.0, %v4848_v55 }
 0x182   :  { %3899 = vpow2.f32 %v3675_v40  ;;  %v1013_v38 = vsel %vm5007_vm13, %v4852_v63, %v1009_v19  ;;  %vm1015_vm14 = vcmp.eq.f32.partialorder %v1014_v4, 8.507059e+37  ;;  %vm1025_vm15 = vweird.f32 %v4786_v8  ;;  %v4235_v19 = vld [vmem:[#allocation2] ss:$0 sm:$0xff] }
 0x183   :  { %1345 = vperm.xlu2 %3781, %v1235_v36   ;;  %3901 = vpow2.f32 %v3659_v9  ;;  %v1017_v29 = vor.u32 1.1754944e-38, %v1016_v31  ;;  %v1023_v27 = vmul.f32 %v4839_v51, %v1022_v25  ;;  %vm1026_vm0 = vweird.f32 %v4839_v51 }
 0x184   :  { %v1029_v43 = vand.u32 2147483647, %v4786_v8  ;;  %v1031_v20 = vand.u32 2147483648, %v4786_v8  ;;  %v1127_v55 = vsub.f32 1.0, %v4827_v37  ;;  %vm1130_vm1 = vweird.f32 %v4767_v46  ;;  %vm1027_vm3 = vmor %vm1025_vm15, %vm1026_vm0 }
 0x185   :  { %v5023_v48 = vpop.eup %3893  ;;  %v1018_v63 = vsel %vm1015_vm14, %v1017_v29, %v1013_v38  ;;  %v1024_v47 = vadd.f32 %v4839_v51, %v1023_v27  ;;  %vm1131_vm2 = vweird.f32 %v4819_v35  ;;  %v1134_v53 = vand.u32 2147483647, %v4767_v46 }
 0x186   :  { %v5028_v17 = vpop.eup %3895  ;;  %v5032_v60 = vmul.f32 %v5023_v48, %v4992_v24  ;;  %v1219_v56 = vmul.f32 0.5, %v1018_v63  ;;  %vm1030_vm4 = vcmp.eq.f32.partialorder %v1029_v43, 8.507059e+37  ;;  %v1032_v37 = vor.u32 1.1754944e-38, %v1031_v20  ;;  %vm1132_vm6 = vmor %vm1130_vm1, %vm1131_vm2 }
 0x187   :  { %v5036_v0 = vpop.eup %3897  ;;  %v5040_v44 = vmul.f32 %v5028_v17, %v4995_v12  ;;  %v1028_v2 = vsel %vm1027_vm3, %v4839_v51, %v1024_v47  ;;  %v1128_v5 = vmul.f32 %v4819_v35, %v1127_v55  ;;  %vm5044_vm5 = vcmp.eq.f32.partialorder %v1134_v53, 8.507059e+37  ;;  %v507_v55 = vpop.xlane.xlu0 %506 }
 0x188   :  { %v3900_v40 = vpop.eup %3899  ;;  %v5050_v8 = vmul.f32 %v5036_v0, %v4999_v54  ;;  %v1251_v9 = vadd.f32 0.4, %v1219_v56  ;;  %v1033_v10 = vsel %vm1030_vm4, %v1032_v37, %v1028_v2  ;;  %v1136_v62 = vand.u32 2147483648, %v4767_v46 }
 0x189   :  { %v3902_v21 = vpop.eup %3901  ;;  %v5053_v49 = vadd.f32 1.0, %v3900_v40  ;;  %v1220_v23 = vmul.f32 0.5, %v1033_v10  ;;  %v1129_v51 = vadd.f32 %v4819_v35, %v1128_v5  ;;  %v591_v4 = vadd.f32 %v4235_v19, %v555_v58 }
 0x18a   :  { %v5056_v36 = vadd.f32 1.0, %v3902_v21  ;;  %1425 = vperm.xlu1 %3783, %v1251_v9   ;;  %v1137_v30 = vor.u32 1.1754944e-38, %v1136_v62  ;;  %v1142_v31 = vsub.f32 1.0, %v4900_v7  ;;  %vm1145_vm7 = vweird.f32 %v4855_v57 }
 0x18b   :  { %3903 = vrcp.f32 %v5053_v49  ;;  %v1252_v25 = vadd.f32 0.4, %v1220_v23  ;;  %v1133_v38 = vsel %vm1132_vm6, %v4819_v35, %v1129_v51  ;;  %v3683_v29 = vmul.f32 -1.442695, %v591_v4 }
 0x18c   :  { %3905 = vrcp.f32 %v5056_v36  ;;  %v1138_v27 = vsel %vm5044_vm5, %v1137_v30, %v1133_v38  ;;  %v1143_v43 = vmul.f32 %v4894_v33, %v1142_v31  ;;  %vm1146_vm8 = vweird.f32 %v4894_v33 }
 0x18d   :  { %1430 = vperm.xlu0 %3782, %v1252_v25   ;;  %v1227_v46 = vmul.f32 0.5, %v1138_v27  ;;  %3907 = vpow2.f32 %v3683_v29  ;;  %v1149_v7 = vand.u32 2147483647, %v4855_v57  ;;  %v1151_v20 = vand.u32 2147483648, %v4855_v57  ;;  %vm1147_vm11 = vmor %vm1145_vm7, %vm1146_vm8 }
 0x18e   :  { %v1144_v35 = vadd.f32 %v4894_v33, %v1143_v43  ;;  %v782_v63 = vsub.f32 1.0, %v4792_v45  ;;  %vm785_vm9 = vweird.f32 %v4733_v26  ;;  %vm786_vm10 = vweird.f32 %v4784_v6 }
 0x18f   :  { %v1259_v47 = vadd.f32 0.4, %v1227_v46  ;;  %vm1150_vm12 = vcmp.eq.f32.partialorder %v1149_v7, 8.507059e+37  ;;  %v1152_v53 = vor.u32 1.1754944e-38, %v1151_v20  ;;  %v789_v56 = vand.u32 2147483647, %v4733_v26  ;;  %vm787_vm15 = vmor %vm785_vm9, %vm786_vm10 }
 0x190   :  { %v1148_v37 = vsel %vm1147_vm11, %v4894_v33, %v1144_v35  ;;  %v783_v58 = vmul.f32 %v4784_v6, %v782_v63  ;;  %v791_v2 = vand.u32 2147483648, %v4733_v26  ;;  %v575_v5 = vadd.f32 %v4235_v19, %v507_v55 }
 0x191   :  { %v5083_v45 = vpop.eup %3903  ;;  %1465 = vperm.xlu2 %3781, %v1259_v47   ;;  %v1153_v28 = vsel %vm1150_vm12, %v1152_v53, %v1148_v37  ;;  %vm5085_vm13 = vcmp.eq.f32.partialorder %v789_v56, 8.507059e+37  ;;  %v797_v57 = vsub.f32 1.0, %v4889_v41  ;;  %vm800_vm14 = vweird.f32 %v4841_v52 }
 0x192   :  { %v5091_v9 = vpop.eup %3905  ;;  %v5095_v33 = vmul.f32 %v5083_v45, %v5053_v49  ;;  %v1228_v10 = vmul.f32 0.5, %v1153_v28  ;;  %v784_v62 = vadd.f32 %v4784_v6, %v783_v58  ;;  %v792_v21 = vor.u32 1.1754944e-38, %v791_v2 }
 0x193   :  { %v3908_v23 = vpop.eup %3907  ;;  %v5100_v51 = vmul.f32 %v5091_v9, %v5056_v36  ;;  %v3667_v41 = vmul.f32 -1.442695, %v575_v5  ;;  %v798_v19 = vmul.f32 %v4885_v61, %v797_v57  ;;  %vm801_vm0 = vweird.f32 %v4885_v61 }
 0x194   :  { %v5108_v4 = vadd.f32 1.0, %v3908_v23  ;;  %v1260_v30 = vadd.f32 0.4, %v1228_v10  ;;  %v788_v31 = vsel %vm787_vm15, %v4784_v6, %v784_v62  ;;  %v804_v25 = vand.u32 2147483647, %v4841_v52  ;;  %vm802_vm1 = vmor %vm800_vm14, %vm801_vm0 }
 0x195   :  { %v793_v38 = vsel %vm5085_vm13, %v792_v21, %v788_v31  ;;  %3909 = vpow2.f32 %v3667_v41  ;;  %v799_v29 = vadd.f32 %v4885_v61, %v798_v19  ;;  %v806_v26 = vand.u32 2147483648, %v4841_v52 }
 0x196   :  { %3911 = vrcp.f32 %v5108_v4  ;;  %1470 = vperm.xlu1 %3783, %v1260_v30   ;;  %v1204_v27 = vmul.f32 0.5, %v793_v38  ;;  %vm805_vm2 = vcmp.eq.f32.partialorder %v804_v25, 8.507059e+37  ;;  %v1157_v6 = vsub.f32 1.0, %v4962_v39 }
 0x197   :  { %v803_v43 = vsel %vm802_vm1, %v4885_v61, %v799_v29  ;;  %v807_v46 = vor.u32 1.1754944e-38, %v806_v26  ;;  %vm1160_vm3 = vweird.f32 %v4925_v13  ;;  %vm1161_vm4 = vweird.f32 %v4955_v11 }
 0x198   :  { %v1236_v7 = vadd.f32 0.4, %v1204_v27  ;;  %v1158_v20 = vmul.f32 %v4955_v11, %v1157_v6  ;;  %v1164_v55 = vand.u32 2147483647, %v4925_v13  ;;  %v1166_v35 = vand.u32 2147483648, %v4925_v13  ;;  %vm1162_vm8 = vmor %vm1160_vm3, %vm1161_vm4 }
 0x199   :  { %v808_v63 = vsel %vm805_vm2, %v807_v46, %v803_v43  ;;  %v902_v52 = vsub.f32 1.0, %v4876_v22  ;;  %vm905_vm5 = vweird.f32 %v4822_v14  ;;  %vm906_vm6 = vweird.f32 %v4864_v16 }
 0x19a   :  { %1350 = vperm.xlu2 %3781, %v1236_v7   ;;  %v1205_v61 = vmul.f32 0.5, %v808_v63  ;;  %v1159_v39 = vadd.f32 %v4955_v11, %v1158_v20  ;;  %vm1165_vm7 = vcmp.eq.f32.partialorder %v1164_v55, 8.507059e+37  ;;  %v1167_v47 = vor.u32 1.1754944e-38, %v1166_v35  ;;  %vm5147_vm9 = vmor %vm905_vm5, %vm906_vm6 }
 0x19b   :  { %v3910_v53 = vpop.eup %3909  ;;  %v903_v56 = vmul.f32 %v4864_v16, %v902_v52  ;;  %v909_v22 = vand.u32 2147483647, %v4822_v14  ;;  %v911_v37 = vand.u32 2147483648, %v4822_v14  ;;  %v917_v58 = vsub.f32 1.0, %v4972_v42 }
 0x19c   :  { %v5138_v2 = vpop.eup %3911  ;;  %v5140_v5 = vadd.f32 1.0, %v3910_v53  ;;  %v1237_v28 = vadd.f32 0.4, %v1205_v61  ;;  %v1163_v40 = vsel %vm1162_vm8, %v4955_v11, %v1159_v39  ;;  %vm920_vm10 = vweird.f32 %v4935_v1 }
 0x19d   :  { %v5154_v42 = vmul.f32 %v5138_v2, %v5108_v4  ;;  %v1168_v57 = vsel %vm1165_vm7, %v1167_v47, %v1163_v40  ;;  %v904_v10 = vadd.f32 %v4864_v16, %v903_v56  ;;  %vm910_vm11 = vcmp.eq.f32.partialorder %v909_v22, 8.507059e+37 }
 0x19e   :  { %3913 = vrcp.f32 %v5140_v5  ;;  %1355 = vperm.xlu1 %3783, %v1237_v28   ;;  %v1229_v11 = vmul.f32 0.5, %v1168_v57  ;;  %v912_v62 = vor.u32 1.1754944e-38, %v911_v37  ;;  %v918_v14 = vmul.f32 %v4965_v50, %v917_v58 }
 0x19f   :  { %v908_v21 = vsel %vm5147_vm9, %v4864_v16, %v904_v10  ;;  %vm921_vm12 = vweird.f32 %v4965_v50  ;;  %v924_v23 = vand.u32 2147483647, %v4935_v1  ;;  %v926_v41 = vand.u32 2147483648, %v4935_v1 }
 0x1a0   :  { %v1261_v19 = vadd.f32 0.4, %v1229_v11  ;;  %v913_v30 = vsel %vm910_vm11, %v912_v62, %v908_v21  ;;  %v919_v31 = vadd.f32 %v4965_v50, %v918_v14  ;;  %v932_v25 = vsub.f32 1.0, %v5032_v60  ;;  %vm922_vm13 = vmor %vm920_vm10, %vm921_vm12 }
 0x1a1   :  { %v1212_v38 = vmul.f32 0.5, %v913_v30  ;;  %vm925_vm14 = vcmp.eq.f32.partialorder %v924_v23, 8.507059e+37  ;;  %v927_v29 = vor.u32 1.1754944e-38, %v926_v41  ;;  %vm935_vm15 = vweird.f32 %v4992_v24 }
 0x1a2   :  { %1475 = vperm.xlu0 %3782, %v1261_v19   ;;  %v923_v16 = vsel %vm922_vm13, %v4965_v50, %v919_v31  ;;  %v933_v26 = vmul.f32 %v5023_v48, %v932_v25  ;;  %vm936_vm0 = vweird.f32 %v5023_v48  ;;  %v939_v27 = vand.u32 2147483647, %v4992_v24 }
 0x1a3   :  { %v1244_v6 = vadd.f32 0.4, %v1212_v38  ;;  %v928_v43 = vsel %vm925_vm14, %v927_v29, %v923_v16  ;;  %v941_v60 = vand.u32 2147483648, %v4992_v24  ;;  %v1037_v1 = vsub.f32 1.0, %v4914_v3  ;;  %vm937_vm3 = vmor %vm935_vm15, %vm936_vm0 }
 0x1a4   :  { %v5176_v46 = vpop.eup %3913  ;;  %v1213_v7 = vmul.f32 0.5, %v928_v43  ;;  %v934_v20 = vadd.f32 %v5023_v48, %v933_v26  ;;  %vm940_vm1 = vcmp.eq.f32.partialorder %v939_v27, 8.507059e+37  ;;  %vm1040_vm2 = vweird.f32 %v4867_v18 }
 0x1a5   :  { %v5182_v50 = vmul.f32 %v5176_v46, %v5140_v5  ;;  %1390 = vperm.xlu2 %3781, %v1244_v6   ;;  %v942_v55 = vor.u32 1.1754944e-38, %v941_v60  ;;  %v1038_v35 = vmul.f32 %v4903_v59, %v1037_v1  ;;  %vm1041_vm4 = vweird.f32 %v4903_v59 }
 0x1a6   :  { %v1245_v3 = vadd.f32 0.4, %v1213_v7  ;;  %v938_v63 = vsel %vm937_vm3, %v5023_v48, %v934_v20  ;;  %vm5189_vm5 = vmor %vm1040_vm2, %vm1041_vm4  ;;  %v1044_v61 = vand.u32 2147483647, %v4867_v18  ;;  %v1046_v39 = vand.u32 2147483648, %v4867_v18 }
 0x1a7   :  { %v943_v47 = vsel %vm940_vm1, %v942_v55, %v938_v63  ;;  %v1039_v24 = vadd.f32 %v4903_v59, %v1038_v35  ;;  %v1052_v53 = vsub.f32 1.0, %v5040_v44  ;;  %vm1055_vm6 = vweird.f32 %v4995_v12  ;;  %v1264_v55 = vld [vmem:[#allocation6] sm:$0xff]  ;;  %v1265_v63 = vld [vmem:[#allocation6 + $0x8] sm:$0xff] }
 0x1a8   :  { %1395 = vperm.xlu1 %3783, %v1245_v3   ;;  %v1214_v56 = vmul.f32 0.5, %v943_v47  ;;  %vm1045_vm7 = vcmp.eq.f32.partialorder %v1044_v61, 8.507059e+37  ;;  %v1047_v22 = vor.u32 1.1754944e-38, %v1046_v39  ;;  %vm1056_vm8 = vweird.f32 %v5028_v17 }
 0x1a9   :  { %v1043_v48 = vsel %vm5189_vm5, %v4903_v59, %v1039_v24  ;;  %v1053_v37 = vmul.f32 %v5028_v17, %v1052_v53  ;;  %v1059_v18 = vand.u32 2147483647, %v4995_v12  ;;  %v1061_v58 = vand.u32 2147483648, %v4995_v12  ;;  %vm1057_vm11 = vmor %vm1055_vm6, %vm1056_vm8 }
 0x1aa   :  { %v1246_v28 = vadd.f32 0.4, %v1214_v56  ;;  %v1048_v44 = vsel %vm1045_vm7, %v1047_v22, %v1043_v48  ;;  %v1067_v40 = vsub.f32 1.0, %v5095_v33  ;;  %vm1070_vm9 = vweird.f32 %v5053_v49 }
 0x1ab   :  { %v1221_v13 = vmul.f32 0.5, %v1048_v44  ;;  %v1054_v57 = vadd.f32 %v5028_v17, %v1053_v37  ;;  %vm1060_vm10 = vcmp.eq.f32.partialorder %v1059_v18, 8.507059e+37  ;;  %v1062_v10 = vor.u32 1.1754944e-38, %v1061_v58 }
 0x1ac   :  { %1400 = vperm.xlu0 %3782, %v1246_v28   ;;  %v1068_v59 = vmul.f32 %v5083_v45, %v1067_v40  ;;  %vm1071_vm12 = vweird.f32 %v5083_v45  ;;  %v1074_v11 = vand.u32 2147483647, %v5053_v49  ;;  %v1076_v62 = vand.u32 2147483648, %v5053_v49 }
 0x1ad   :  { %v1253_v33 = vadd.f32 0.4, %v1221_v13  ;;  %v1058_v14 = vsel %vm1057_vm11, %v5028_v17, %v1054_v57  ;;  %v812_v21 = vsub.f32 1.0, %v4983_v15  ;;  %vm815_vm13 = vweird.f32 %v4939_v32  ;;  %vm1072_vm15 = vmor %vm1070_vm9, %vm1071_vm12 }
 0x1ae   :  { %v1063_v23 = vsel %vm1060_vm10, %v1062_v10, %v1058_v14  ;;  %v1069_v41 = vadd.f32 %v5083_v45, %v1068_v59  ;;  %vm1075_vm14 = vcmp.eq.f32.partialorder %v1074_v11, 8.507059e+37  ;;  %v1077_v12 = vor.u32 1.1754944e-38, %v1076_v62  ;;  %v1280_v14 = vld [vmem:[#allocation6 + $0x80] sm:$0xff] }
 0x1af   :  { %1435 = vperm.xlu2 %3781, %v1253_v33   ;;  %v1222_v19 = vmul.f32 0.5, %v1063_v23  ;;  %v813_v30 = vmul.f32 %v4968_v34, %v812_v21  ;;  %vm816_vm0 = vweird.f32 %v4968_v34  ;;  %v819_v17 = vand.u32 2147483647, %v4939_v32  ;;  %v1313_v33 = vld [vmem:[#allocation6 + $0x188] sm:$0xff] }
 0x1b0   :  { %v1073_v15 = vsel %vm1072_vm15, %v5083_v45, %v1069_v41  ;;  %vm5224_vm1 = vmor %vm815_vm13, %vm816_vm0  ;;  %v821_v25 = vand.u32 2147483648, %v4939_v32  ;;  %v827_v38 = vsub.f32 1.0, %v5100_v51  ;;  %vm830_vm2 = vweird.f32 %v5056_v36  ;;  %v1331_v45 = vpop.permute.xlu2 %1330 }
 0x1b1   :  { %v1254_v49 = vadd.f32 0.4, %v1222_v19  ;;  %v1078_v29 = vsel %vm1075_vm14, %v1077_v12, %v1073_v15  ;;  %v814_v16 = vadd.f32 %v4968_v34, %v813_v30  ;;  %vm820_vm3 = vcmp.eq.f32.partialorder %v819_v17, 8.507059e+37  ;;  %v1371_v21 = vpop.permute.xlu0 %1370 }
 0x1b2   :  { %v1223_v26 = vmul.f32 0.5, %v1078_v29  ;;  %v822_v27 = vor.u32 1.1754944e-38, %v821_v25  ;;  %v828_v6 = vmul.f32 %v5091_v9, %v827_v38  ;;  %vm831_vm4 = vweird.f32 %v5091_v9 }
 0x1b3   :  { %1440 = vperm.xlu1 %3783, %v1254_v49   ;;  %v818_v32 = vsel %vm5224_vm1, %v4968_v34, %v814_v16  ;;  %v834_v51 = vand.u32 2147483647, %v5056_v36  ;;  %v836_v43 = vand.u32 2147483648, %v5056_v36  ;;  %v1172_v60 = vsub.f32 1.0, %v5050_v8  ;;  %vm832_vm6 = vmor %vm830_vm2, %vm831_vm4  ;;  %v1296_v49 = vld [vmem:[#allocation6 + $0x100] sm:$0xff] }
 0x1b4   :  { %v1255_v1 = vadd.f32 0.4, %v1223_v26  ;;  %v823_v7 = vsel %vm820_vm3, %v822_v27, %v818_v32  ;;  %v829_v20 = vadd.f32 %v5091_v9, %v828_v6  ;;  %vm1175_vm5 = vweird.f32 %v4999_v54  ;;  %v1297_v32 = vld [vmem:[#allocation6 + $0x108] sm:$0xff] }
 0x1b5   :  { %v1206_v35 = vmul.f32 0.5, %v823_v7  ;;  %vm835_vm7 = vcmp.eq.f32.partialorder %v834_v51, 8.507059e+37  ;;  %v837_v3 = vor.u32 1.1754944e-38, %v836_v43  ;;  %v1173_v34 = vmul.f32 %v5036_v0, %v1172_v60  ;;  %v1282_v7 = vld [vmem:[#allocation6 + $0x90] sm:$0xff] }
 0x1b6   :  { %1445 = vperm.xlu0 %3782, %v1255_v1   ;;  %v833_v52 = vsel %vm832_vm6, %v5091_v9, %v829_v20  ;;  %vm1176_vm8 = vweird.f32 %v5036_v0  ;;  %v1179_v8 = vand.u32 2147483647, %v4999_v54  ;;  %v1181_v61 = vand.u32 2147483648, %v4999_v54  ;;  %v1283_v20 = vld [vmem:[#allocation6 + $0x98] sm:$0xff] }
 0x1b7   :  { %v1238_v39 = vadd.f32 0.4, %v1206_v35  ;;  %v838_v47 = vsel %vm835_vm7, %v837_v3, %v833_v52  ;;  %v1174_v24 = vadd.f32 %v5036_v0, %v1173_v34  ;;  %vm1177_vm9 = vmor %vm1175_vm5, %vm1176_vm8  ;;  %v1488_v36 = vsub.f32 %v1264_v55, %v1331_v45 }
 0x1b8   :  { %v1207_v53 = vmul.f32 0.5, %v838_v47  ;;  %vm1180_vm10 = vcmp.eq.f32.partialorder %v1179_v8, 8.507059e+37  ;;  %v1182_v56 = vor.u32 1.1754944e-38, %v1181_v61  ;;  %v1489_v22 = vsub.f32 %v1265_v63, %v1331_v45  ;;  %v1451_v59 = vpop.permute.xlu2 %1450 }
 0x1b9   :  { %1360 = vperm.xlu2 %3781, %v1238_v39   ;;  %v1178_v9 = vsel %vm1177_vm9, %v5036_v0, %v1174_v24  ;;  %v3684_v48 = vmul.f32 -50.0, %v1488_v36  ;;  %v1187_v37 = vsub.f32 1.0, %v5154_v42  ;;  %vm1190_vm11 = vweird.f32 %v5108_v4  ;;  %v1312_v42 = vld [vmem:[#allocation6 + $0x180] sm:$0xff] }
 0x1ba   :  { %v1239_v18 = vadd.f32 0.4, %v1207_v53  ;;  %v1183_v58 = vsel %vm1180_vm10, %v1182_v56, %v1178_v9  ;;  %v3685_v28 = vmul.f32 -50.0, %v1489_v22  ;;  %vm1191_vm12 = vweird.f32 %v5138_v2 }
 0x1bb   :  { %v1230_v54 = vmul.f32 0.5, %v1183_v58  ;;  %v1680_v44 = vmul.f32 1.442695, %v3684_v48  ;;  %v1188_v40 = vmul.f32 %v5138_v2, %v1187_v37  ;;  %v1194_v13 = vand.u32 2147483647, %v5108_v4  ;;  %vm1192_vm15 = vmor %vm1190_vm11, %vm1191_vm12 }
 0x1bc   :  { %1365 = vperm.xlu1 %3783, %v1239_v18   ;;  %v1682_v57 = vmul.f32 1.442695, %v3685_v28  ;;  %v1196_v0 = vand.u32 2147483648, %v5108_v4  ;;  %v947_v10 = vsub.f32 1.0, %v5182_v50  ;;  %vm950_vm13 = vweird.f32 %v5140_v5  ;;  %v1281_v4 = vld [vmem:[#allocation6 + $0x88] sm:$0xff]  ;;  %v1411_v29 = vpop.permute.xlu1 %1410 }
 0x1bd   :  { %v1262_v11 = vadd.f32 0.4, %v1230_v54  ;;  %3915 = vpow2.f32 %v1680_v44  ;;  %v1189_v62 = vadd.f32 %v5138_v2, %v1188_v40  ;;  %vm1195_vm14 = vcmp.eq.f32.partialorder %v1194_v13, 8.507059e+37 }
 0x1be   :  { %3917 = vpow2.f32 %v1682_v57  ;;  %v1197_v23 = vor.u32 1.1754944e-38, %v1196_v0  ;;  %v948_v50 = vmul.f32 %v5176_v46, %v947_v10  ;;  %vm951_vm0 = vweird.f32 %v5176_v46 }
 0x1bf   :  { %v1193_v41 = vsel %vm1192_vm15, %v5138_v2, %v1189_v62  ;;  %vm5271_vm1 = vmor %vm950_vm13, %vm951_vm0  ;;  %v954_v19 = vand.u32 2147483647, %v5140_v5  ;;  %v956_v30 = vand.u32 2147483648, %v5140_v5  ;;  %v1536_v17 = vsub.f32 %v1312_v42, %v1451_v59  ;;  %v1314_v42 = vld [vmem:[#allocation6 + $0x190] sm:$0xff] }
 0x1c0   :  { %v1198_v15 = vsel %vm1195_vm14, %v1197_v23, %v1193_v41  ;;  %v949_v31 = vadd.f32 %v5176_v46, %v948_v50  ;;  %v1537_v25 = vsub.f32 %v1313_v33, %v1451_v59  ;;  %v1504_v38 = vsub.f32 %v1280_v14, %v1371_v21  ;;  %v1315_v14 = vld [vmem:[#allocation6 + $0x198] sm:$0xff]  ;;  %v1270_v23 = vld [vmem:[#allocation6 + $0x30] sm:$0xff] }
 0x1c1   :  { %1480 = vperm.xlu2 %3781, %v1262_v11   ;;  %v1231_v2 = vmul.f32 0.5, %v1198_v15  ;;  %vm955_vm2 = vcmp.eq.f32.partialorder %v954_v19, 8.507059e+37  ;;  %v957_v16 = vor.u32 1.1754944e-38, %v956_v30  ;;  %v3732_v26 = vmul.f32 -50.0, %v1536_v17  ;;  %v1266_v15 = vld [vmem:[#allocation6 + $0x10] sm:$0xff] }
 0x1c2   :  { %v953_v27 = vsel %vm5271_vm1, %v5176_v46, %v949_v31  ;;  %v3733_v6 = vmul.f32 -50.0, %v1537_v25  ;;  %v1505_v5 = vsub.f32 %v1281_v4, %v1371_v21  ;;  %v3700_v45 = vmul.f32 -50.0, %v1504_v38 }
 0x1c3   :  { %v3916_v51 = vpop.eup %3915  ;;  %v1263_v43 = vadd.f32 0.4, %v1231_v2  ;;  %v958_v60 = vsel %vm955_vm2, %v957_v16, %v953_v27  ;;  %v1776_v1 = vmul.f32 1.442695, %v3732_v26  ;;  %v1520_v55 = vsub.f32 %v1296_v49, %v1411_v29  ;;  %v1300_v27 = vld [vmem:[#allocation6 + $0x120] sm:$0xff] }
 0x1c4   :  { %v3918_v35 = vpop.eup %3917  ;;  %v5281_v3 = vadd.f32 1.0, %v3916_v51  ;;  %v1215_v34 = vmul.f32 0.5, %v958_v60  ;;  %v1778_v63 = vmul.f32 1.442695, %v3733_v6  ;;  %v3701_v52 = vmul.f32 -50.0, %v1505_v5  ;;  %v1301_v6 = vld [vmem:[#allocation6 + $0x128] sm:$0xff] }
 0x1c5   :  { %v5283_v8 = vadd.f32 1.0, %v3918_v35  ;;  %1485 = vperm.xlu1 %3783, %v1263_v43   ;;  %3919 = vpow2.f32 %v1776_v1  ;;  %v1376_v46 = vpop.permute.xlu2 %1375  ;;  %v1712_v61 = vmul.f32 1.442695, %v3700_v45  ;;  %v1521_v39 = vsub.f32 %v1297_v32, %v1411_v29 }
 0x1c6   :  { %3921 = vrcp.f32 %v5281_v3  ;;  %v1247_v47 = vadd.f32 0.4, %v1215_v34  ;;  %v1506_v24 = vsub.f32 %v1282_v7, %v1376_v46  ;;  %v1507_v36 = vsub.f32 %v1283_v20, %v1376_v46  ;;  %v1456_v59 = vpop.permute.xlu1 %1455 }
 0x1c7   :  { %3923 = vrcp.f32 %v5283_v8  ;;  %v1714_v53 = vmul.f32 1.442695, %v3701_v52  ;;  %v3716_v56 = vmul.f32 -50.0, %v1520_v55  ;;  %v3717_v22 = vmul.f32 -50.0, %v1521_v39 }
 0x1c8   :  { %3925 = vpow2.f32 %v1778_v63  ;;  %v3702_v9 = vmul.f32 -50.0, %v1506_v24  ;;  %v3703_v48 = vmul.f32 -50.0, %v1507_v36  ;;  %v1881_v18 = vand.u32 2147483647, %v5281_v3 }
 0x1c9   :  { %1405 = vperm.xlu2 %3781, %v1247_v47   ;;  %3927 = vpow2.f32 %v1712_v61  ;;  %v1744_v37 = vmul.f32 1.442695, %v3716_v56  ;;  %v1883_v54 = vand.u32 2147483648, %v5281_v3  ;;  %v1746_v40 = vmul.f32 1.442695, %v3717_v22  ;;  %v1267_v61 = vld [vmem:[#allocation6 + $0x18] sm:$0xff] }
 0x1ca   :  { %v1716_v58 = vmul.f32 1.442695, %v3702_v9  ;;  %v1718_v28 = vmul.f32 1.442695, %v3703_v48  ;;  %3929 = vpow2.f32 %v1714_v53  ;;  %v1896_v13 = vand.u32 2147483647, %v5283_v8 }
 0x1cb   :  { %v3920_v44 = vpop.eup %3919  ;;  %3931 = vpow2.f32 %v1744_v37  ;;  %vm1877_vm3 = vweird.f32 %v5281_v3  ;;  %v1898_v10 = vand.u32 2147483648, %v5283_v8  ;;  %v1884_v33 = vor.u32 1.1754944e-38, %v1883_v54 }
 0x1cc   :  { %v5290_v57 = vpop.eup %3921  ;;  %v5292_v0 = vadd.f32 1.0, %v3920_v44  ;;  %3933 = vpow2.f32 %v1716_v58  ;;  %vm1892_vm5 = vweird.f32 %v5283_v8  ;;  %vm5303_vm6 = vcmp.eq.f32.partialorder %v1881_v18, 8.507059e+37  ;;  %v1336_v31 = vpop.permute.xlu0 %1335  ;;  %v1268_v18 = vld [vmem:[#allocation6 + $0x20] sm:$0xff]  ;;  %v1269_v58 = vld [vmem:[#allocation6 + $0x28] sm:$0xff] }
 0x1cd   :  { %v5296_v11 = vpop.eup %3923  ;;  %3935 = vpow2.f32 %v1718_v28  ;;  %v1873_v62 = vmul.f32 %v5290_v57, %v5281_v3  ;;  %vm1878_vm4 = vweird.f32 %v5290_v57  ;;  %v1899_v41 = vor.u32 1.1754944e-38, %v1898_v10 }
 0x1ce   :  { %v3926_v21 = vpop.eup %3925  ;;  %3937 = vrcp.f32 %v5292_v0  ;;  %v1888_v50 = vmul.f32 %v5296_v11, %v5283_v8  ;;  %vm1893_vm7 = vweird.f32 %v5296_v11  ;;  %vm5312_vm8 = vcmp.eq.f32.partialorder %v1896_v13, 8.507059e+37  ;;  %vm1879_vm9 = vmor %vm1877_vm3, %vm1878_vm4 }
 0x1cf   :  { %v3928_v12 = vpop.eup %3927  ;;  %v5310_v19 = vadd.f32 1.0, %v3926_v21  ;;  %3939 = vpow2.f32 %v1746_v40  ;;  %v1874_v30 = vsub.f32 1.0, %v1873_v62  ;;  %v1538_v4 = vsub.f32 %v1314_v42, %v1456_v59  ;;  %vm1894_vm10 = vmor %vm1892_vm5, %vm1893_vm7 }
 0x1d0   :  { %v3930_v25 = vpop.eup %3929  ;;  %v5316_v38 = vadd.f32 1.0, %v3928_v12  ;;  %v1889_v49 = vsub.f32 1.0, %v1888_v50  ;;  %v1539_v29 = vsub.f32 %v1315_v14, %v1456_v59  ;;  %v1490_v2 = vsub.f32 %v1266_v15, %v1336_v31  ;;  %v1271_v50 = vld [vmem:[#allocation6 + $0x38] sm:$0xff] }
 0x1d1   :  { %v3932_v16 = vpop.eup %3931  ;;  %3941 = vrcp.f32 %v5310_v19  ;;  %v5319_v26 = vadd.f32 1.0, %v3930_v25  ;;  %v1875_v5 = vmul.f32 %v5290_v57, %v1874_v30  ;;  %v3734_v45 = vmul.f32 -50.0, %v1538_v4 }
 0x1d2   :  { %v3934_v32 = vpop.eup %3933  ;;  %3943 = vrcp.f32 %v5316_v38  ;;  %v5323_v51 = vadd.f32 1.0, %v3932_v16  ;;  %v1890_v43 = vmul.f32 %v5296_v11, %v1889_v49  ;;  %v3735_v60 = vmul.f32 -50.0, %v1539_v29 }
 0x1d3   :  { %v3936_v1 = vpop.eup %3935  ;;  %v5326_v7 = vadd.f32 1.0, %v3934_v32  ;;  %3945 = vrcp.f32 %v5319_v26  ;;  %v1421_v20 = vpop.permute.xlu2 %1420  ;;  %v1876_v55 = vadd.f32 %v5290_v57, %v1875_v5  ;;  %v1780_v35 = vmul.f32 1.442695, %v3734_v45 }
 0x1d4   :  { %v5330_v34 = vpop.eup %3937  ;;  %v5332_v63 = vadd.f32 1.0, %v3936_v1  ;;  %3947 = vrcp.f32 %v5323_v51  ;;  %v1524_v52 = vsub.f32 %v1300_v27, %v1421_v20  ;;  %v1525_v46 = vsub.f32 %v1301_v6, %v1421_v20  ;;  %v1341_v28 = vpop.permute.xlu1 %1340 }
 0x1d5   :  { %v3940_v39 = vpop.eup %3939  ;;  %3949 = vrcp.f32 %v5326_v7  ;;  %v1880_v47 = vsel %vm1879_vm9, %v5290_v57, %v1876_v55  ;;  %v1891_v24 = vadd.f32 %v5296_v11, %v1890_v43  ;;  %v1782_v36 = vmul.f32 1.442695, %v3735_v60 }
 0x1d6   :  { %3951 = vrcp.f32 %v5332_v63  ;;  %v5343_v53 = vadd.f32 1.0, %v3940_v39  ;;  %v3720_v56 = vmul.f32 -50.0, %v1524_v52  ;;  %v3721_v22 = vmul.f32 -50.0, %v1525_v46 }
 0x1d7   :  { %v5349_v3 = vpop.eup %3941  ;;  %v5353_v9 = vsel %vm5303_vm6, %v1884_v33, %v1880_v47  ;;  %v1895_v48 = vsel %vm1894_vm10, %v5296_v11, %v1891_v24  ;;  %3953 = vpow2.f32 %v1780_v35  ;;  %v1491_v37 = vsub.f32 %v1267_v61, %v1336_v31 }
 0x1d8   :  { %7327 = vst [vmem:[#allocation13_spill] sm:$0xff] %v5353_v9  ;;  %v5356_v54 = vpop.eup %3943  ;;  %3955 = vrcp.f32 %v5343_v53  ;;  %v1752_v44 = vmul.f32 1.442695, %v3720_v56  ;;  %v1754_v8 = vmul.f32 1.442695, %v3721_v22  ;;  %v5361_v40 = vsel %vm5312_vm8, %v1899_v41, %v1895_v48  ;;  %v5382_v5 = vpop.permute.xlu0 %1415 }
 0x1d9   :  { %7328 = vst [vmem:[#allocation14_spill] sm:$0xff] %v5361_v40  ;;  %v5363_v13 = vpop.eup %3945  ;;  %v2832_v57 = vand.u32 2147483647, %v5353_v9  ;;  %v2833_v10 = vand.u32 2147483647, %v5361_v40  ;;  %3957 = vpow2.f32 %v1782_v36  ;;  %v3686_v42 = vmul.f32 -50.0, %v1490_v2 }
 0x1da   :  { %v5367_v59 = vpop.eup %3947  ;;  %3959 = vpow2.f32 %v1752_v44  ;;  %v3687_v11 = vmul.f32 -50.0, %v1491_v37  ;;  %v1492_v62 = vsub.f32 %v1268_v18, %v1341_v28  ;;  %v1493_v33 = vsub.f32 %v1269_v58, %v1341_v28 }
 0x1db   :  { %v5369_v14 = vpop.eup %3949  ;;  %3961 = vpow2.f32 %v1754_v8  ;;  %v2896_v21 = vadd.f32 %v2833_v10, %v2832_v57  ;;  %v1684_v41 = vmul.f32 1.442695, %v3686_v42  ;;  %v2593_v12 = vmul.f32 %v5330_v34, %v5292_v0  ;;  %v1299_v8 = vld [vmem:[#allocation6 + $0x118] sm:$0xff] }
 0x1dc   :  { %v5373_v30 = vpop.eup %3951  ;;  %v1686_v17 = vmul.f32 1.442695, %v3687_v11  ;;  %v3688_v4 = vmul.f32 -50.0, %v1492_v62  ;;  %v3689_v15 = vmul.f32 -50.0, %v1493_v33  ;;  %vm2597_vm11 = vweird.f32 %v5292_v0 }
 0x1dd   :  { %v3954_v31 = vpop.eup %3953  ;;  %v1346_v25 = vpop.permute.xlu2 %1345  ;;  %3963 = vpow2.f32 %v1684_v41  ;;  %v2594_v49 = vsub.f32 1.0, %v2593_v12  ;;  %vm2598_vm12 = vweird.f32 %v5330_v34  ;;  %v2601_v29 = vand.u32 2147483647, %v5292_v0  ;;  %v1284_v12 = vld [vmem:[#allocation6 + $0xa0] sm:$0xff] }
 0x1de   :  { %v5378_v2 = vpop.eup %3955  ;;  %v5380_v16 = vadd.f32 1.0, %v3954_v31  ;;  %v1494_v27 = vsub.f32 %v1270_v23, %v1346_v25  ;;  %v1495_v6 = vsub.f32 %v1271_v50, %v1346_v25  ;;  %3965 = vpow2.f32 %v1686_v17  ;;  %vm5403_vm14 = vmor %vm2597_vm11, %vm2598_vm12  ;;  %v1285_v17 = vld [vmem:[#allocation6 + $0xa8] sm:$0xff] }
 0x1df   :  { %v3958_v45 = vpop.eup %3957  ;;  %v1688_v32 = vmul.f32 1.442695, %v3688_v4  ;;  %v1690_v43 = vmul.f32 1.442695, %v3689_v15  ;;  %v2595_v60 = vmul.f32 %v5330_v34, %v2594_v49  ;;  %vm5385_vm13 = vcmp.eq.f32.partialorder %v2601_v29, 8.507059e+37  ;;  %v1316_v29 = vld [vmem:[#allocation6 + $0x1a0] sm:$0xff] }
 0x1e0   :  { %v3960_v20 = vpop.eup %3959  ;;  %2897 = vadd.xlane.f32.xlu0 %v2896_v21  ;;  %v5389_v55 = vadd.f32 1.0, %v3958_v45  ;;  %3967 = vrcp.f32 %v5380_v16  ;;  %v3690_v35 = vmul.f32 -50.0, %v1494_v27  ;;  %v3691_v52 = vmul.f32 -50.0, %v1495_v6  ;;  %v1317_v27 = vld [vmem:[#allocation6 + $0x1a8] sm:$0xff] }
 0x1e1   :  { %v3962_v46 = vpop.eup %3961  ;;  %v5392_v61 = vadd.f32 1.0, %v3960_v20  ;;  %3969 = vpow2.f32 %v1688_v32  ;;  %v2596_v39 = vadd.f32 %v5330_v34, %v2595_v60  ;;  %v2603_v47 = vand.u32 2147483648, %v5292_v0  ;;  %v1298_v0 = vld [vmem:[#allocation6 + $0x110] sm:$0xff]  ;;  %v1319_v60 = vld [vmem:[#allocation6 + $0x1b8] sm:$0xff] }
 0x1e2   :  { %v5396_v24 = vadd.f32 1.0, %v3962_v46  ;;  %3971 = vrcp.f32 %v5389_v55  ;;  %v1692_v36 = vmul.f32 1.442695, %v3690_v35  ;;  %v1694_v56 = vmul.f32 1.442695, %v3691_v52  ;;  %v1318_v32 = vld [vmem:[#allocation6 + $0x1b0] sm:$0xff] }
 0x1e3   :  { %v3964_v48 = vpop.eup %3963  ;;  %3973 = vrcp.f32 %v5392_v61  ;;  %v2600_v37 = vsel %vm5403_vm14, %v5330_v34, %v2596_v39  ;;  %v2604_v18 = vor.u32 1.1754944e-38, %v2603_v47  ;;  %v2608_v58 = vmul.f32 %v5349_v3, %v5310_v19 }
 0x1e4   :  { %v3966_v28 = vpop.eup %3965  ;;  %3975 = vrcp.f32 %v5396_v24  ;;  %v5414_v44 = vadd.f32 1.0, %v3964_v48  ;;  %vm2612_vm15 = vweird.f32 %v5310_v19  ;;  %vm2613_vm0 = vweird.f32 %v5349_v3  ;;  %v1381_v4 = vpop.permute.xlu1 %1380 }
 0x1e5   :  { %3977 = vpow2.f32 %v1692_v36  ;;  %v5418_v57 = vadd.f32 1.0, %v3966_v28  ;;  %v5422_v34 = vsel %vm5385_vm13, %v2604_v18, %v2600_v37  ;;  %v2609_v10 = vsub.f32 1.0, %v2608_v58  ;;  %vm2614_vm2 = vmor %vm2612_vm15, %vm2613_vm0 }
 0x1e6   :  { %7333 = vst [vmem:[#allocation15_spill] sm:$0xff] %v5422_v34  ;;  %v5424_v42 = vpop.eup %3967  ;;  %3979 = vpow2.f32 %v1694_v56  ;;  %v2616_v11 = vand.u32 2147483647, %v5310_v19  ;;  %v2618_v62 = vand.u32 2147483648, %v5310_v19  ;;  %v2880_v33 = vand.u32 2147483647, %v5422_v34 }
 0x1e7   :  { %v3970_v21 = vpop.eup %3969  ;;  %3981 = vrcp.f32 %v5414_v44  ;;  %v2610_v23 = vmul.f32 %v5349_v3, %v2609_v10  ;;  %v1522_v50 = vsub.f32 %v1298_v0, %v5382_v5  ;;  %v1523_v41 = vsub.f32 %v1299_v8, %v5382_v5  ;;  %v1461_v6 = vpop.permute.xlu0 %1460 }
 0x1e8   :  { %v5433_v15 = vpop.eup %3971  ;;  %3983 = vrcp.f32 %v5418_v57  ;;  %v5436_v31 = vadd.f32 1.0, %v3970_v21  ;;  %vm5438_vm1 = vcmp.eq.f32.partialorder %v2616_v11, 8.507059e+37  ;;  %v2619_v49 = vor.u32 1.1754944e-38, %v2618_v62 }
 0x1e9   :  { %v5442_v45 = vpop.eup %3973  ;;  %3985 = vpow2.f32 %v1690_v43  ;;  %v2611_v5 = vadd.f32 %v5349_v3, %v2610_v23  ;;  %v3718_v1 = vmul.f32 -50.0, %v1522_v50  ;;  %v3719_v20 = vmul.f32 -50.0, %v1523_v41 }
 0x1ea   :  { %v5445_v35 = vpop.eup %3975  ;;  %3987 = vrcp.f32 %v5436_v31  ;;  %v1508_v52 = vsub.f32 %v1284_v12, %v1381_v4  ;;  %v1509_v46 = vsub.f32 %v1285_v17, %v1381_v4  ;;  %v1540_v39 = vsub.f32 %v1316_v29, %v1461_v6 }
 0x1eb   :  { %v3978_v47 = vpop.eup %3977  ;;  %v2615_v43 = vsel %vm2614_vm2, %v5349_v3, %v2611_v5  ;;  %v1466_v36 = vpop.permute.xlu2 %1465  ;;  %v1748_v56 = vmul.f32 1.442695, %v3718_v1  ;;  %v1750_v22 = vmul.f32 1.442695, %v3719_v20  ;;  %v1541_v48 = vsub.f32 %v1317_v27, %v1461_v6 }
 0x1ec   :  { %v3980_v37 = vpop.eup %3979  ;;  %v5453_v18 = vadd.f32 1.0, %v3978_v47  ;;  %v5457_v58 = vsel %vm5438_vm1, %v2619_v49, %v2615_v43  ;;  %v1542_v28 = vsub.f32 %v1318_v32, %v1466_v36  ;;  %v1543_v19 = vsub.f32 %v1319_v60, %v1466_v36  ;;  %v1272_v32 = vld [vmem:[#allocation6 + $0x40] sm:$0xff]  ;;  %v1273_v60 = vld [vmem:[#allocation6 + $0x48] sm:$0xff] }
 0x1ed   :  { %7336 = vst [vmem:[#allocation16_spill] sm:$0xff] %v5457_v58  ;;  %v5459_v0 = vpop.eup %3981  ;;  %v5461_v8 = vadd.f32 1.0, %v3980_v37  ;;  %v2881_v10 = vand.u32 2147483647, %v5457_v58  ;;  %3989 = vpow2.f32 %v1748_v56  ;;  %v3704_v3 = vmul.f32 -50.0, %v1508_v52 }
 0x1ee   :  { %v5464_v11 = vpop.eup %3983  ;;  %3991 = vrcp.f32 %v5453_v18  ;;  %v3738_v62 = vmul.f32 -50.0, %v1542_v28  ;;  %v3739_v21 = vmul.f32 -50.0, %v1543_v19  ;;  %v3705_v23 = vmul.f32 -50.0, %v1509_v46  ;;  %v1287_v28 = vld [vmem:[#allocation6 + $0xb8] sm:$0xff] }
 0x1ef   :  { %v3986_v50 = vpop.eup %3985  ;;  %3993 = vrcp.f32 %v5461_v8  ;;  %v2968_v41 = vadd.f32 %v2881_v10, %v2880_v33  ;;  %v1720_v12 = vmul.f32 1.442695, %v3704_v3  ;;  %v3736_v17 = vmul.f32 -50.0, %v1540_v39 }
 0x1f0   :  { %v5468_v4 = vpop.eup %3987  ;;  %v5470_v25 = vadd.f32 1.0, %v3986_v50  ;;  %v1788_v49 = vmul.f32 1.442695, %v3738_v62  ;;  %v1790_v29 = vmul.f32 1.442695, %v3739_v21  ;;  %3995 = vpow2.f32 %v1750_v22 }
 0x1f1   :  { %3997 = vpow2.f32 %v1720_v12  ;;  %v1722_v27 = vmul.f32 1.442695, %v3705_v23  ;;  %v3737_v6 = vmul.f32 -50.0, %v1541_v48  ;;  %v1784_v5 = vmul.f32 1.442695, %v3736_v17 }
 0x1f2   :  { %3999 = vrcp.f32 %v5470_v25  ;;  %2969 = vadd.xlane.f32.xlu2 %v2968_v41  ;;  %v2113_v33 = vmul.f32 %v5356_v54, %v5316_v38  ;;  %vm2117_vm3 = vweird.f32 %v5316_v38  ;;  %vm2118_vm4 = vweird.f32 %v5356_v54 }
 0x1f3   :  { %v3990_v1 = vpop.eup %3989  ;;  %4001 = vpow2.f32 %v1788_v49  ;;  %v1786_v20 = vmul.f32 1.442695, %v3737_v6  ;;  %v2121_v52 = vand.u32 2147483647, %v5316_v38  ;;  %v2123_v46 = vand.u32 2147483648, %v5316_v38  ;;  %vm2119_vm6 = vmor %vm2117_vm3, %vm2118_vm4 }
 0x1f4   :  { %v5479_v39 = vpop.eup %3991  ;;  %4003 = vpow2.f32 %v1790_v29  ;;  %v5481_v47 = vadd.f32 1.0, %v3990_v1  ;;  %v1351_v43 = vpop.permute.xlu2 %1350  ;;  %v2114_v36 = vsub.f32 1.0, %v2113_v33  ;;  %v2128_v56 = vmul.f32 %v5363_v13, %v5319_v26 }
 0x1f5   :  { %v5485_v22 = vpop.eup %3993  ;;  %4005 = vpow2.f32 %v1722_v27  ;;  %v1496_v48 = vsub.f32 %v1272_v32, %v1351_v43  ;;  %v1497_v37 = vsub.f32 %v1273_v60, %v1351_v43  ;;  %vm5487_vm5 = vcmp.eq.f32.partialorder %v2121_v52, 8.507059e+37  ;;  %v1386_v52 = vpop.permute.xlu0 %1385 }
 0x1f6   :  { %v3996_v19 = vpop.eup %3995  ;;  %4007 = vrcp.f32 %v5481_v47  ;;  %v2115_v10 = vmul.f32 %v5356_v54, %v2114_v36  ;;  %v2124_v3 = vor.u32 1.1754944e-38, %v2123_v46  ;;  %v2129_v62 = vsub.f32 1.0, %v2128_v56 }
 0x1f7   :  { %v3998_v21 = vpop.eup %3997  ;;  %v5493_v23 = vadd.f32 1.0, %v3996_v19  ;;  %v3692_v50 = vmul.f32 -50.0, %v1496_v48  ;;  %v3693_v41 = vmul.f32 -50.0, %v1497_v37  ;;  %4009 = vpow2.f32 %v1784_v5 }
 0x1f8   :  { %v5495_v12 = vpop.eup %3999  ;;  %v5497_v17 = vadd.f32 1.0, %v3998_v21  ;;  %4011 = vpow2.f32 %v1786_v20  ;;  %v2116_v49 = vadd.f32 %v5356_v54, %v2115_v10  ;;  %v2130_v29 = vmul.f32 %v5363_v13, %v2129_v62  ;;  %v1286_v20 = vld [vmem:[#allocation6 + $0xb0] sm:$0xff]  ;;  %v1288_v62 = vld [vmem:[#allocation6 + $0xc0] sm:$0xff]  ;;  %v1289_v21 = vld [vmem:[#allocation6 + $0xc8] sm:$0xff] }
 0x1f9   :  { %v4002_v27 = vpop.eup %4001  ;;  %4013 = vrcp.f32 %v5493_v23  ;;  %v1696_v6 = vmul.f32 1.442695, %v3692_v50  ;;  %v1698_v32 = vmul.f32 1.442695, %v3693_v41  ;;  %vm2132_vm7 = vweird.f32 %v5319_v26 }
 0x1fa   :  { %v4004_v5 = vpop.eup %4003  ;;  %v5507_v60 = vadd.f32 1.0, %v4002_v27  ;;  %4015 = vrcp.f32 %v5497_v17  ;;  %v2120_v33 = vsel %vm2119_vm6, %v5356_v54, %v2116_v49  ;;  %v2131_v1 = vadd.f32 %v5363_v13, %v2130_v29 }
 0x1fb   :  { %v4006_v46 = vpop.eup %4005  ;;  %v5512_v43 = vadd.f32 1.0, %v4004_v5  ;;  %4017 = vpow2.f32 %v1696_v6  ;;  %v5516_v38 = vsel %vm5487_vm5, %v2124_v3, %v2120_v33  ;;  %vm2133_vm8 = vweird.f32 %v5363_v13 }
 0x1fc   :  { %7340 = vst [vmem:[#allocation18_spill] sm:$0xff] %v5516_v38  ;;  %v5519_v36 = vpop.eup %4007  ;;  %4019 = vrcp.f32 %v5507_v60  ;;  %v5522_v56 = vadd.f32 1.0, %v4006_v46  ;;  %vm5526_vm9 = vmor %vm2132_vm7, %vm2133_vm8  ;;  %v2136_v48 = vand.u32 2147483647, %v5319_v26  ;;  %v2138_v37 = vand.u32 2147483648, %v5319_v26 }
 0x1fd   :  { %7339 = vst [vmem:[#allocation17_spill] sm:$0xff] %v5512_v43  ;;  %v4010_v19 = vpop.eup %4009  ;;  %4021 = vrcp.f32 %v5512_v43  ;;  %v2135_v10 = vsel %vm5526_vm9, %v5363_v13, %v2131_v1  ;;  %v2848_v3 = vand.u32 2147483647, %v5516_v38  ;;  %v1510_v50 = vsub.f32 %v1286_v20, %v1386_v52 }
 0x1fe   :  { %v4012_v41 = vpop.eup %4011  ;;  %4023 = vrcp.f32 %v5522_v56  ;;  %v5538_v49 = vadd.f32 1.0, %v4010_v19  ;;  %vm2137_vm10 = vcmp.eq.f32.partialorder %v2136_v48, 8.507059e+37  ;;  %v2139_v26 = vor.u32 1.1754944e-38, %v2138_v37 }
 0x1ff   :  { %v5540_v29 = vpop.eup %4013  ;;  %4025 = vpow2.f32 %v1698_v32  ;;  %v5542_v27 = vadd.f32 1.0, %v4012_v41  ;;  %v1391_v6 = vpop.permute.xlu2 %1390  ;;  %v1511_v5 = vsub.f32 %v1287_v28, %v1386_v52  ;;  %v3706_v13 = vmul.f32 -50.0, %v1510_v50 }
 0x200   :  { %v5544_v33 = vpop.eup %4015  ;;  %4027 = vrcp.f32 %v5538_v49  ;;  %v5547_v1 = vsel %vm2137_vm10, %v2139_v26, %v2135_v10  ;;  %v1512_v20 = vsub.f32 %v1288_v62, %v1391_v6  ;;  %v1513_v46 = vsub.f32 %v1289_v21, %v1391_v6 }
 0x201   :  { %7343 = vst [vmem:[#allocation19_spill] sm:$0xff] %v5547_v1  ;;  %v4018_v54 = vpop.eup %4017  ;;  %4029 = vrcp.f32 %v5542_v27  ;;  %v2849_v48 = vand.u32 2147483647, %v5547_v1  ;;  %v3707_v37 = vmul.f32 -50.0, %v1511_v5  ;;  %v1724_v32 = vmul.f32 1.442695, %v3706_v13 }
 0x202   :  { %v5551_v19 = vpop.eup %4019  ;;  %v5553_v41 = vadd.f32 1.0, %v4018_v54  ;;  %v3708_v52 = vmul.f32 -50.0, %v1512_v20  ;;  %v3709_v28 = vmul.f32 -50.0, %v1513_v46  ;;  %v2353_v50 = vmul.f32 %v5367_v59, %v5323_v51 }
 0x203   :  { %v5557_v10 = vpop.eup %4021  ;;  %v2920_v62 = vadd.f32 %v2849_v48, %v2848_v3  ;;  %4031 = vpow2.f32 %v1724_v32  ;;  %v1726_v21 = vmul.f32 1.442695, %v3707_v37  ;;  %vm2357_vm11 = vweird.f32 %v5323_v51 }
 0x204   :  { %7344 = vst [vmem:[#allocation20_spill] sm:$0xff] %v5553_v41  ;;  %v5560_v26 = vpop.eup %4023  ;;  %4033 = vrcp.f32 %v5553_v41  ;;  %v1728_v6 = vmul.f32 1.442695, %v3708_v52  ;;  %v1730_v5 = vmul.f32 1.442695, %v3709_v28  ;;  %v2354_v13 = vsub.f32 1.0, %v2353_v50  ;;  %v1426_v50 = vpop.permute.xlu1 %1425 }
 0x205   :  { %7345 = vst [vmem:[#allocation21_spill] sm:$0xff] %v5557_v10  ;;  %v4026_v54 = vpop.eup %4025  ;;  %2921 = vadd.xlane.f32.xlu1 %v2920_v62  ;;  %4035 = vpow2.f32 %v1726_v21  ;;  %vm2358_vm12 = vweird.f32 %v5367_v59  ;;  %v2361_v20 = vand.u32 2147483647, %v5323_v51  ;;  %v2363_v3 = vand.u32 2147483648, %v5323_v51  ;;  %v1302_v52 = vld [vmem:[#allocation6 + $0x130] sm:$0xff]  ;;  %v1303_v28 = vld [vmem:[#allocation6 + $0x138] sm:$0xff] }
 0x206   :  { %v5566_v46 = vpop.eup %4027  ;;  %v5568_v48 = vadd.f32 1.0, %v4026_v54  ;;  %4037 = vpow2.f32 %v1728_v6  ;;  %v2355_v37 = vmul.f32 %v5367_v59, %v2354_v13  ;;  %v2368_v32 = vmul.f32 %v5378_v2, %v5343_v53  ;;  %v1306_v54 = vld [vmem:[#allocation6 + $0x150] sm:$0xff]  ;;  %vm2359_vm0 = vmor %vm2357_vm11, %vm2358_vm12 }
 0x207   :  { %v5573_v62 = vpop.eup %4029  ;;  %4039 = vpow2.f32 %v1730_v5  ;;  %vm5575_vm13 = vcmp.eq.f32.partialorder %v2361_v20, 8.507059e+37  ;;  %v2364_v1 = vor.u32 1.1754944e-38, %v2363_v3  ;;  %vm2372_vm14 = vweird.f32 %v5343_v53 }
 0x208   :  { %7346 = vst [vmem:[#allocation22_spill] sm:$0xff] %v5568_v48  ;;  %4041 = vrcp.f32 %v5568_v48  ;;  %v2356_v6 = vadd.f32 %v5367_v59, %v2355_v37  ;;  %v2369_v13 = vsub.f32 1.0, %v2368_v32  ;;  %vm2373_vm15 = vweird.f32 %v5378_v2  ;;  %v1307_v48 = vld [vmem:[#allocation6 + $0x158] sm:$0xff] }
 0x209   :  { %v4032_v38 = vpop.eup %4031  ;;  %v2376_v5 = vand.u32 2147483647, %v5343_v53  ;;  %v2378_v20 = vand.u32 2147483648, %v5343_v53  ;;  %v1526_v3 = vsub.f32 %v1302_v52, %v1426_v50  ;;  %v1527_v58 = vsub.f32 %v1303_v28, %v1426_v50  ;;  %v1436_v34 = vpop.permute.xlu2 %1435  ;;  %vm2374_vm2 = vmor %vm2372_vm14, %vm2373_vm15 }
 0x20a   :  { %v5589_v40 = vpop.eup %4033  ;;  %v5591_v9 = vadd.f32 1.0, %v4032_v38  ;;  %v2360_v37 = vsel %vm2359_vm0, %v5367_v59, %v2356_v6  ;;  %v2370_v32 = vmul.f32 %v5378_v2, %v2369_v13  ;;  %v1530_v41 = vsub.f32 %v1306_v54, %v1436_v34 }
 0x20b   :  { %7349 = vst [vmem:[#allocation23_spill] sm:$0xff] %v5589_v40  ;;  %v4036_v10 = vpop.eup %4035  ;;  %v5597_v51 = vsel %vm5575_vm13, %v2364_v1, %v2360_v37  ;;  %vm5599_vm1 = vcmp.eq.f32.partialorder %v2376_v5, 8.507059e+37  ;;  %v2379_v52 = vor.u32 1.1754944e-38, %v2378_v20  ;;  %v3722_v28 = vmul.f32 -50.0, %v1526_v3  ;;  %v1304_v20 = vld [vmem:[#allocation6 + $0x140] sm:$0xff] }
 0x20c   :  { %7350 = vst [vmem:[#allocation24_spill] sm:$0xff] %v5597_v51  ;;  %v4038_v50 = vpop.eup %4037  ;;  %v5603_v38 = vadd.f32 1.0, %v4036_v10  ;;  %4043 = vrcp.f32 %v5591_v9  ;;  %v2371_v59 = vadd.f32 %v5378_v2, %v2370_v32  ;;  %v2864_v54 = vand.u32 2147483647, %v5597_v51  ;;  %v1431_v10 = vpop.permute.xlu0 %1430  ;;  %v1305_v51 = vld [vmem:[#allocation6 + $0x148] sm:$0xff] }
 0x20d   :  { %v4040_v6 = vpop.eup %4039  ;;  %v5608_v13 = vadd.f32 1.0, %v4038_v50  ;;  %v3723_v1 = vmul.f32 -50.0, %v1527_v58  ;;  %v1756_v21 = vmul.f32 1.442695, %v3722_v28  ;;  %v1531_v5 = vsub.f32 %v1307_v48, %v1436_v34 }
 0x20e   :  { %v5614_v3 = vpop.eup %4041  ;;  %v5616_v37 = vadd.f32 1.0, %v4040_v6  ;;  %4045 = vrcp.f32 %v5603_v38  ;;  %v2375_v32 = vsel %vm2374_vm2, %v5378_v2, %v2371_v59  ;;  %v3726_v50 = vmul.f32 -50.0, %v1530_v41 }
 0x20f   :  { %7353 = vst [vmem:[#allocation25_spill] sm:$0xff] %v5608_v13  ;;  %4047 = vrcp.f32 %v5608_v13  ;;  %v5623_v53 = vsel %vm5599_vm1, %v2379_v52, %v2375_v32  ;;  %v1758_v58 = vmul.f32 1.442695, %v3723_v1  ;;  %v3727_v34 = vmul.f32 -50.0, %v1531_v5 }
 0x210   :  { %7354 = vst [vmem:[#allocation26_spill] sm:$0xff] %v5614_v3  ;;  %4049 = vrcp.f32 %v5616_v37  ;;  %v2865_v48 = vand.u32 2147483647, %v5623_v53  ;;  %v1764_v28 = vmul.f32 1.442695, %v3726_v50  ;;  %v1528_v6 = vsub.f32 %v1304_v20, %v1431_v10 }
 0x211   :  { %7355 = vst [vmem:[#allocation27_spill] sm:$0xff] %v5616_v37  ;;  %4051 = vpow2.f32 %v1756_v21  ;;  %v1766_v3 = vmul.f32 1.442695, %v3727_v34  ;;  %v1529_v40 = vsub.f32 %v1305_v51, %v1431_v10  ;;  %v2623_v2 = vmul.f32 %v5424_v42, %v5380_v16 }
 0x212   :  { %7356 = vst [vmem:[#allocation28_spill] sm:$0xff] %v5623_v53  ;;  %v5629_v41 = vpop.eup %4043  ;;  %v2944_v59 = vadd.f32 %v2865_v48, %v2864_v54  ;;  %4053 = vpow2.f32 %v1758_v58  ;;  %v3724_v43 = vmul.f32 -50.0, %v1528_v6  ;;  %vm2627_vm3 = vweird.f32 %v5380_v16  ;;  %v1471_v53 = vpop.permute.xlu1 %1470 }
 0x213   :  { %4055 = vpow2.f32 %v1764_v28  ;;  %v3725_v52 = vmul.f32 -50.0, %v1529_v40  ;;  %v2624_v1 = vsub.f32 1.0, %v2623_v2  ;;  %vm2628_vm4 = vweird.f32 %v5424_v42 }
 0x214   :  { %v5633_v5 = vpop.eup %4045  ;;  %2945 = vadd.xlane.f32.xlu0 %v2944_v59  ;;  %4057 = vpow2.f32 %v1766_v3  ;;  %v1760_v51 = vmul.f32 1.442695, %v3724_v43  ;;  %v2631_v21 = vand.u32 2147483647, %v5380_v16  ;;  %v2633_v20 = vand.u32 2147483648, %v5380_v16  ;;  %vm2629_vm8 = vmor %vm2627_vm3, %vm2628_vm4 }
 0x215   :  { %v5637_v10 = vpop.eup %4047  ;;  %v1762_v54 = vmul.f32 1.442695, %v3725_v52  ;;  %v2625_v32 = vmul.f32 %v5424_v42, %v2624_v1  ;;  %v2638_v40 = vmul.f32 %v5433_v15, %v5389_v55  ;;  %vm2642_vm5 = vweird.f32 %v5389_v55 }
 0x216   :  { %7357 = vst [vmem:[#allocation29_spill] sm:$0xff] %v5637_v10  ;;  %v5643_v50 = vpop.eup %4049  ;;  %4059 = vpow2.f32 %v1760_v51  ;;  %vm5645_vm6 = vcmp.eq.f32.partialorder %v2631_v21, 8.507059e+37  ;;  %v2634_v58 = vor.u32 1.1754944e-38, %v2633_v20  ;;  %vm2643_vm7 = vweird.f32 %v5433_v15 }
 0x217   :  { %7358 = vst [vmem:[#allocation30_spill] sm:$0xff] %v5643_v50  ;;  %v4052_v34 = vpop.eup %4051  ;;  %4061 = vpow2.f32 %v1762_v54  ;;  %v2626_v48 = vadd.f32 %v5424_v42, %v2625_v32  ;;  %v2639_v28 = vsub.f32 1.0, %v2638_v40  ;;  %v2646_v6 = vand.u32 2147483647, %v5389_v55  ;;  %vm2644_vm11 = vmor %vm2642_vm5, %vm2643_vm7  ;;  %v1276_v54 = vld [vmem:[#allocation6 + $0x60] sm:$0xff] }
 0x218   :  { %v4054_v2 = vpop.eup %4053  ;;  %v5652_v59 = vadd.f32 1.0, %v4052_v34  ;;  %v2648_v43 = vand.u32 2147483648, %v5389_v55  ;;  %v1903_v52 = vmul.f32 %v5459_v0, %v5414_v44  ;;  %vm1907_vm9 = vweird.f32 %v5414_v44 }
 0x219   :  { %v4056_v1 = vpop.eup %4055  ;;  %v5662_v51 = vadd.f32 1.0, %v4054_v2  ;;  %v2630_v21 = vsel %vm2629_vm8, %v5424_v42, %v2626_v48  ;;  %v2640_v20 = vmul.f32 %v5433_v15, %v2639_v28  ;;  %vm5666_vm10 = vcmp.eq.f32.partialorder %v2646_v6, 8.507059e+37 }
 0x21a   :  { %v4058_v16 = vpop.eup %4057  ;;  %4063 = vrcp.f32 %v5652_v59  ;;  %v5671_v32 = vadd.f32 1.0, %v4056_v1  ;;  %v5675_v40 = vsel %vm5645_vm6, %v2634_v58, %v2630_v21  ;;  %v2649_v34 = vor.u32 1.1754944e-38, %v2648_v43 }
 0x21b   :  { %7364 = vst [vmem:[#allocation32_spill] sm:$0xff] %v5675_v40  ;;  %4065 = vrcp.f32 %v5662_v51  ;;  %v5678_v2 = vadd.f32 1.0, %v4058_v16  ;;  %v2641_v42 = vadd.f32 %v5433_v15, %v2640_v20  ;;  %v2882_v48 = vand.u32 2147483647, %v5675_v40 }
 0x21c   :  { %7363 = vst [vmem:[#allocation31_spill] sm:$0xff] %v5671_v32  ;;  %v4060_v28 = vpop.eup %4059  ;;  %4067 = vrcp.f32 %v5671_v32  ;;  %v1904_v3 = vsub.f32 1.0, %v1903_v52  ;;  %vm1908_vm12 = vweird.f32 %v5459_v0  ;;  %v1911_v58 = vand.u32 2147483647, %v5414_v44 }
 0x21d   :  { %7365 = vst [vmem:[#allocation33_spill] sm:$0xff] %v5678_v2  ;;  %v4062_v6 = vpop.eup %4061  ;;  %4069 = vrcp.f32 %v5678_v2  ;;  %v5690_v43 = vadd.f32 1.0, %v4060_v28  ;;  %v2645_v1 = vsel %vm2644_vm11, %v5433_v15, %v2641_v42  ;;  %v1913_v21 = vand.u32 2147483648, %v5414_v44  ;;  %v1320_v42 = vld [vmem:[#allocation6 + $0x1c0] sm:$0xff]  ;;  %vm1909_vm0 = vmor %vm1907_vm9, %vm1908_vm12 }
 0x21e   :  { %v5694_v20 = vadd.f32 1.0, %v4062_v6  ;;  %v5698_v55 = vsel %vm5666_vm10, %v2649_v34, %v2645_v1  ;;  %v1905_v52 = vmul.f32 %v5459_v0, %v1904_v3  ;;  %vm5701_vm13 = vcmp.eq.f32.partialorder %v1911_v58, 8.507059e+37  ;;  %v1321_v6 = vld [vmem:[#allocation6 + $0x1c8] sm:$0xff]  ;;  %v1361_v34 = vpop.permute.xlu2 %1360 }
 0x21f   :  { %7366 = vst [vmem:[#allocation34_spill] sm:$0xff] %v5690_v43  ;;  %4071 = vrcp.f32 %v5690_v43  ;;  %v2883_v28 = vand.u32 2147483647, %v5698_v55  ;;  %v1914_v40 = vor.u32 1.1754944e-38, %v1913_v21  ;;  %v1918_v15 = vmul.f32 %v5464_v11, %v5418_v57 }
 0x220   :  { %7367 = vst [vmem:[#allocation35_spill] sm:$0xff] %v5694_v20  ;;  %v5709_v1 = vpop.eup %4063  ;;  %4073 = vrcp.f32 %v5694_v20  ;;  %v1906_v3 = vadd.f32 %v5459_v0, %v1905_v52  ;;  %vm1922_vm14 = vweird.f32 %v5418_v57  ;;  %vm1923_vm15 = vweird.f32 %v5464_v11  ;;  %v1277_v20 = vld [vmem:[#allocation6 + $0x68] sm:$0xff] }
 0x221   :  { %7368 = vst [vmem:[#allocation36_spill] sm:$0xff] %v5698_v55  ;;  %v5715_v58 = vpop.eup %4065  ;;  %v2971_v21 = vadd.f32 %v2883_v28, %v2882_v48  ;;  %v1919_v55 = vsub.f32 1.0, %v1918_v15  ;;  %v1926_v2 = vand.u32 2147483647, %v5418_v57  ;;  %v1928_v32 = vand.u32 2147483648, %v5418_v57  ;;  %vm1924_vm3 = vmor %vm1922_vm14, %vm1923_vm15 }
 0x222   :  { %v5723_v43 = vpop.eup %4067  ;;  %v1910_v52 = vsel %vm1909_vm0, %v5459_v0, %v1906_v3  ;;  %v1544_v50 = vsub.f32 %v1320_v42, %v1471_v53  ;;  %v1545_v37 = vsub.f32 %v1321_v6, %v1471_v53  ;;  %v1500_v10 = vsub.f32 %v1276_v54, %v1361_v34 }
 0x223   :  { %7371 = vst [vmem:[#allocation37_spill] sm:$0xff] %v5723_v43  ;;  %v5726_v13 = vpop.eup %4069  ;;  %2972 = vadd.xlane.f32.xlu0 %v2971_v21  ;;  %v5730_v44 = vsel %vm5701_vm13, %v1914_v40, %v1910_v52  ;;  %v1920_v48 = vmul.f32 %v5464_v11, %v1919_v55  ;;  %vm5733_vm1 = vcmp.eq.f32.partialorder %v1926_v2, 8.507059e+37  ;;  %v1929_v15 = vor.u32 1.1754944e-38, %v1928_v32 }
 0x224   :  { %7372 = vst [vmem:[#allocation38_spill] sm:$0xff] %v5730_v44  ;;  %v2834_v43 = vand.u32 2147483647, %v5730_v44  ;;  %v3740_v0 = vmul.f32 -50.0, %v1544_v50  ;;  %v3741_v42 = vmul.f32 -50.0, %v1545_v37  ;;  %v1501_v53 = vsub.f32 %v1277_v20, %v1361_v34 }
 0x225   :  { %v5738_v6 = vpop.eup %4071  ;;  %v1921_v54 = vadd.f32 %v5464_v11, %v1920_v48  ;;  %v3696_v3 = vmul.f32 -50.0, %v1500_v10  ;;  %v2143_v40 = vmul.f32 %v5369_v14, %v5326_v7  ;;  %vm2147_vm2 = vweird.f32 %v5326_v7 }
 0x226   :  { %v5744_v2 = vpop.eup %4073  ;;  %v1792_v50 = vmul.f32 1.442695, %v3740_v0  ;;  %v1794_v37 = vmul.f32 1.442695, %v3741_v42  ;;  %v3697_v32 = vmul.f32 -50.0, %v1501_v53  ;;  %vm2148_vm4 = vweird.f32 %v5369_v14 }
 0x227   :  { %v1925_v20 = vsel %vm1924_vm3, %v5464_v11, %v1921_v54  ;;  %v1704_v10 = vmul.f32 1.442695, %v3696_v3  ;;  %v2144_v55 = vsub.f32 1.0, %v2143_v40  ;;  %v2151_v16 = vand.u32 2147483647, %v5326_v7  ;;  %vm2149_vm8 = vmor %vm2147_vm2, %vm2148_vm4 }
 0x228   :  { %v5755_v34 = vsel %vm5733_vm1, %v1929_v15, %v1925_v20  ;;  %4075 = vpow2.f32 %v1792_v50  ;;  %v1706_v21 = vmul.f32 1.442695, %v3697_v32  ;;  %v2153_v57 = vand.u32 2147483648, %v5326_v7 }
 0x229   :  { %7375 = vst [vmem:[#allocation39_spill] sm:$0xff] %v5755_v34  ;;  %v2835_v52 = vand.u32 2147483647, %v5755_v34  ;;  %4077 = vpow2.f32 %v1794_v37  ;;  %v2145_v48 = vmul.f32 %v5369_v14, %v2144_v55  ;;  %vm5760_vm5 = vcmp.eq.f32.partialorder %v2151_v16, 8.507059e+37 }
 0x22a   :  { %4079 = vpow2.f32 %v1704_v10  ;;  %v2154_v11 = vor.u32 1.1754944e-38, %v2153_v57  ;;  %v2158_v28 = vmul.f32 %v5373_v30, %v5332_v63  ;;  %vm2162_vm6 = vweird.f32 %v5332_v63 }
 0x22b   :  { %v2899_v15 = vadd.f32 %v2835_v52, %v2834_v43  ;;  %4081 = vpow2.f32 %v1706_v21  ;;  %v2146_v42 = vadd.f32 %v5369_v14, %v2145_v48  ;;  %vm2163_vm7 = vweird.f32 %v5373_v30 }
 0x22c   :  { %v2159_v53 = vsub.f32 1.0, %v2158_v28  ;;  %v2166_v54 = vand.u32 2147483647, %v5332_v63  ;;  %v2168_v3 = vand.u32 2147483648, %v5332_v63  ;;  %v2383_v40 = vmul.f32 %v5519_v36, %v5481_v47  ;;  %vm2164_vm13 = vmor %vm2162_vm6, %vm2163_vm7 }
 0x22d   :  { %2900 = vadd.xlane.f32.xlu2 %v2899_v15  ;;  %v2150_v43 = vsel %vm2149_vm8, %v5369_v14, %v2146_v42  ;;  %vm2387_vm9 = vweird.f32 %v5481_v47  ;;  %vm2388_vm10 = vweird.f32 %v5519_v36  ;;  %v2391_v50 = vand.u32 2147483647, %v5481_v47 }
 0x22e   :  { %v4076_v37 = vpop.eup %4075  ;;  %v5783_v7 = vsel %vm5760_vm5, %v2154_v11, %v2150_v43  ;;  %v2160_v32 = vmul.f32 %v5373_v30, %v2159_v53  ;;  %vm5786_vm11 = vcmp.eq.f32.partialorder %v2166_v54, 8.507059e+37  ;;  %v2169_v10 = vor.u32 1.1754944e-38, %v2168_v3  ;;  %v1274_v43 = vld [vmem:[#allocation6 + $0x50] sm:$0xff]  ;;  %vm2389_vm15 = vmor %vm2387_vm9, %vm2388_vm10 }
 0x22f   :  { %7378 = vst [vmem:[#allocation40_spill] sm:$0xff] %v5783_v7  ;;  %v4078_v55 = vpop.eup %4077  ;;  %v5790_v14 = vadd.f32 1.0, %v4076_v37  ;;  %v2850_v16 = vand.u32 2147483647, %v5783_v7  ;;  %v2384_v21 = vsub.f32 1.0, %v2383_v40  ;;  %vm5793_vm12 = vcmp.eq.f32.partialorder %v2391_v50, 8.507059e+37  ;;  %v1356_v50 = vpop.permute.xlu1 %1355 }
 0x230   :  { %v4080_v52 = vpop.eup %4079  ;;  %v5797_v48 = vadd.f32 1.0, %v4078_v55  ;;  %v2161_v0 = vadd.f32 %v5373_v30, %v2160_v32  ;;  %v2393_v11 = vand.u32 2147483648, %v5481_v47  ;;  %v2398_v28 = vmul.f32 %v5540_v29, %v5493_v23  ;;  %v1275_v55 = vld [vmem:[#allocation6 + $0x58] sm:$0xff] }
 0x231   :  { %v4082_v15 = vpop.eup %4081  ;;  %4083 = vrcp.f32 %v5790_v14  ;;  %v5804_v42 = vadd.f32 1.0, %v4080_v52  ;;  %v2385_v53 = vmul.f32 %v5519_v36, %v2384_v21  ;;  %vm2402_vm14 = vweird.f32 %v5493_v23 }
 0x232   :  { %4085 = vrcp.f32 %v5797_v48  ;;  %v5813_v54 = vadd.f32 1.0, %v4082_v15  ;;  %v2165_v3 = vsel %vm2164_vm13, %v5373_v30, %v2161_v0  ;;  %v2394_v40 = vor.u32 1.1754944e-38, %v2393_v11  ;;  %v1322_v11 = vld [vmem:[#allocation6 + $0x1d0] sm:$0xff]  ;;  %v1476_v15 = vpop.permute.xlu0 %1475 }
 0x233   :  { %7383 = vst [vmem:[#allocation41_spill] sm:$0xff] %v5804_v42  ;;  %4087 = vrcp.f32 %v5804_v42  ;;  %v5819_v37 = vsel %vm5786_vm11, %v2169_v10, %v2165_v3  ;;  %v2386_v63 = vadd.f32 %v5519_v36, %v2385_v53  ;;  %v2399_v32 = vsub.f32 1.0, %v2398_v28  ;;  %v1323_v28 = vld [vmem:[#allocation6 + $0x1d8] sm:$0xff]  ;;  %v1324_v53 = vld [vmem:[#allocation6 + $0x1e0] sm:$0xff]  ;;  %v1481_v3 = vpop.permute.xlu2 %1480 }
 0x234   :  { %7384 = vst [vmem:[#allocation42_spill] sm:$0xff] %v5813_v54  ;;  %4089 = vrcp.f32 %v5813_v54  ;;  %v2851_v21 = vand.u32 2147483647, %v5819_v37  ;;  %vm2403_vm0 = vweird.f32 %v5540_v29  ;;  %v2406_v30 = vand.u32 2147483647, %v5493_v23 }
 0x235   :  { %7385 = vst [vmem:[#allocation43_spill] sm:$0xff] %v5819_v37  ;;  %v2390_v20 = vsel %vm2389_vm15, %v5519_v36, %v2386_v63  ;;  %v2400_v10 = vmul.f32 %v5540_v29, %v2399_v32  ;;  %v2408_v52 = vand.u32 2147483648, %v5493_v23  ;;  %v1498_v0 = vsub.f32 %v1274_v43, %v1356_v50  ;;  %v1325_v63 = vld [vmem:[#allocation6 + $0x1e8] sm:$0xff]  ;;  %vm2404_vm2 = vmor %vm2402_vm14, %vm2403_vm0 }
 0x236   :  { %v2923_v37 = vadd.f32 %v2851_v21, %v2850_v16  ;;  %v5835_v47 = vsel %vm5793_vm12, %v2394_v40, %v2390_v20  ;;  %vm5837_vm1 = vcmp.eq.f32.partialorder %v2406_v30, 8.507059e+37  ;;  %v1499_v36 = vsub.f32 %v1275_v55, %v1356_v50 }
 0x237   :  { %7386 = vst [vmem:[#allocation44_spill] sm:$0xff] %v5835_v47  ;;  %v5841_v32 = vpop.eup %4083  ;;  %v2401_v43 = vadd.f32 %v5540_v29, %v2400_v10  ;;  %v2409_v34 = vor.u32 1.1754944e-38, %v2408_v52  ;;  %v2866_v44 = vand.u32 2147483647, %v5835_v47  ;;  %v3694_v54 = vmul.f32 -50.0, %v1498_v0 }
 0x238   :  { %v5845_v42 = vpop.eup %4085  ;;  %2924 = vadd.xlane.f32.xlu2 %v2923_v37  ;;  %v3695_v16 = vmul.f32 -50.0, %v1499_v36  ;;  %v1546_v57 = vsub.f32 %v1322_v11, %v1476_v15  ;;  %v1547_v40 = vsub.f32 %v1323_v28, %v1476_v15  ;;  %v1548_v50 = vsub.f32 %v1324_v53, %v1481_v3 }
 0x239   :  { %v5851_v55 = vpop.eup %4087  ;;  %v2405_v21 = vsel %vm2404_vm2, %v5540_v29, %v2401_v43  ;;  %v1700_v30 = vmul.f32 1.442695, %v3694_v54  ;;  %v1549_v20 = vsub.f32 %v1325_v63, %v1481_v3  ;;  %v2173_v10 = vmul.f32 %v5544_v33, %v5497_v17 }
 0x23a   :  { %v5856_v52 = vpop.eup %4089  ;;  %v5860_v37 = vsel %vm5837_vm1, %v2409_v34, %v2405_v21  ;;  %v1702_v23 = vmul.f32 1.442695, %v3695_v16  ;;  %v3742_v0 = vmul.f32 -50.0, %v1546_v57  ;;  %v3743_v11 = vmul.f32 -50.0, %v1547_v40 }
 0x23b   :  { %7389 = vst [vmem:[#allocation45_spill] sm:$0xff] %v5860_v37  ;;  %v2867_v28 = vand.u32 2147483647, %v5860_v37  ;;  %4091 = vpow2.f32 %v1700_v30  ;;  %v3744_v15 = vmul.f32 -50.0, %v1548_v50  ;;  %v3745_v53 = vmul.f32 -50.0, %v1549_v20 }
 0x23c   :  { %4093 = vpow2.f32 %v1702_v23  ;;  %v1796_v29 = vmul.f32 1.442695, %v3742_v0  ;;  %v1798_v54 = vmul.f32 1.442695, %v3743_v11  ;;  %v2174_v3 = vsub.f32 1.0, %v2173_v10 }
 0x23d   :  { %v2947_v36 = vadd.f32 %v2867_v28, %v2866_v44  ;;  %v1800_v63 = vmul.f32 1.442695, %v3744_v15  ;;  %v1802_v43 = vmul.f32 1.442695, %v3745_v53  ;;  %vm2177_vm3 = vweird.f32 %v5497_v17 }
 0x23e   :  { %4095 = vpow2.f32 %v1796_v29  ;;  %v2175_v34 = vmul.f32 %v5544_v33, %v2174_v3  ;;  %vm2178_vm4 = vweird.f32 %v5544_v33  ;;  %v2181_v7 = vand.u32 2147483647, %v5497_v17 }
 0x23f   :  { %2948 = vadd.xlane.f32.xlu1 %v2947_v36  ;;  %4097 = vpow2.f32 %v1798_v54  ;;  %v2183_v16 = vand.u32 2147483648, %v5497_v17  ;;  %v2188_v57 = vmul.f32 %v5560_v26, %v5522_v56  ;;  %vm2192_vm5 = vweird.f32 %v5522_v56  ;;  %vm2179_vm8 = vmor %vm2177_vm3, %vm2178_vm4 }
 0x240   :  { %4099 = vpow2.f32 %v1800_v63  ;;  %v2176_v44 = vadd.f32 %v5544_v33, %v2175_v34  ;;  %vm2182_vm6 = vcmp.eq.f32.partialorder %v2181_v7, 8.507059e+37  ;;  %vm2193_vm7 = vweird.f32 %v5560_v26 }
 0x241   :  { %v4092_v40 = vpop.eup %4091  ;;  %4101 = vpow2.f32 %v1802_v43  ;;  %v2184_v50 = vor.u32 1.1754944e-38, %v2183_v16  ;;  %v2189_v21 = vsub.f32 1.0, %v2188_v57  ;;  %v2196_v30 = vand.u32 2147483647, %v5522_v56  ;;  %vm2194_vm11 = vmor %vm2192_vm5, %vm2193_vm7 }
 0x242   :  { %v4094_v20 = vpop.eup %4093  ;;  %v5876_v10 = vadd.f32 1.0, %v4092_v40  ;;  %v2180_v23 = vsel %vm2179_vm8, %v5544_v33, %v2176_v44  ;;  %v2198_v0 = vand.u32 2147483648, %v5522_v56  ;;  %v2413_v11 = vmul.f32 %v5442_v45, %v5392_v61 }
 0x243   :  { %v5882_v28 = vadd.f32 1.0, %v4094_v20  ;;  %v5884_v15 = vsel %vm2182_vm6, %v2184_v50, %v2180_v23  ;;  %v2190_v17 = vmul.f32 %v5560_v26, %v2189_v21  ;;  %vm5887_vm9 = vcmp.eq.f32.partialorder %v2196_v30, 8.507059e+37 }
 0x244   :  { %7390 = vst [vmem:[#allocation46_spill] sm:$0xff] %v5884_v15  ;;  %v4096_v29 = vpop.eup %4095  ;;  %4103 = vrcp.f32 %v5876_v10  ;;  %v2199_v54 = vor.u32 1.1754944e-38, %v2198_v0  ;;  %v2852_v33 = vand.u32 2147483647, %v5884_v15  ;;  %v2414_v3 = vsub.f32 1.0, %v2413_v11 }
 0x245   :  { %v4098_v36 = vpop.eup %4097  ;;  %4105 = vrcp.f32 %v5882_v28  ;;  %v5894_v63 = vadd.f32 1.0, %v4096_v29  ;;  %v2191_v43 = vadd.f32 %v5560_v26, %v2190_v17  ;;  %vm2417_vm10 = vweird.f32 %v5392_v61 }
 0x246   :  { %v4100_v34 = vpop.eup %4099  ;;  %v5898_v7 = vadd.f32 1.0, %v4098_v36  ;;  %v2415_v16 = vmul.f32 %v5442_v45, %v2414_v3  ;;  %vm2418_vm12 = vweird.f32 %v5442_v45  ;;  %v2421_v57 = vand.u32 2147483647, %v5392_v61 }
 0x247   :  { %7393 = vst [vmem:[#allocation47_spill] sm:$0xff] %v5894_v63  ;;  %v4102_v44 = vpop.eup %4101  ;;  %4107 = vrcp.f32 %v5894_v63  ;;  %v5908_v40 = vadd.f32 1.0, %v4100_v34  ;;  %v2195_v50 = vsel %vm2194_vm11, %v5560_v26, %v2191_v43  ;;  %v2423_v21 = vand.u32 2147483648, %v5392_v61  ;;  %vm2419_vm13 = vmor %vm2417_vm10, %vm2418_vm12 }
 0x248   :  { %7394 = vst [vmem:[#allocation48_spill] sm:$0xff] %v5898_v7  ;;  %4109 = vrcp.f32 %v5898_v7  ;;  %v5913_v30 = vadd.f32 1.0, %v4102_v44  ;;  %v5917_v56 = vsel %vm5887_vm9, %v2199_v54, %v2195_v50  ;;  %v2416_v20 = vadd.f32 %v5442_v45, %v2415_v16 }
 0x249   :  { %7395 = vst [vmem:[#allocation49_spill] sm:$0xff] %v5917_v56  ;;  %4111 = vrcp.f32 %v5908_v40  ;;  %v2853_v23 = vand.u32 2147483647, %v5917_v56  ;;  %vm2422_vm14 = vcmp.eq.f32.partialorder %v2421_v57, 8.507059e+37  ;;  %v2424_v26 = vor.u32 1.1754944e-38, %v2423_v21 }
 0x24a   :  { %v5924_v0 = vpop.eup %4103  ;;  %4113 = vrcp.f32 %v5913_v30  ;;  %v2420_v11 = vsel %vm2419_vm13, %v5442_v45, %v2416_v20  ;;  %v2428_v17 = vmul.f32 %v5445_v35, %v5396_v24  ;;  %vm2432_vm15 = vweird.f32 %v5396_v24 }
 0x24b   :  { %v5931_v53 = vpop.eup %4105  ;;  %v2926_v29 = vadd.f32 %v2853_v23, %v2852_v33  ;;  %v5933_v54 = vsel %vm2422_vm14, %v2424_v26, %v2420_v11  ;;  %vm2433_vm0 = vweird.f32 %v5445_v35  ;;  %v2436_v61 = vand.u32 2147483647, %v5396_v24  ;;  %v1290_v23 = vld [vmem:[#allocation6 + $0xd0] sm:$0xff]  ;;  %v1291_v26 = vld [vmem:[#allocation6 + $0xd8] sm:$0xff]  ;;  %v1396_v11 = vpop.permute.xlu1 %1395 }
 0x24c   :  { %7396 = vst [vmem:[#allocation50_spill] sm:$0xff] %v5933_v54  ;;  %v2429_v3 = vsub.f32 1.0, %v2428_v17  ;;  %v2438_v36 = vand.u32 2147483648, %v5396_v24  ;;  %v2868_v43 = vand.u32 2147483647, %v5933_v54  ;;  %v1933_v45 = vmul.f32 %v5468_v4, %v5436_v31  ;;  %vm2434_vm7 = vmor %vm2432_vm15, %vm2433_vm0 }
 0x24d   :  { %v5941_v34 = vpop.eup %4107  ;;  %2927 = vadd.xlane.f32.xlu0 %v2926_v29  ;;  %vm5943_vm1 = vcmp.eq.f32.partialorder %v2436_v61, 8.507059e+37  ;;  %vm1937_vm2 = vweird.f32 %v5436_v31  ;;  %vm1938_vm3 = vweird.f32 %v5468_v4  ;;  %v1941_v33 = vand.u32 2147483647, %v5436_v31 }
 0x24e   :  { %7397 = vst [vmem:[#allocation51_spill] sm:$0xff] %v5941_v34  ;;  %v5950_v57 = vpop.eup %4109  ;;  %v2430_v44 = vmul.f32 %v5445_v35, %v2429_v3  ;;  %v2439_v50 = vor.u32 1.1754944e-38, %v2438_v36  ;;  %v1934_v21 = vsub.f32 1.0, %v1933_v45  ;;  %v1943_v20 = vand.u32 2147483648, %v5436_v31  ;;  %v1292_v3 = vld [vmem:[#allocation6 + $0xe0] sm:$0xff]  ;;  %v1401_v36 = vpop.permute.xlu0 %1400  ;;  %v1293_v34 = vld [vmem:[#allocation6 + $0xe8] sm:$0xff]  ;;  %vm1939_vm9 = vmor %vm1937_vm2, %vm1938_vm3 }
 0x24f   :  { %7400 = vst [vmem:[#allocation52_spill] sm:$0xff] %v5950_v57  ;;  %v5954_v17 = vpop.eup %4111  ;;  %vm5956_vm4 = vcmp.eq.f32.partialorder %v1941_v33, 8.507059e+37  ;;  %v1948_v61 = vmul.f32 %v5495_v12, %v5470_v25  ;;  %vm1952_vm5 = vweird.f32 %v5470_v25  ;;  %vm1953_vm6 = vweird.f32 %v5495_v12 }
 0x250   :  { %v5964_v45 = vpop.eup %4113  ;;  %v2431_v54 = vadd.f32 %v5445_v35, %v2430_v44  ;;  %v1935_v56 = vmul.f32 %v5468_v4, %v1934_v21  ;;  %v1944_v15 = vor.u32 1.1754944e-38, %v1943_v20  ;;  %v1956_v33 = vand.u32 2147483647, %v5470_v25  ;;  %vm1954_vm10 = vmor %vm1952_vm5, %vm1953_vm6 }
 0x251   :  { %7403 = vst [vmem:[#allocation53_spill] sm:$0xff] %v5964_v45  ;;  %v1949_v37 = vsub.f32 1.0, %v1948_v61  ;;  %v1958_v47 = vand.u32 2147483648, %v5470_v25  ;;  %v1514_v57 = vsub.f32 %v1290_v23, %v1396_v11  ;;  %v1515_v7 = vsub.f32 %v1291_v26, %v1396_v11  ;;  %v1294_v61 = vld [vmem:[#allocation6 + $0xf0] sm:$0xff] }
 0x252   :  { %v2435_v63 = vsel %vm2434_vm7, %v5445_v35, %v2431_v54  ;;  %v1936_v44 = vadd.f32 %v5468_v4, %v1935_v56  ;;  %vm5976_vm8 = vcmp.eq.f32.partialorder %v1956_v33, 8.507059e+37  ;;  %v1516_v20 = vsub.f32 %v1292_v3, %v1401_v36  ;;  %v1406_v3 = vpop.permute.xlu2 %1405  ;;  %v1295_v33 = vld [vmem:[#allocation6 + $0xf8] sm:$0xff] }
 0x253   :  { %v5982_v45 = vsel %vm5943_vm1, %v2439_v50, %v2435_v63  ;;  %v1950_v24 = vmul.f32 %v5495_v12, %v1949_v37  ;;  %v1959_v23 = vor.u32 1.1754944e-38, %v1958_v47  ;;  %v3710_v35 = vmul.f32 -50.0, %v1514_v57 }
 0x254   :  { %v2869_v56 = vand.u32 2147483647, %v5982_v45  ;;  %v1940_v54 = vsel %vm1939_vm9, %v5468_v4, %v1936_v44  ;;  %v3711_v26 = vmul.f32 -50.0, %v1515_v7  ;;  %v1517_v11 = vsub.f32 %v1293_v34, %v1401_v36 }
 0x255   :  { %v5993_v63 = vsel %vm5956_vm4, %v1944_v15, %v1940_v54  ;;  %v1951_v16 = vadd.f32 %v5495_v12, %v1950_v24  ;;  %v1732_v31 = vmul.f32 1.442695, %v3710_v35  ;;  %v3712_v50 = vmul.f32 -50.0, %v1516_v20 }
 0x256   :  { %v2950_v37 = vadd.f32 %v2869_v56, %v2868_v43  ;;  %v2836_v4 = vand.u32 2147483647, %v5993_v63  ;;  %v1734_v47 = vmul.f32 1.442695, %v3711_v26  ;;  %v3713_v7 = vmul.f32 -50.0, %v1517_v11 }
 0x257   :  { %v1955_v34 = vsel %vm1954_vm10, %v5495_v12, %v1951_v16  ;;  %4115 = vpow2.f32 %v1732_v31  ;;  %v1736_v15 = vmul.f32 1.442695, %v3712_v50  ;;  %v1518_v57 = vsub.f32 %v1294_v61, %v1406_v3 }
 0x258   :  { %2951 = vadd.xlane.f32.xlu2 %v2950_v37  ;;  %v6004_v29 = vsel %vm5976_vm8, %v1959_v23, %v1955_v34  ;;  %4117 = vpow2.f32 %v1734_v47  ;;  %v1738_v43 = vmul.f32 1.442695, %v3713_v7  ;;  %v1519_v36 = vsub.f32 %v1295_v33, %v1406_v3 }
 0x259   :  { %v2837_v25 = vand.u32 2147483647, %v6004_v29  ;;  %4119 = vpow2.f32 %v1736_v15  ;;  %v3714_v44 = vmul.f32 -50.0, %v1518_v57  ;;  %v1963_v20 = vmul.f32 %v5479_v39, %v5453_v18 }
 0x25a   :  { %4121 = vpow2.f32 %v1738_v43  ;;  %v3715_v12 = vmul.f32 -50.0, %v1519_v36  ;;  %vm1967_vm11 = vweird.f32 %v5453_v18  ;;  %vm1968_vm12 = vweird.f32 %v5479_v39 }
 0x25b   :  { %v2902_v24 = vadd.f32 %v2837_v25, %v2836_v4  ;;  %v1740_v35 = vmul.f32 1.442695, %v3714_v44  ;;  %v1964_v56 = vsub.f32 1.0, %v1963_v20  ;;  %v1973_v23 = vand.u32 2147483648, %v5453_v18  ;;  %vm1969_vm14 = vmor %vm1967_vm11, %vm1968_vm12 }
 0x25c   :  { %v1742_v21 = vmul.f32 1.442695, %v3715_v12  ;;  %v1978_v54 = vmul.f32 %v5485_v22, %v5461_v8  ;;  %v1971_v61 = vand.u32 2147483647, %v5453_v18  ;;  %vm1983_vm13 = vweird.f32 %v5485_v22 }
 0x25d   :  { %v4116_v26 = vpop.eup %4115  ;;  %2903 = vadd.xlane.f32.xlu1 %v2902_v24  ;;  %4123 = vpow2.f32 %v1740_v35  ;;  %v1965_v11 = vmul.f32 %v5479_v39, %v1964_v56  ;;  %v1974_v31 = vor.u32 1.1754944e-38, %v1973_v23  ;;  %v1986_v47 = vand.u32 2147483647, %v5461_v8 }
 0x25e   :  { %v4118_v3 = vpop.eup %4117  ;;  %v6017_v16 = vadd.f32 1.0, %v4116_v26  ;;  %4125 = vpow2.f32 %v1742_v21  ;;  %v1979_v50 = vsub.f32 1.0, %v1978_v54  ;;  %v1988_v7 = vand.u32 2147483648, %v5461_v8 }
 0x25f   :  { %v4120_v33 = vpop.eup %4119  ;;  %v6019_v37 = vadd.f32 1.0, %v4118_v3  ;;  %v1966_v4 = vadd.f32 %v5479_v39, %v1965_v11  ;;  %v2653_v43 = vmul.f32 %v5566_v46, %v5538_v49  ;;  %vm1972_vm15 = vcmp.eq.f32.partialorder %v1971_v61, 8.507059e+37 }
 0x260   :  { %v4122_v34 = vpop.eup %4121  ;;  %4127 = vrcp.f32 %v6017_v16  ;;  %v6025_v15 = vadd.f32 1.0, %v4120_v33  ;;  %v1980_v57 = vmul.f32 %v5485_v22, %v1979_v50  ;;  %vm1982_vm0 = vweird.f32 %v5461_v8  ;;  %v1309_v50 = vld [vmem:[#allocation6 + $0x168] sm:$0xff]  ;;  %v1441_v33 = vpop.permute.xlu1 %1440 }
 0x261   :  { %4129 = vrcp.f32 %v6019_v37  ;;  %v6035_v36 = vadd.f32 1.0, %v4122_v34  ;;  %v1970_v25 = vsel %vm1969_vm14, %v5479_v39, %v1966_v4  ;;  %vm1984_vm1 = vmor %vm1982_vm0, %vm1983_vm13  ;;  %vm1987_vm2 = vcmp.eq.f32.partialorder %v1986_v47, 8.507059e+37 }
 0x262   :  { %4131 = vrcp.f32 %v6025_v15  ;;  %v6039_v44 = vsel %vm1972_vm15, %v1974_v31, %v1970_v25  ;;  %v1981_v20 = vadd.f32 %v5485_v22, %v1980_v57  ;;  %v1989_v12 = vor.u32 1.1754944e-38, %v1988_v7  ;;  %v1308_v31 = vld [vmem:[#allocation6 + $0x160] sm:$0xff]  ;;  %v1310_v57 = vld [vmem:[#allocation6 + $0x170] sm:$0xff] }
 0x263   :  { %v4124_v18 = vpop.eup %4123  ;;  %4133 = vrcp.f32 %v6035_v36  ;;  %v2654_v24 = vsub.f32 1.0, %v2653_v43  ;;  %v2838_v21 = vand.u32 2147483647, %v6039_v44  ;;  %v2661_v23 = vand.u32 2147483647, %v5538_v49  ;;  %v1446_v43 = vpop.permute.xlu0 %1445 }
 0x264   :  { %v4126_v35 = vpop.eup %4125  ;;  %v6046_v39 = vadd.f32 1.0, %v4124_v18  ;;  %v1985_v56 = vsel %vm1984_vm1, %v5485_v22, %v1981_v20  ;;  %vm2658_vm3 = vweird.f32 %v5566_v46  ;;  %v2663_v26 = vand.u32 2147483648, %v5538_v49 }
 0x265   :  { %v6051_v54 = vsel %vm1987_vm2, %v1989_v12, %v1985_v56  ;;  %v2655_v8 = vmul.f32 %v5566_v46, %v2654_v24  ;;  %v6058_v61 = vadd.f32 1.0, %v4126_v35  ;;  %vm2657_vm4 = vweird.f32 %v5538_v49 }
 0x266   :  { %7406 = vst [vmem:[#allocation54_spill] sm:$0xff] %v6051_v54  ;;  %v6056_v11 = vpop.eup %4127  ;;  %v2839_v3 = vand.u32 2147483647, %v6051_v54  ;;  %v2668_v22 = vmul.f32 %v5573_v62, %v5542_v27  ;;  %4135 = vrcp.f32 %v6046_v39  ;;  %vm6068_vm5 = vcmp.eq.f32.partialorder %v2661_v23, 8.507059e+37  ;;  %vm2659_vm6 = vmor %vm2657_vm4, %vm2658_vm3 }
 0x267   :  { %v6064_v4 = vpop.eup %4129  ;;  %v2656_v47 = vadd.f32 %v5566_v46, %v2655_v8  ;;  %v2664_v34 = vor.u32 1.1754944e-38, %v2663_v26  ;;  %vm2672_vm7 = vweird.f32 %v5542_v27  ;;  %v2676_v18 = vand.u32 2147483647, %v5542_v27  ;;  %v1311_v8 = vld [vmem:[#allocation6 + $0x178] sm:$0xff] }
 0x268   :  { %v6072_v49 = vpop.eup %4131  ;;  %v2905_v25 = vadd.f32 %v2839_v3, %v2838_v21  ;;  %v2669_v20 = vsub.f32 1.0, %v2668_v22  ;;  %v2678_v35 = vand.u32 2147483648, %v5542_v27  ;;  %v1532_v56 = vsub.f32 %v1308_v31, %v1441_v33 }
 0x269   :  { %v6078_v12 = vpop.eup %4133  ;;  %v2660_v24 = vsel %vm2659_vm6, %v5566_v46, %v2656_v47  ;;  %v1533_v23 = vsub.f32 %v1309_v50, %v1441_v33  ;;  %vm2673_vm8 = vweird.f32 %v5573_v62  ;;  %v1534_v3 = vsub.f32 %v1310_v57, %v1446_v43 }
 0x26a   :  { %2906 = vadd.xlane.f32.xlu2 %v2905_v25  ;;  %v6084_v21 = vsel %vm6068_vm5, %v2664_v34, %v2660_v24  ;;  %v2670_v26 = vmul.f32 %v5573_v62, %v2669_v20  ;;  %vm6088_vm9 = vcmp.eq.f32.partialorder %v2676_v18, 8.507059e+37  ;;  %v2679_v46 = vor.u32 1.1754944e-38, %v2678_v35  ;;  %vm2674_vm10 = vmor %vm2672_vm7, %vm2673_vm8 }
 0x26b   :  { %v3728_v47 = vmul.f32 -50.0, %v1532_v56  ;;  %v3729_v54 = vmul.f32 -50.0, %v1533_v23  ;;  %v1535_v50 = vsub.f32 %v1311_v8, %v1446_v43  ;;  %v3730_v33 = vmul.f32 -50.0, %v1534_v3 }
 0x26c   :  { %v2671_v31 = vadd.f32 %v5573_v62, %v2670_v26  ;;  %v2443_v7 = vmul.f32 %v5709_v1, %v5652_v59  ;;  %v6095_v34 = vpop.eup %4135  ;;  %v2884_v57 = vand.u32 2147483647, %v6084_v21  ;;  %vm2448_vm11 = vweird.f32 %v5709_v1 }
 0x26d   :  { %v1768_v25 = vmul.f32 1.442695, %v3728_v47  ;;  %v1770_v20 = vmul.f32 1.442695, %v3729_v54  ;;  %v3731_v24 = vmul.f32 -50.0, %v1535_v50  ;;  %v2453_v27 = vand.u32 2147483648, %v5652_v59 }
 0x26e   :  { %v2675_v18 = vsel %vm2674_vm10, %v5573_v62, %v2671_v31  ;;  %v1772_v35 = vmul.f32 1.442695, %v3730_v33  ;;  %v2444_v43 = vsub.f32 1.0, %v2443_v7  ;;  %v2451_v23 = vand.u32 2147483647, %v5652_v59 }
 0x26f   :  { %v6104_v56 = vsel %vm6088_vm9, %v2679_v46, %v2675_v18  ;;  %4137 = vpow2.f32 %v1768_v25  ;;  %v1774_v54 = vmul.f32 1.442695, %v3731_v24  ;;  %v2458_v62 = vmul.f32 %v5715_v58, %v5662_v51 }
 0x270   :  { %7411 = vst [vmem:[#allocation55_spill] sm:$0xff] %v6104_v56  ;;  %v2885_v8 = vand.u32 2147483647, %v6104_v56  ;;  %4139 = vpow2.f32 %v1770_v20  ;;  %v2445_v26 = vmul.f32 %v5709_v1, %v2444_v43  ;;  %vm2447_vm12 = vweird.f32 %v5652_v59 }
 0x271   :  { %4141 = vpow2.f32 %v1772_v35  ;;  %vm6117_vm13 = vmor %vm2447_vm12, %vm2448_vm11  ;;  %vm2452_vm14 = vcmp.eq.f32.partialorder %v2451_v23, 8.507059e+37  ;;  %v2454_v47 = vor.u32 1.1754944e-38, %v2453_v27  ;;  %v2459_v31 = vsub.f32 1.0, %v2458_v62 }
 0x272   :  { %4143 = vrcp.f32 %v6058_v61  ;;  %v2974_v3 = vadd.f32 %v2885_v8, %v2884_v57  ;;  %v2446_v22 = vadd.f32 %v5709_v1, %v2445_v26  ;;  %v2466_v33 = vand.u32 2147483647, %v5662_v51 }
 0x273   :  { %4145 = vpow2.f32 %v1774_v54  ;;  %v2468_v7 = vand.u32 2147483648, %v5662_v51  ;;  %v2683_v59 = vmul.f32 %v5551_v19, %v5507_v60  ;;  %v2460_v25 = vmul.f32 %v5715_v58, %v2459_v31  ;;  %v7416_v54 = vld [vmem:[#allocation21_spill] sm:$0xff] }
 0x274   :  { %2975 = vadd.xlane.f32.xlu1 %v2974_v3  ;;  %v2450_v50 = vsel %vm6117_vm13, %v5709_v1, %v2446_v22  ;;  %vm2462_vm15 = vweird.f32 %v5662_v51  ;;  %vm2463_vm0 = vweird.f32 %v5715_v58  ;;  %vm2687_vm1 = vweird.f32 %v5507_v60  ;;  %v7415_v51 = vld [vmem:[#allocation17_spill] sm:$0xff] }
 0x275   :  { %v4138_v57 = vpop.eup %4137  ;;  %v6134_v1 = vsel %vm2452_vm14, %v2454_v47, %v2450_v50  ;;  %v2684_v24 = vsub.f32 1.0, %v2683_v59  ;;  %v2691_v35 = vand.u32 2147483647, %v5507_v60  ;;  %v2461_v27 = vadd.f32 %v5715_v58, %v2460_v25  ;;  %vm2464_vm2 = vmor %vm2462_vm15, %vm2463_vm0 }
 0x276   :  { %v4140_v20 = vpop.eup %4139  ;;  %v6132_v18 = vadd.f32 1.0, %v4138_v57  ;;  %7414 = vst [vmem:[#allocation56_spill] sm:$0xff] %v6134_v1  ;;  %v2693_v8 = vand.u32 2147483648, %v5507_v60  ;;  %v2698_v26 = vmul.f32 %v7416_v54, %v7415_v51  ;;  %vm2467_vm3 = vcmp.eq.f32.partialorder %v2466_v33, 8.507059e+37 }
 0x277   :  { %v4142_v43 = vpop.eup %4141  ;;  %v6137_v23 = vadd.f32 1.0, %v4140_v20  ;;  %v2469_v3 = vor.u32 1.1754944e-38, %v2468_v7  ;;  %v2685_v22 = vmul.f32 %v5551_v19, %v2684_v24  ;;  %vm2688_vm4 = vweird.f32 %v5551_v19 }
 0x278   :  { %v6143_v62 = vpop.eup %4143  ;;  %4147 = vrcp.f32 %v6132_v18  ;;  %v6150_v47 = vadd.f32 1.0, %v4142_v43  ;;  %v2465_v31 = vsel %vm2464_vm2, %v5715_v58, %v2461_v27  ;;  %v2870_v50 = vand.u32 2147483647, %v6134_v1  ;;  %vm2689_vm6 = vmor %vm2687_vm1, %vm2688_vm4  ;;  %v7425_v1 = vld [vmem:[#allocation23_spill] sm:$0xff] }
 0x279   :  { %v6147_v46 = vpop.eup %4145  ;;  %v6154_v59 = vsel %vm2467_vm3, %v2469_v3, %v2465_v31  ;;  %v2686_v57 = vadd.f32 %v5551_v19, %v2685_v22  ;;  %vm2692_vm5 = vcmp.eq.f32.partialorder %v2691_v35, 8.507059e+37  ;;  %v2699_v33 = vsub.f32 1.0, %v2698_v26 }
 0x27a   :  { %7417 = vst [vmem:[#allocation17_spill] sm:$0xff] %v6154_v59  ;;  %4149 = vrcp.f32 %v6137_v23  ;;  %v2871_v7 = vand.u32 2147483647, %v6154_v59  ;;  %v2694_v25 = vor.u32 1.1754944e-38, %v2693_v8  ;;  %vm2703_vm7 = vweird.f32 %v7416_v54 }
 0x27b   :  { %v2690_v58 = vsel %vm2689_vm6, %v5551_v19, %v2686_v57  ;;  %v2700_v20 = vmul.f32 %v7416_v54, %v2699_v33  ;;  %v2706_v24 = vand.u32 2147483647, %v7415_v51  ;;  %v2708_v43 = vand.u32 2147483648, %v7415_v51 }
 0x27c   :  { %v2953_v35 = vadd.f32 %v2871_v7, %v2870_v50  ;;  %v6166_v27 = vsel %vm2692_vm5, %v2694_v25, %v2690_v58  ;;  %vm2702_vm8 = vweird.f32 %v7415_v51  ;;  %v2203_v60 = vmul.f32 %v5629_v41, %v5591_v9  ;;  %v1278_v7 = vld [vmem:[#allocation6 + $0x70] sm:$0xff]  ;;  %v1279_v25 = vld [vmem:[#allocation6 + $0x78] sm:$0xff]  ;;  %v1366_v58 = vpop.permute.xlu1 %1365 }
 0x27d   :  { %7418 = vst [vmem:[#allocation21_spill] sm:$0xff] %v6166_v27  ;;  %v2701_v8 = vadd.f32 %v7416_v54, %v2700_v20  ;;  %vm6172_vm9 = vcmp.eq.f32.partialorder %v2706_v24, 8.507059e+37  ;;  %v2709_v19 = vor.u32 1.1754944e-38, %v2708_v43  ;;  %vm2207_vm10 = vweird.f32 %v5591_v9  ;;  %vm2704_vm11 = vmor %vm2702_vm8, %vm2703_vm7 }
 0x27e   :  { %v6177_v3 = vpop.eup %4147  ;;  %2954 = vadd.xlane.f32.xlu0 %v2953_v35  ;;  %v2886_v51 = vand.u32 2147483647, %v6166_v27  ;;  %v2204_v22 = vsub.f32 1.0, %v2203_v60  ;;  %vm2208_vm12 = vweird.f32 %v5629_v41  ;;  %v2211_v31 = vand.u32 2147483647, %v5591_v9 }
 0x27f   :  { %v2705_v50 = vsel %vm2704_vm11, %v7416_v54, %v2701_v8  ;;  %v2213_v57 = vand.u32 2147483648, %v5591_v9  ;;  %v2218_v33 = vmul.f32 %v5633_v5, %v5603_v38  ;;  %vm2222_vm13 = vweird.f32 %v5603_v38  ;;  %vm2209_vm0 = vmor %vm2207_vm10, %vm2208_vm12 }
 0x280   :  { %v6189_v20 = vpop.eup %4149  ;;  %v6193_v24 = vsel %vm6172_vm9, %v2709_v19, %v2705_v50  ;;  %v2205_v43 = vmul.f32 %v5629_v41, %v2204_v22  ;;  %vm6196_vm14 = vcmp.eq.f32.partialorder %v2211_v31, 8.507059e+37  ;;  %vm2223_vm15 = vweird.f32 %v5633_v5  ;;  %v7424_v50 = vld [vmem:[#allocation20_spill] sm:$0xff] }
 0x281   :  { %7421 = vst [vmem:[#allocation57_spill] sm:$0xff] %v6193_v24  ;;  %v2887_v35 = vand.u32 2147483647, %v6193_v24  ;;  %v2219_v60 = vsub.f32 1.0, %v2218_v33  ;;  %v2226_v8 = vand.u32 2147483647, %v5603_v38  ;;  %v1502_v26 = vsub.f32 %v1278_v7, %v1366_v58  ;;  %vm2224_vm3 = vmor %vm2222_vm13, %vm2223_vm15 }
 0x282   :  { %v2228_v27 = vand.u32 2147483648, %v5603_v38  ;;  %v2206_v59 = vadd.f32 %v5629_v41, %v2205_v43  ;;  %v1503_v19 = vsub.f32 %v1279_v25, %v1366_v58  ;;  %v1993_v22 = vmul.f32 %v7425_v1, %v7424_v50 }
 0x283   :  { %v2977_v31 = vadd.f32 %v2887_v35, %v2886_v51  ;;  %v2214_v56 = vor.u32 1.1754944e-38, %v2213_v57  ;;  %v2220_v33 = vmul.f32 %v5633_v5, %v2219_v60  ;;  %vm6212_vm1 = vcmp.eq.f32.partialorder %v2226_v8, 8.507059e+37 }
 0x284   :  { %v2210_v43 = vsel %vm2209_vm0, %v5629_v41, %v2206_v59  ;;  %v3698_v7 = vmul.f32 -50.0, %v1502_v26  ;;  %v3699_v25 = vmul.f32 -50.0, %v1503_v19  ;;  %v1994_v58 = vsub.f32 1.0, %v1993_v22  ;;  %v7429_v26 = vld [vmem:[#allocation26_spill] sm:$0xff] }
 0x285   :  { %2978 = vadd.xlane.f32.xlu2 %v2977_v31  ;;  %v6219_v51 = vsel %vm6196_vm14, %v2214_v56, %v2210_v43  ;;  %v2221_v9 = vadd.f32 %v5633_v5, %v2220_v33  ;;  %v2229_v35 = vor.u32 1.1754944e-38, %v2228_v27  ;;  %vm1998_vm2 = vweird.f32 %v7425_v1  ;;  %v7428_v27 = vld [vmem:[#allocation22_spill] sm:$0xff] }
 0x286   :  { %v2854_v41 = vand.u32 2147483647, %v6219_v51  ;;  %v1708_v59 = vmul.f32 1.442695, %v3698_v7  ;;  %v1710_v57 = vmul.f32 1.442695, %v3699_v25  ;;  %v1995_v60 = vmul.f32 %v7425_v1, %v1994_v58 }
 0x287   :  { %v2225_v54 = vsel %vm2224_vm3, %v5633_v5, %v2221_v9  ;;  %v2001_v56 = vand.u32 2147483647, %v7424_v50  ;;  %v2003_v8 = vand.u32 2147483648, %v7424_v50  ;;  %v2008_v19 = vmul.f32 %v7429_v26, %v7428_v27  ;;  %v7433_v9 = vld [vmem:[#allocation29_spill] sm:$0xff] }
 0x288   :  { %v6236_v22 = vsel %vm6212_vm1, %v2229_v35, %v2225_v54  ;;  %4151 = vpow2.f32 %v1708_v59  ;;  %v1996_v38 = vadd.f32 %v7425_v1, %v1995_v60  ;;  %vm1997_vm4 = vweird.f32 %v7424_v50 }
 0x289   :  { %7430 = vst [vmem:[#allocation20_spill] sm:$0xff] %v6236_v22  ;;  %v6241_v31 = vadd.f32 1.0, %v6147_v46  ;;  %v2855_v5 = vand.u32 2147483647, %v6236_v22  ;;  %4153 = vpow2.f32 %v1710_v57  ;;  %vm1999_vm5 = vmor %vm1997_vm4, %vm1998_vm2  ;;  %v2004_v33 = vor.u32 1.1754944e-38, %v2003_v8  ;;  %v7432_v46 = vld [vmem:[#allocation25_spill] sm:$0xff] }
 0x28a   :  { %v2000_v43 = vsel %vm1999_vm5, %v7425_v1, %v1996_v38  ;;  %vm2002_vm6 = vcmp.eq.f32.partialorder %v2001_v56, 8.507059e+37  ;;  %v2009_v24 = vsub.f32 1.0, %v2008_v19  ;;  %v2016_v7 = vand.u32 2147483647, %v7428_v27  ;;  %v7437_v19 = vld [vmem:[#allocation30_spill] sm:$0xff] }
 0x28b   :  { %v2929_v25 = vadd.f32 %v2855_v5, %v2854_v41  ;;  %v6248_v58 = vsel %vm2002_vm6, %v2004_v33, %v2000_v43  ;;  %v2018_v50 = vand.u32 2147483648, %v7428_v27  ;;  %v2233_v35 = vmul.f32 %v7433_v9, %v7432_v46 }
 0x28c   :  { %7431 = vst [vmem:[#allocation23_spill] sm:$0xff] %v6248_v58  ;;  %4155 = vrcp.f32 %v6150_v47  ;;  %v2010_v59 = vmul.f32 %v7429_v26, %v2009_v24  ;;  %vm2012_vm7 = vweird.f32 %v7428_v27  ;;  %vm2013_vm8 = vweird.f32 %v7429_v26  ;;  %v7436_v27 = vld [vmem:[#allocation27_spill] sm:$0xff] }
 0x28d   :  { %2930 = vadd.xlane.f32.xlu1 %v2929_v25  ;;  %vm6257_vm9 = vcmp.eq.f32.partialorder %v2016_v7, 8.507059e+37  ;;  %v2840_v41 = vand.u32 2147483647, %v6248_v58  ;;  %v2234_v57 = vsub.f32 1.0, %v2233_v35  ;;  %v2241_v60 = vand.u32 2147483647, %v7432_v46  ;;  %vm2014_vm11 = vmor %vm2012_vm7, %vm2013_vm8 }
 0x28e   :  { %v4152_v54 = vpop.eup %4151  ;;  %v2011_v56 = vadd.f32 %v7429_v26, %v2010_v59  ;;  %vm2237_vm10 = vweird.f32 %v7432_v46  ;;  %v2243_v8 = vand.u32 2147483648, %v7432_v46  ;;  %v2248_v38 = vmul.f32 %v7437_v19, %v7436_v27 }
 0x28f   :  { %v4154_v5 = vpop.eup %4153  ;;  %v2019_v33 = vor.u32 1.1754944e-38, %v2018_v50  ;;  %v2235_v43 = vmul.f32 %v7433_v9, %v2234_v57  ;;  %vm2238_vm12 = vweird.f32 %v7433_v9  ;;  %vm2252_vm13 = vweird.f32 %v7436_v27 }
 0x290   :  { %v6271_v24 = vadd.f32 1.0, %v4152_v54  ;;  %v2015_v7 = vsel %vm2014_vm11, %v7429_v26, %v2011_v56  ;;  %vm6274_vm14 = vcmp.eq.f32.partialorder %v2241_v60, 8.507059e+37  ;;  %v2249_v35 = vsub.f32 1.0, %v2248_v38  ;;  %vm2239_vm0 = vmor %vm2237_vm10, %vm2238_vm12 }
 0x291   :  { %v6280_v59 = vsel %vm6257_vm9, %v2019_v33, %v2015_v7  ;;  %v2236_v50 = vadd.f32 %v7433_v9, %v2235_v43  ;;  %vm2253_vm15 = vweird.f32 %v7437_v19  ;;  %v2256_v57 = vand.u32 2147483647, %v7436_v27  ;;  %v7443_v43 = vld [vmem:[#allocation34_spill] sm:$0xff] }
 0x292   :  { %7440 = vst [vmem:[#allocation22_spill] sm:$0xff] %v6280_v59  ;;  %v6285_v58 = vpop.eup %4155  ;;  %v2841_v54 = vand.u32 2147483647, %v6280_v59  ;;  %v2244_v26 = vor.u32 1.1754944e-38, %v2243_v8  ;;  %v2250_v60 = vmul.f32 %v7437_v19, %v2249_v35  ;;  %v2258_v1 = vand.u32 2147483648, %v7436_v27  ;;  %vm2254_vm3 = vmor %vm2252_vm13, %vm2253_vm15  ;;  %v1486_v27 = vpop.permute.xlu1 %1485 }
 0x293   :  { %v6292_v56 = vadd.f32 1.0, %v4154_v5  ;;  %v2240_v38 = vsel %vm2239_vm0, %v7433_v9, %v2236_v50  ;;  %vm6295_vm1 = vcmp.eq.f32.partialorder %v2256_v57, 8.507059e+37  ;;  %v2473_v7 = vmul.f32 %v5738_v6, %v7443_v43  ;;  %v7445_v57 = vld [vmem:[#allocation35_spill] sm:$0xff] }
 0x294   :  { %v2908_v59 = vadd.f32 %v2841_v54, %v2840_v41  ;;  %v6303_v46 = vsel %vm6274_vm14, %v2244_v26, %v2240_v38  ;;  %v2251_v8 = vadd.f32 %v7437_v19, %v2250_v60  ;;  %vm2477_vm2 = vweird.f32 %v7443_v43  ;;  %v1326_v26 = vld [vmem:[#allocation6 + $0x1f0] sm:$0xff]  ;;  %v1327_v60 = vld [vmem:[#allocation6 + $0x1f8] sm:$0xff] }
 0x295   :  { %7444 = vst [vmem:[#allocation26_spill] sm:$0xff] %v6303_v46  ;;  %v2259_v9 = vor.u32 1.1754944e-38, %v2258_v1  ;;  %v2856_v5 = vand.u32 2147483647, %v6303_v46  ;;  %v2474_v35 = vsub.f32 1.0, %v2473_v7  ;;  %vm2478_vm4 = vweird.f32 %v5738_v6 }
 0x296   :  { %v2481_v50 = vand.u32 2147483647, %v7443_v43  ;;  %2909 = vadd.xlane.f32.xlu0 %v2908_v59  ;;  %v2255_v41 = vsel %vm2254_vm3, %v7437_v19, %v2251_v8  ;;  %v2483_v25 = vand.u32 2147483648, %v7443_v43  ;;  %v2488_v54 = vmul.f32 %v5744_v2, %v7445_v57  ;;  %vm2479_vm8 = vmor %vm2477_vm2, %vm2478_vm4 }
 0x297   :  { %v6320_v1 = vsel %vm6295_vm1, %v2259_v9, %v2255_v41  ;;  %v2475_v38 = vmul.f32 %v5738_v6, %v2474_v35  ;;  %vm2492_vm6 = vweird.f32 %v7445_v57  ;;  %vm2493_vm7 = vweird.f32 %v5744_v2 }
 0x298   :  { %7446 = vst [vmem:[#allocation25_spill] sm:$0xff] %v6320_v1  ;;  %vm6323_vm5 = vcmp.eq.f32.partialorder %v2481_v50, 8.507059e+37  ;;  %v2857_v19 = vand.u32 2147483647, %v6320_v1  ;;  %v2489_v7 = vsub.f32 1.0, %v2488_v54  ;;  %v2498_v33 = vand.u32 2147483648, %v7445_v57  ;;  %vm2494_vm10 = vmor %vm2492_vm6, %vm2493_vm7 }
 0x299   :  { %v2496_v8 = vand.u32 2147483647, %v7445_v57  ;;  %v2476_v46 = vadd.f32 %v5738_v6, %v2475_v38  ;;  %v1550_v9 = vsub.f32 %v1326_v26, %v1486_v27  ;;  %v1551_v41 = vsub.f32 %v1327_v60, %v1486_v27 }
 0x29a   :  { %v2932_v35 = vadd.f32 %v2857_v19, %v2856_v5  ;;  %v2484_v50 = vor.u32 1.1754944e-38, %v2483_v25  ;;  %v2490_v1 = vmul.f32 %v5744_v2, %v2489_v7  ;;  %v2713_v54 = vmul.f32 %v5841_v32, %v5790_v14 }
 0x29b   :  { %v2480_v22 = vsel %vm2479_vm8, %v5738_v6, %v2476_v46  ;;  %vm6341_vm9 = vcmp.eq.f32.partialorder %v2496_v8, 8.507059e+37  ;;  %v3746_v26 = vmul.f32 -50.0, %v1550_v9  ;;  %v3747_v60 = vmul.f32 -50.0, %v1551_v41 }
 0x29c   :  { %2933 = vadd.xlane.f32.xlu2 %v2932_v35  ;;  %v6347_v5 = vsel %vm6323_vm5, %v2484_v50, %v2480_v22  ;;  %v2491_v43 = vadd.f32 %v5744_v2, %v2490_v1  ;;  %v2499_v25 = vor.u32 1.1754944e-38, %v2498_v33  ;;  %v2714_v27 = vsub.f32 1.0, %v2713_v54 }
 0x29d   :  { %4157 = vrcp.f32 %v6241_v31  ;;  %v2872_v6 = vand.u32 2147483647, %v6347_v5  ;;  %v1804_v46 = vmul.f32 1.442695, %v3746_v26  ;;  %v1806_v19 = vmul.f32 1.442695, %v3747_v60 }
 0x29e   :  { %v2495_v7 = vsel %vm2494_vm10, %v5744_v2, %v2491_v43  ;;  %v2715_v22 = vmul.f32 %v5841_v32, %v2714_v27  ;;  %vm2718_vm11 = vweird.f32 %v5841_v32  ;;  %v2723_v1 = vand.u32 2147483648, %v5790_v14  ;;  %v7451_v26 = vld [vmem:[#allocation31_spill] sm:$0xff]  ;;  %v7452_v60 = vld [vmem:[#allocation37_spill] sm:$0xff] }
 0x29f   :  { %v6362_v59 = vsel %vm6341_vm9, %v2499_v25, %v2495_v7  ;;  %4159 = vpow2.f32 %v1804_v46  ;;  %v2721_v57 = vand.u32 2147483647, %v5790_v14  ;;  %v2728_v8 = vmul.f32 %v5845_v42, %v5797_v48 }
 0x2a0   :  { %4161 = vrcp.f32 %v6271_v24  ;;  %v2873_v2 = vand.u32 2147483647, %v6362_v59  ;;  %v2716_v33 = vadd.f32 %v5841_v32, %v2715_v22  ;;  %vm2717_vm12 = vweird.f32 %v5790_v14  ;;  %v7455_v22 = vld [vmem:[#allocation33_spill] sm:$0xff] }
 0x2a1   :  { %4163 = vpow2.f32 %v1806_v19  ;;  %vm2719_vm13 = vmor %vm2717_vm12, %vm2718_vm11  ;;  %v2724_v9 = vor.u32 1.1754944e-38, %v2723_v1  ;;  %v2729_v41 = vsub.f32 1.0, %v2728_v8  ;;  %v2736_v35 = vand.u32 2147483647, %v5797_v48 }
 0x2a2   :  { %v2956_v50 = vadd.f32 %v2873_v2, %v2872_v6  ;;  %v2720_v54 = vsel %vm2719_vm13, %v5841_v32, %v2716_v33  ;;  %v2738_v38 = vand.u32 2147483648, %v5797_v48  ;;  %v2503_v43 = vmul.f32 %v7452_v60, %v7451_v26 }
 0x2a3   :  { %v6376_v25 = vpop.eup %4157  ;;  %4165 = vrcp.f32 %v6292_v56  ;;  %vm2722_vm14 = vcmp.eq.f32.partialorder %v2721_v57, 8.507059e+37  ;;  %v2730_v14 = vmul.f32 %v5845_v42, %v2729_v41  ;;  %vm2733_vm15 = vweird.f32 %v5845_v42 }
 0x2a4   :  { %2957 = vadd.xlane.f32.xlu1 %v2956_v50  ;;  %v6381_v27 = vsel %vm2722_vm14, %v2724_v9, %v2720_v54  ;;  %vm2732_vm0 = vweird.f32 %v5797_v48  ;;  %vm6384_vm1 = vcmp.eq.f32.partialorder %v2736_v35, 8.507059e+37  ;;  %v2504_v6 = vsub.f32 1.0, %v2503_v43 }
 0x2a5   :  { %v4160_v46 = vpop.eup %4159  ;;  %v2731_v19 = vadd.f32 %v5845_v42, %v2730_v14  ;;  %vm2507_vm2 = vweird.f32 %v7451_v26  ;;  %v2513_v7 = vand.u32 2147483648, %v7451_v26  ;;  %v2518_v1 = vmul.f32 %v5726_v13, %v7455_v22  ;;  %vm2734_vm3 = vmor %vm2732_vm0, %vm2733_vm15 }
 0x2a6   :  { %v6393_v57 = vpop.eup %4161  ;;  %v2739_v8 = vor.u32 1.1754944e-38, %v2738_v38  ;;  %v2505_v48 = vmul.f32 %v7452_v60, %v2504_v6  ;;  %vm2508_vm4 = vweird.f32 %v7452_v60  ;;  %v2511_v2 = vand.u32 2147483647, %v7451_v26 }
 0x2a7   :  { %v4164_v33 = vpop.eup %4163  ;;  %v6398_v9 = vadd.f32 1.0, %v4160_v46  ;;  %v2735_v41 = vsel %vm2734_vm3, %v5845_v42, %v2731_v19  ;;  %v2888_v35 = vand.u32 2147483647, %v6381_v27  ;;  %vm2522_vm5 = vweird.f32 %v7455_v22  ;;  %vm2509_vm7 = vmor %vm2507_vm2, %vm2508_vm4 }
 0x2a8   :  { %v6405_v50 = vsel %vm6384_vm1, %v2739_v8, %v2735_v41  ;;  %v2506_v54 = vadd.f32 %v7452_v60, %v2505_v48  ;;  %v2519_v38 = vsub.f32 1.0, %v2518_v1  ;;  %vm2523_vm6 = vweird.f32 %v5726_v13 }
 0x2a9   :  { %7456 = vst [vmem:[#allocation29_spill] sm:$0xff] %v6405_v50  ;;  %v6409_v43 = vpop.eup %4165  ;;  %v2889_v14 = vand.u32 2147483647, %v6405_v50  ;;  %v2514_v42 = vor.u32 1.1754944e-38, %v2513_v7  ;;  %v2526_v6 = vand.u32 2147483647, %v7455_v22  ;;  %v2023_v1 = vmul.f32 %v5924_v0, %v5876_v10  ;;  %vm2524_vm10 = vmor %vm2522_vm5, %vm2523_vm6 }
 0x2aa   :  { %v2528_v46 = vand.u32 2147483648, %v7455_v22  ;;  %v2510_v32 = vsel %vm2509_vm7, %v7452_v60, %v2506_v54  ;;  %vm2512_vm8 = vcmp.eq.f32.partialorder %v2511_v2, 8.507059e+37  ;;  %v2520_v19 = vmul.f32 %v5726_v13, %v2519_v38 }
 0x2ab   :  { %v6420_v8 = vadd.f32 1.0, %v4164_v33  ;;  %4167 = vrcp.f32 %v6398_v9  ;;  %v2980_v48 = vadd.f32 %v2889_v14, %v2888_v35  ;;  %v6423_v26 = vsel %vm2512_vm8, %v2514_v42, %v2510_v32 }
 0x2ac   :  { %v2521_v7 = vadd.f32 %v5726_v13, %v2520_v19  ;;  %vm2527_vm9 = vcmp.eq.f32.partialorder %v2526_v6, 8.507059e+37  ;;  %v2529_v41 = vor.u32 1.1754944e-38, %v2528_v46  ;;  %v2024_v50 = vsub.f32 1.0, %v2023_v1 }
 0x2ad   :  { %2981 = vadd.xlane.f32.xlu0 %v2980_v48  ;;  %v2874_v60 = vand.u32 2147483647, %v6423_v26  ;;  %v2031_v2 = vand.u32 2147483647, %v5876_v10  ;;  %v2033_v33 = vand.u32 2147483648, %v5876_v10  ;;  %v2038_v35 = vmul.f32 %v5931_v53, %v5882_v28 }
 0x2ae   :  { %v2525_v54 = vsel %vm2524_vm10, %v5726_v13, %v2521_v7  ;;  %v2025_v38 = vmul.f32 %v5924_v0, %v2024_v50  ;;  %vm2028_vm11 = vweird.f32 %v5924_v0  ;;  %v2046_v14 = vand.u32 2147483647, %v5882_v28 }
 0x2af   :  { %v6439_v42 = vsel %vm2527_vm9, %v2529_v41, %v2525_v54  ;;  %vm2027_vm12 = vweird.f32 %v5876_v10  ;;  %v2039_v22 = vsub.f32 1.0, %v2038_v35  ;;  %vm2042_vm13 = vweird.f32 %v5882_v28 }
 0x2b0   :  { %v2875_v6 = vand.u32 2147483647, %v6439_v42  ;;  %v2026_v46 = vadd.f32 %v5924_v0, %v2025_v38  ;;  %vm2043_vm14 = vweird.f32 %v5931_v53  ;;  %v2048_v13 = vand.u32 2147483648, %v5882_v28  ;;  %vm2029_vm15 = vmor %vm2027_vm12, %vm2028_vm11 }
 0x2b1   :  { %v6447_v50 = vpop.eup %4167  ;;  %vm2032_vm0 = vcmp.eq.f32.partialorder %v2031_v2, 8.507059e+37  ;;  %v2034_v32 = vor.u32 1.1754944e-38, %v2033_v33  ;;  %v2040_v19 = vmul.f32 %v5931_v53, %v2039_v22  ;;  %v2263_v10 = vmul.f32 %v6056_v11, %v6017_v16  ;;  %vm2044_vm3 = vmor %vm2042_vm13, %vm2043_vm14 }
 0x2b2   :  { %v2959_v1 = vadd.f32 %v2875_v6, %v2874_v60  ;;  %v2030_v48 = vsel %vm2029_vm15, %v5924_v0, %v2026_v46  ;;  %vm6453_vm1 = vcmp.eq.f32.partialorder %v2046_v14, 8.507059e+37  ;;  %v2271_v41 = vand.u32 2147483647, %v6017_v16 }
 0x2b3   :  { %v6458_v35 = vsel %vm2032_vm0, %v2034_v32, %v2030_v48  ;;  %v2041_v54 = vadd.f32 %v5931_v53, %v2040_v19  ;;  %v2264_v2 = vsub.f32 1.0, %v2263_v10  ;;  %vm2267_vm2 = vweird.f32 %v6017_v16  ;;  %v7461_v10 = vld [vmem:[#allocation41_spill] sm:$0xff] }
 0x2b4   :  { %2960 = vadd.xlane.f32.xlu2 %v2959_v1  ;;  %v2049_v0 = vor.u32 1.1754944e-38, %v2048_v13  ;;  %vm2268_vm4 = vweird.f32 %v6056_v11  ;;  %v2273_v60 = vand.u32 2147483648, %v6017_v16  ;;  %v2278_v33 = vmul.f32 %v6064_v4, %v6019_v37 }
 0x2b5   :  { %v2045_v38 = vsel %vm2044_vm3, %v5931_v53, %v2041_v54  ;;  %v2842_v14 = vand.u32 2147483647, %v6458_v35  ;;  %v2265_v22 = vmul.f32 %v6056_v11, %v2264_v2  ;;  %vm6473_vm5 = vcmp.eq.f32.partialorder %v2271_v41, 8.507059e+37  ;;  %vm2269_vm7 = vmor %vm2267_vm2, %vm2268_vm4 }
 0x2b6   :  { %v6479_v28 = vsel %vm6453_vm1, %v2049_v0, %v2045_v38  ;;  %v2279_v46 = vsub.f32 1.0, %v2278_v33  ;;  %vm2282_vm6 = vweird.f32 %v6019_v37  ;;  %v2286_v13 = vand.u32 2147483647, %v6019_v37  ;;  %v7464_v38 = vld [vmem:[#allocation42_spill] sm:$0xff] }
 0x2b7   :  { %v2843_v32 = vand.u32 2147483647, %v6479_v28  ;;  %v2266_v53 = vadd.f32 %v6056_v11, %v2265_v22  ;;  %v2288_v19 = vand.u32 2147483648, %v6019_v37  ;;  %v2053_v1 = vmul.f32 %v5851_v55, %v7461_v10 }
 0x2b8   :  { %v2274_v48 = vor.u32 1.1754944e-38, %v2273_v60  ;;  %v2280_v7 = vmul.f32 %v6064_v4, %v2279_v46  ;;  %vm2283_vm8 = vweird.f32 %v6064_v4  ;;  %vm2057_vm9 = vweird.f32 %v7461_v10 }
 0x2b9   :  { %v2911_v41 = vadd.f32 %v2843_v32, %v2842_v14  ;;  %v2270_v54 = vsel %vm2269_vm7, %v6056_v11, %v2266_v53  ;;  %vm6496_vm10 = vcmp.eq.f32.partialorder %v2286_v13, 8.507059e+37  ;;  %v2054_v0 = vsub.f32 1.0, %v2053_v1  ;;  %vm2284_vm11 = vmor %vm2282_vm6, %vm2283_vm8 }
 0x2ba   :  { %v6502_v33 = vsel %vm6473_vm5, %v2274_v48, %v2270_v54  ;;  %v2281_v16 = vadd.f32 %v6064_v4, %v2280_v7  ;;  %v2063_v60 = vand.u32 2147483648, %v7461_v10  ;;  %v2068_v22 = vmul.f32 %v5856_v52, %v7464_v38 }
 0x2bb   :  { %2912 = vadd.xlane.f32.xlu1 %v2911_v41  ;;  %v2289_v11 = vor.u32 1.1754944e-38, %v2288_v19  ;;  %v2055_v14 = vmul.f32 %v5851_v55, %v2054_v0  ;;  %vm2058_vm12 = vweird.f32 %v5851_v55  ;;  %v2061_v6 = vand.u32 2147483647, %v7461_v10 }
 0x2bc   :  { %v2285_v46 = vsel %vm2284_vm11, %v6064_v4, %v2281_v16  ;;  %v2858_v13 = vand.u32 2147483647, %v6502_v33  ;;  %v2064_v32 = vor.u32 1.1754944e-38, %v2063_v60  ;;  %v2069_v53 = vsub.f32 1.0, %v2068_v22  ;;  %vm2059_vm13 = vmor %vm2057_vm9, %vm2058_vm12 }
 0x2bd   :  { %v6517_v1 = vsel %vm6496_vm10, %v2289_v11, %v2285_v46  ;;  %v2056_v37 = vadd.f32 %v5851_v55, %v2055_v14  ;;  %v2076_v19 = vand.u32 2147483647, %v7464_v38  ;;  %v2078_v48 = vand.u32 2147483648, %v7464_v38 }
 0x2be   :  { %v2859_v7 = vand.u32 2147483647, %v6517_v1  ;;  %v2070_v4 = vmul.f32 %v5856_v52, %v2069_v53  ;;  %vm2073_vm14 = vweird.f32 %v5856_v52  ;;  %v2293_v41 = vmul.f32 %v6072_v49, %v6025_v15 }
 0x2bf   :  { %v2060_v54 = vsel %vm2059_vm13, %v5851_v55, %v2056_v37  ;;  %vm2062_vm15 = vcmp.eq.f32.partialorder %v2061_v6, 8.507059e+37  ;;  %vm2072_vm0 = vweird.f32 %v7464_v38  ;;  %vm2077_vm1 = vcmp.eq.f32.partialorder %v2076_v19, 8.507059e+37 }
 0x2c0   :  { %v2935_v2 = vadd.f32 %v2859_v7, %v2858_v13  ;;  %v6531_v0 = vsel %vm2062_vm15, %v2064_v32, %v2060_v54  ;;  %v2071_v16 = vadd.f32 %v5856_v52, %v2070_v4  ;;  %v2294_v10 = vsub.f32 1.0, %v2293_v41  ;;  %vm2074_vm2 = vmor %vm2072_vm0, %vm2073_vm14 }
 0x2c1   :  { %v2079_v60 = vor.u32 1.1754944e-38, %v2078_v48  ;;  %vm2298_vm3 = vweird.f32 %v6072_v49  ;;  %v2303_v22 = vand.u32 2147483648, %v6025_v15  ;;  %v2308_v11 = vmul.f32 %v6078_v12, %v6035_v36 }
 0x2c2   :  { %2936 = vadd.xlane.f32.xlu0 %v2935_v2  ;;  %v2075_v55 = vsel %vm2074_vm2, %v5856_v52, %v2071_v16  ;;  %v2844_v38 = vand.u32 2147483647, %v6531_v0  ;;  %v2295_v14 = vmul.f32 %v6072_v49, %v2294_v10  ;;  %v2301_v6 = vand.u32 2147483647, %v6025_v15 }
 0x2c3   :  { %v6542_v46 = vsel %vm2077_vm1, %v2079_v60, %v2075_v55  ;;  %vm2297_vm4 = vweird.f32 %v6025_v15  ;;  %v2309_v13 = vsub.f32 1.0, %v2308_v11  ;;  %vm2312_vm5 = vweird.f32 %v6035_v36 }
 0x2c4   :  { %v2845_v32 = vand.u32 2147483647, %v6542_v46  ;;  %v2296_v53 = vadd.f32 %v6072_v49, %v2295_v14  ;;  %vm2313_vm6 = vweird.f32 %v6078_v12  ;;  %v2318_v52 = vand.u32 2147483648, %v6035_v36  ;;  %vm2299_vm7 = vmor %vm2297_vm4, %vm2298_vm3 }
 0x2c5   :  { %v2304_v37 = vor.u32 1.1754944e-38, %v2303_v22  ;;  %v2310_v19 = vmul.f32 %v6078_v12, %v2309_v13  ;;  %v2316_v48 = vand.u32 2147483647, %v6035_v36  ;;  %v2533_v15 = vmul.f32 %v6177_v3, %v6132_v18  ;;  %vm2314_vm11 = vmor %vm2312_vm5, %vm2313_vm6 }
 0x2c6   :  { %v2914_v7 = vadd.f32 %v2845_v32, %v2844_v38  ;;  %v2300_v4 = vsel %vm2299_vm7, %v6072_v49, %v2296_v53  ;;  %vm2302_vm8 = vcmp.eq.f32.partialorder %v2301_v6, 8.507059e+37  ;;  %vm2537_vm9 = vweird.f32 %v6132_v18 }
 0x2c7   :  { %v6558_v41 = vsel %vm2302_vm8, %v2304_v37, %v2300_v4  ;;  %v2311_v54 = vadd.f32 %v6078_v12, %v2310_v19  ;;  %v2534_v2 = vsub.f32 1.0, %v2533_v15  ;;  %vm2538_vm10 = vweird.f32 %v6177_v3 }
 0x2c8   :  { %2915 = vadd.xlane.f32.xlu2 %v2914_v7  ;;  %v2319_v16 = vor.u32 1.1754944e-38, %v2318_v52  ;;  %v2541_v10 = vand.u32 2147483647, %v6132_v18  ;;  %v2543_v49 = vand.u32 2147483648, %v6132_v18  ;;  %v2548_v60 = vmul.f32 %v6189_v20, %v6137_v23  ;;  %vm2539_vm14 = vmor %vm2537_vm9, %vm2538_vm10 }
 0x2c9   :  { %v2315_v22 = vsel %vm2314_vm11, %v6078_v12, %v2311_v54  ;;  %vm2317_vm12 = vcmp.eq.f32.partialorder %v2316_v48, 8.507059e+37  ;;  %v2860_v11 = vand.u32 2147483647, %v6558_v41  ;;  %v2535_v55 = vmul.f32 %v6177_v3, %v2534_v2 }
 0x2ca   :  { %v6573_v38 = vsel %vm2317_vm12, %v2319_v16, %v2315_v22  ;;  %v2549_v14 = vsub.f32 1.0, %v2548_v60  ;;  %vm2552_vm13 = vweird.f32 %v6137_v23  ;;  %v2556_v36 = vand.u32 2147483647, %v6137_v23 }
 0x2cb   :  { %v2861_v6 = vand.u32 2147483647, %v6573_v38  ;;  %v2536_v13 = vadd.f32 %v6177_v3, %v2535_v55  ;;  %v2558_v32 = vand.u32 2147483648, %v6137_v23  ;;  %v2323_v12 = vmul.f32 %v6095_v34, %v6046_v39 }
 0x2cc   :  { %vm2542_vm15 = vcmp.eq.f32.partialorder %v2541_v10, 8.507059e+37  ;;  %v2544_v53 = vor.u32 1.1754944e-38, %v2543_v49  ;;  %v2550_v52 = vmul.f32 %v6189_v20, %v2549_v14  ;;  %vm2553_vm0 = vweird.f32 %v6189_v20 }
 0x2cd   :  { %v2938_v37 = vadd.f32 %v2861_v6, %v2860_v11  ;;  %v2540_v19 = vsel %vm2539_vm14, %v6177_v3, %v2536_v13  ;;  %vm6589_vm1 = vcmp.eq.f32.partialorder %v2556_v36, 8.507059e+37  ;;  %v2324_v15 = vsub.f32 1.0, %v2323_v12  ;;  %vm2554_vm3 = vmor %vm2552_vm13, %vm2553_vm0 }
 0x2ce   :  { %v6593_v7 = vsel %vm2542_vm15, %v2544_v53, %v2540_v19  ;;  %v2551_v4 = vadd.f32 %v6189_v20, %v2550_v52  ;;  %vm2328_vm2 = vweird.f32 %v6095_v34  ;;  %v2333_v18 = vand.u32 2147483648, %v6046_v39 }
 0x2cf   :  { %2939 = vadd.xlane.f32.xlu1 %v2938_v37  ;;  %v2559_v54 = vor.u32 1.1754944e-38, %v2558_v32  ;;  %v2325_v3 = vmul.f32 %v6095_v34, %v2324_v15  ;;  %v2331_v2 = vand.u32 2147483647, %v6046_v39  ;;  %v2338_v16 = vmul.f32 %v6143_v62, %v6058_v61 }
 0x2d0   :  { %v2555_v10 = vsel %vm2554_vm3, %v6189_v20, %v2551_v4  ;;  %v2876_v49 = vand.u32 2147483647, %v6593_v7  ;;  %vm2327_vm4 = vweird.f32 %v6046_v39  ;;  %vm2342_vm5 = vweird.f32 %v6058_v61 }
 0x2d1   :  { %v6610_v23 = vsel %vm6589_vm1, %v2559_v54, %v2555_v10  ;;  %v2326_v60 = vadd.f32 %v6095_v34, %v2325_v3  ;;  %v2339_v22 = vsub.f32 1.0, %v2338_v16  ;;  %v2346_v11 = vand.u32 2147483647, %v6058_v61  ;;  %vm2329_vm6 = vmor %vm2327_vm4, %vm2328_vm2 }
 0x2d2   :  { %v2877_v55 = vand.u32 2147483647, %v6610_v23  ;;  %v2334_v20 = vor.u32 1.1754944e-38, %v2333_v18  ;;  %v2348_v14 = vand.u32 2147483648, %v6058_v61  ;;  %v2563_v39 = vmul.f32 %v6285_v58, %v6150_v47 }
 0x2d3   :  { %v2330_v36 = vsel %vm2329_vm6, %v6095_v34, %v2326_v60  ;;  %vm2332_vm7 = vcmp.eq.f32.partialorder %v2331_v2, 8.507059e+37  ;;  %v2340_v6 = vmul.f32 %v6143_v62, %v2339_v22  ;;  %vm2343_vm8 = vweird.f32 %v6143_v62 }
 0x2d4   :  { %v2962_v13 = vadd.f32 %v2877_v55, %v2876_v49  ;;  %v6623_v32 = vsel %vm2332_vm7, %v2334_v20, %v2330_v36  ;;  %v2564_v12 = vsub.f32 1.0, %v2563_v39  ;;  %vm2567_vm9 = vweird.f32 %v6150_v47  ;;  %vm2344_vm12 = vmor %vm2342_vm5, %vm2343_vm8 }
 0x2d5   :  { %v2341_v53 = vadd.f32 %v6143_v62, %v2340_v6  ;;  %vm2347_vm10 = vcmp.eq.f32.partialorder %v2346_v11, 8.507059e+37  ;;  %vm2568_vm11 = vweird.f32 %v6285_v58  ;;  %v2573_v52 = vand.u32 2147483648, %v6150_v47 }
 0x2d6   :  { %2963 = vadd.xlane.f32.xlu0 %v2962_v13  ;;  %v2349_v34 = vor.u32 1.1754944e-38, %v2348_v14  ;;  %v2565_v37 = vmul.f32 %v6285_v58, %v2564_v12  ;;  %v2571_v19 = vand.u32 2147483647, %v6150_v47  ;;  %v2578_v48 = vmul.f32 %v6376_v25, %v6241_v31  ;;  %vm2569_vm15 = vmor %vm2567_vm9, %vm2568_vm11 }
 0x2d7   :  { %v2345_v15 = vsel %vm2344_vm12, %v6143_v62, %v2341_v53  ;;  %v2862_v4 = vand.u32 2147483647, %v6623_v32  ;;  %vm2582_vm13 = vweird.f32 %v6241_v31  ;;  %v2586_v18 = vand.u32 2147483647, %v6241_v31 }
 0x2d8   :  { %v6639_v54 = vsel %vm2347_vm10, %v2349_v34, %v2345_v15  ;;  %v2566_v61 = vadd.f32 %v6285_v58, %v2565_v37  ;;  %v2579_v3 = vsub.f32 1.0, %v2578_v48  ;;  %vm2583_vm14 = vweird.f32 %v6376_v25 }
 0x2d9   :  { %v2863_v2 = vand.u32 2147483647, %v6639_v54  ;;  %v2574_v62 = vor.u32 1.1754944e-38, %v2573_v52  ;;  %v2588_v16 = vand.u32 2147483648, %v6241_v31  ;;  %v2083_v10 = vmul.f32 %v6393_v57, %v6271_v24  ;;  %vm2584_vm3 = vmor %vm2582_vm13, %vm2583_vm14 }
 0x2da   :  { %v2570_v49 = vsel %vm2569_vm15, %v6285_v58, %v2566_v61  ;;  %vm2572_vm0 = vcmp.eq.f32.partialorder %v2571_v19, 8.507059e+37  ;;  %v2580_v60 = vmul.f32 %v6376_v25, %v2579_v3  ;;  %vm6653_vm1 = vcmp.eq.f32.partialorder %v2586_v18, 8.507059e+37 }
 0x2db   :  { %v2941_v11 = vadd.f32 %v2863_v2, %v2862_v4  ;;  %v6657_v55 = vsel %vm2572_vm0, %v2574_v62, %v2570_v49  ;;  %v2084_v47 = vsub.f32 1.0, %v2083_v10  ;;  %v2091_v20 = vand.u32 2147483647, %v6271_v24  ;;  %v7471_v10 = vld [vmem:[#allocation53_spill] sm:$0xff] }
 0x2dc   :  { %v2581_v14 = vadd.f32 %v6376_v25, %v2580_v60  ;;  %vm2087_vm2 = vweird.f32 %v6271_v24  ;;  %v2093_v39 = vand.u32 2147483648, %v6271_v24  ;;  %v2098_v58 = vmul.f32 %v6409_v43, %v6292_v56 }
 0x2dd   :  { %2942 = vadd.xlane.f32.xlu2 %v2941_v11  ;;  %v2589_v36 = vor.u32 1.1754944e-38, %v2588_v16  ;;  %v2878_v6 = vand.u32 2147483647, %v6657_v55  ;;  %v2085_v13 = vmul.f32 %v6393_v57, %v2084_v47  ;;  %vm2088_vm4 = vweird.f32 %v6393_v57 }
 0x2de   :  { %v2585_v12 = vsel %vm2584_vm3, %v6376_v25, %v2581_v14  ;;  %vm6673_vm5 = vcmp.eq.f32.partialorder %v2091_v20, 8.507059e+37  ;;  %v2099_v52 = vsub.f32 1.0, %v2098_v58  ;;  %vm2103_vm6 = vweird.f32 %v6409_v43  ;;  %vm2089_vm7 = vmor %vm2087_vm2, %vm2088_vm4 }
 0x2df   :  { %v6680_v31 = vsel %vm6653_vm1, %v2589_v36, %v2585_v12  ;;  %v2086_v34 = vadd.f32 %v6393_v57, %v2085_v13  ;;  %v2108_v37 = vand.u32 2147483648, %v6292_v56  ;;  %v2773_v19 = vmul.f32 %v5954_v17, %v5908_v40  ;;  %v7472_v36 = vld [vmem:[#allocation47_spill] sm:$0xff] }
 0x2e0   :  { %v2879_v25 = vand.u32 2147483647, %v6680_v31  ;;  %v2094_v48 = vor.u32 1.1754944e-38, %v2093_v39  ;;  %v2100_v15 = vmul.f32 %v6409_v43, %v2099_v52  ;;  %v2106_v4 = vand.u32 2147483647, %v6292_v56 }
 0x2e1   :  { %v2090_v18 = vsel %vm2089_vm7, %v6393_v57, %v2086_v34  ;;  %vm2102_vm8 = vweird.f32 %v6292_v56  ;;  %v2109_v61 = vor.u32 1.1754944e-38, %v2108_v37  ;;  %v2774_v3 = vsub.f32 1.0, %v2773_v19  ;;  %v2898_v34 = vpop.xlane.xlu0 %2897 }
 0x2e2   :  { %v2965_v2 = vadd.f32 %v2879_v25, %v2878_v6  ;;  %v6695_v62 = vsel %vm6673_vm5, %v2094_v48, %v2090_v18  ;;  %v2101_v16 = vadd.f32 %v6409_v43, %v2100_v15  ;;  %vm2778_vm9 = vweird.f32 %v5954_v17  ;;  %vm2104_vm10 = vmor %vm2102_vm8, %vm2103_vm6  ;;  %v7473_v6 = vld [vmem:[#allocation51_spill] sm:$0xff]  ;;  %v7474_v48 = vld [vmem:[#allocation48_spill] sm:$0xff] }
 0x2e3   :  { %v2775_v24 = vmul.f32 %v5954_v17, %v2774_v3  ;;  %v2781_v57 = vand.u32 2147483647, %v5908_v40  ;;  %v2783_v56 = vand.u32 2147483648, %v5908_v40  ;;  %v2788_v49 = vmul.f32 %v7471_v10, %v5913_v30  ;;  %v7475_v15 = vld [vmem:[#allocation52_spill] sm:$0xff] }
 0x2e4   :  { %2966 = vadd.xlane.f32.xlu1 %v2965_v2  ;;  %v2105_v60 = vsel %vm2104_vm10, %v6409_v43, %v2101_v16  ;;  %vm2107_vm11 = vcmp.eq.f32.partialorder %v2106_v4, 8.507059e+37  ;;  %v2846_v22 = vand.u32 2147483647, %v6695_v62  ;;  %vm2777_vm12 = vweird.f32 %v5908_v40 }
 0x2e5   :  { %v6709_v11 = vsel %vm2107_vm11, %v2109_v61, %v2105_v60  ;;  %v2776_v47 = vadd.f32 %v5954_v17, %v2775_v24  ;;  %v2784_v20 = vor.u32 1.1754944e-38, %v2783_v56  ;;  %v2789_v14 = vsub.f32 1.0, %v2788_v49  ;;  %vm2779_vm13 = vmor %vm2777_vm12, %vm2778_vm9 }
 0x2e6   :  { %v2847_v39 = vand.u32 2147483647, %v6709_v11  ;;  %v2796_v58 = vand.u32 2147483647, %v5913_v30  ;;  %v2798_v43 = vand.u32 2147483648, %v5913_v30  ;;  %v2743_v13 = vmul.f32 %v7473_v6, %v7472_v36 }
 0x2e7   :  { %v2780_v40 = vsel %vm2779_vm13, %v5954_v17, %v2776_v47  ;;  %vm2782_vm14 = vcmp.eq.f32.partialorder %v2781_v57, 8.507059e+37  ;;  %v2790_v12 = vmul.f32 %v7471_v10, %v2789_v14  ;;  %vm2793_vm15 = vweird.f32 %v7471_v10 }
 0x2e8   :  { %4169 = vrcp.f32 %v6420_v8  ;;  %v2917_v53 = vadd.f32 %v2847_v39, %v2846_v22  ;;  %v6723_v52 = vsel %vm2782_vm14, %v2784_v20, %v2780_v40  ;;  %vm2792_vm0 = vweird.f32 %v5913_v30 }
 0x2e9   :  { %v2791_v37 = vadd.f32 %v7471_v10, %v2790_v12  ;;  %v2744_v19 = vsub.f32 1.0, %v2743_v13  ;;  %vm2748_vm1 = vweird.f32 %v7473_v6  ;;  %vm2794_vm2 = vmor %vm2792_vm0, %vm2793_vm15  ;;  %vm2797_vm3 = vcmp.eq.f32.partialorder %v2796_v58, 8.507059e+37 }
 0x2ea   :  { %2918 = vadd.xlane.f32.xlu0 %v2917_v53  ;;  %v2799_v17 = vor.u32 1.1754944e-38, %v2798_v43  ;;  %v2753_v25 = vand.u32 2147483648, %v7472_v36  ;;  %v2758_v4 = vmul.f32 %v7475_v15, %v7474_v48  ;;  %v2892_v61 = vand.u32 2147483647, %v6723_v52  ;;  %v2970_v53 = vpop.xlane.xlu2 %2969 }
 0x2eb   :  { %v2795_v18 = vsel %vm2794_vm2, %v7471_v10, %v2791_v37  ;;  %v2745_v3 = vmul.f32 %v7473_v6, %v2744_v19  ;;  %v2751_v30 = vand.u32 2147483647, %v7472_v36  ;;  %vm2747_vm4 = vweird.f32 %v7472_v36  ;;  %v2946_v36 = vpop.xlane.xlu0 %2945 }
 0x2ec   :  { %v6735_v2 = vsel %vm2797_vm3, %v2799_v17, %v2795_v18  ;;  %v2759_v16 = vsub.f32 1.0, %v2758_v4  ;;  %vm2763_vm5 = vweird.f32 %v7475_v15  ;;  %v2768_v56 = vand.u32 2147483648, %v7474_v48  ;;  %vm2749_vm6 = vmor %vm2747_vm4, %vm2748_vm1 }
 0x2ed   :  { %v2893_v24 = vand.u32 2147483647, %v6735_v2  ;;  %v2746_v57 = vadd.f32 %v7473_v6, %v2745_v3  ;;  %v6742_v10 = vmax.f32 %v2898_v34, 1e-12  ;;  %v2754_v60 = vor.u32 1.1754944e-38, %v2753_v25 }
 0x2ee   :  { %v6744_v49 = vpop.eup %4169  ;;  %v2760_v22 = vmul.f32 %v7475_v15, %v2759_v16  ;;  %v2766_v47 = vand.u32 2147483647, %v7474_v48  ;;  %v2803_v20 = vmul.f32 %v6447_v50, %v6398_v9  ;;  %vm2752_vm7 = vcmp.eq.f32.partialorder %v2751_v30, 8.507059e+37 }
 0x2ef   :  { %v2986_v14 = vadd.f32 %v2893_v24, %v2892_v61  ;;  %v2750_v39 = vsel %vm2749_vm6, %v7473_v6, %v2746_v57  ;;  %4171 = vrcp.f32 %v6742_v10  ;;  %vm2762_vm8 = vweird.f32 %v7474_v48 }
 0x2f0   :  { %v6754_v58 = vsel %vm2752_vm7, %v2754_v60, %v2750_v39  ;;  %v2761_v43 = vadd.f32 %v7475_v15, %v2760_v22  ;;  %vm2764_vm9 = vmor %vm2762_vm8, %vm2763_vm5  ;;  %v2769_v13 = vor.u32 1.1754944e-38, %v2768_v56  ;;  %v2804_v40 = vsub.f32 1.0, %v2803_v20  ;;  %v2922_v22 = vpop.xlane.xlu1 %2921 }
 0x2f1   :  { %7476 = vst [vmem:[#allocation27_spill] sm:$0xff] %v6754_v58  ;;  %2987 = vadd.xlane.f32.xlu2 %v2986_v14  ;;  %v2811_v12 = vand.u32 2147483647, %v6398_v9  ;;  %vm2767_vm10 = vcmp.eq.f32.partialorder %v2766_v47, 8.507059e+37  ;;  %v2890_v34 = vand.u32 2147483647, %v6754_v58  ;;  %vm2808_vm11 = vweird.f32 %v6447_v50 }
 0x2f2   :  { %v2765_v6 = vsel %vm2764_vm9, %v7475_v15, %v2761_v43  ;;  %v2813_v37 = vand.u32 2147483648, %v6398_v9  ;;  %v2805_v17 = vmul.f32 %v6447_v50, %v2804_v40  ;;  %v2818_v25 = vmul.f32 %v6744_v49, %v6420_v8  ;;  %v2901_v43 = vpop.xlane.xlu2 %2900 }
 0x2f3   :  { %v6764_v19 = vsel %vm2767_vm10, %v2769_v13, %v2765_v6  ;;  %vm2807_vm12 = vweird.f32 %v6398_v9  ;;  %vm6773_vm13 = vcmp.eq.f32.partialorder %v2811_v12, 8.507059e+37  ;;  %v2828_v24 = vand.u32 2147483648, %v6420_v8  ;;  %v2973_v6 = vpop.xlane.xlu0 %2972 }
 0x2f4   :  { %7477 = vst [vmem:[#allocation30_spill] sm:$0xff] %v6764_v19  ;;  %v2891_v48 = vand.u32 2147483647, %v6764_v19  ;;  %v2806_v15 = vadd.f32 %v6447_v50, %v2805_v17  ;;  %v2814_v61 = vor.u32 1.1754944e-38, %v2813_v37  ;;  %v2819_v3 = vsub.f32 1.0, %v2818_v25  ;;  %vm2809_vm14 = vmor %vm2807_vm12, %vm2808_vm11  ;;  %v7495_v19 = vld [vmem:[#allocation28_spill] sm:$0xff] }
 0x2f5   :  { %v4172_v4 = vpop.eup %4171  ;;  %v6779_v57 = vmax.f32 %v2970_v53, 1e-12  ;;  %vm2823_vm15 = vweird.f32 %v6744_v49  ;;  %v2826_v60 = vand.u32 2147483647, %v6420_v8  ;;  %v3033_v20 = vand.u32 2147483647, %v6742_v10 }
 0x2f6   :  { %v2983_v30 = vadd.f32 %v2891_v48, %v2890_v34  ;;  %v3025_v16 = vmul.f32 %v4172_v4, %v6742_v10  ;;  %v2810_v56 = vsel %vm2809_vm14, %v6447_v50, %v2806_v15  ;;  %v2820_v9 = vmul.f32 %v6744_v49, %v2819_v3 }
 0x2f7   :  { %v6788_v14 = vsel %vm6773_vm13, %v2814_v61, %v2810_v56  ;;  %4173 = vrcp.f32 %v6779_v57  ;;  %vm3030_vm0 = vweird.f32 %v4172_v4  ;;  %v3035_v50 = vand.u32 2147483648, %v6742_v10 }
 0x2f8   :  { %2984 = vadd.xlane.f32.xlu1 %v2983_v30  ;;  %v3026_v47 = vsub.f32 1.0, %v3025_v16  ;;  %7480 = vst [vmem:[#allocation34_spill] sm:$0xff] %v6788_v14  ;;  %v2821_v39 = vadd.f32 %v6744_v49, %v2820_v9  ;;  %vm2822_vm1 = vweird.f32 %v6420_v8  ;;  %v2829_v40 = vor.u32 1.1754944e-38, %v2828_v24  ;;  %v7482_v24 = vld [vmem:[#allocation13_spill] sm:$0xff]  ;;  %v7483_v9 = vld [vmem:[#allocation14_spill] sm:$0xff] }
 0x2f9   :  { %vm2824_vm2 = vmor %vm2822_vm1, %vm2823_vm15  ;;  %v6794_v12 = vmax.f32 %v2922_v22, 1e-12  ;;  %v6796_v53 = vmax.f32 %v2946_v36, 1e-12  ;;  %vm3029_vm3 = vweird.f32 %v6742_v10  ;;  %vm2827_vm4 = vcmp.eq.f32.partialorder %v2826_v60, 8.507059e+37 }
 0x2fa   :  { %v3027_v13 = vmul.f32 %v4172_v4, %v3026_v47  ;;  %v2825_v34 = vsel %vm2824_vm2, %v6744_v49, %v2821_v39  ;;  %v2894_v37 = vand.u32 2147483647, %v6788_v14  ;;  %vm3034_vm5 = vcmp.eq.f32.partialorder %v3033_v20, 8.507059e+37  ;;  %vm3031_vm6 = vmor %vm3029_vm3, %vm3030_vm0 }
 0x2fb   :  { %v6801_v25 = vsel %vm2827_vm4, %v2829_v40, %v2825_v34  ;;  %4175 = vrcp.f32 %v6794_v12  ;;  %v3036_v8 = vor.u32 1.1754944e-38, %v3035_v50  ;;  %v6807_v48 = vmax.f32 %v2973_v6, 1e-12 }
 0x2fc   :  { %v3028_v17 = vadd.f32 %v4172_v4, %v3027_v13  ;;  %7481 = vst [vmem:[#allocation35_spill] sm:$0xff] %v6801_v25  ;;  %v2895_v36 = vand.u32 2147483647, %v6801_v25  ;;  %4177 = vrcp.f32 %v6796_v53  ;;  %v3417_v15 = vand.u32 2147483647, %v6779_v57  ;;  %v7491_v25 = vld [vmem:[#allocation16_spill] sm:$0xff] }
 0x2fd   :  { %v4174_v10 = vpop.eup %4173  ;;  %v3419_v18 = vand.u32 2147483648, %v6779_v57  ;;  %v6811_v61 = vmax.f32 %v2901_v43, 1e-12  ;;  %v3161_v22 = vand.u32 2147483647, %v6794_v12  ;;  %v3163_v47 = vand.u32 2147483648, %v6794_v12 }
 0x2fe   :  { %v3032_v49 = vsel %vm3031_vm6, %v4172_v4, %v3028_v17  ;;  %v2989_v30 = vadd.f32 %v2895_v36, %v2894_v37  ;;  %v3409_v16 = vmul.f32 %v4174_v10, %v6779_v57  ;;  %v3289_v20 = vand.u32 2147483647, %v6796_v53  ;;  %v2925_v37 = vpop.xlane.xlu2 %2924 }
 0x2ff   :  { %v3037_v3 = vsel %vm3034_vm5, %v3036_v8, %v3032_v49  ;;  %v3291_v50 = vand.u32 2147483648, %v6796_v53  ;;  %4179 = vrcp.f32 %v6807_v48  ;;  %vm3413_vm7 = vweird.f32 %v6779_v57 }
 0x300   :  { %v3038_v56 = vmul.f32 %v3037_v3, %v7482_v24  ;;  %v3039_v60 = vmul.f32 %v3037_v3, %v7483_v9  ;;  %2990 = vadd.xlane.f32.xlu0 %v2989_v30  ;;  %v3410_v4 = vsub.f32 1.0, %v3409_v16  ;;  %vm6822_vm8 = vcmp.eq.f32.partialorder %v3417_v15, 8.507059e+37 }
 0x301   :  { %v4176_v39 = vpop.eup %4175  ;;  %v3420_v13 = vor.u32 1.1754944e-38, %v3419_v18  ;;  %4181 = vrcp.f32 %v6811_v61  ;;  %vm3414_vm9 = vweird.f32 %v4174_v10  ;;  %vm3157_vm10 = vweird.f32 %v6794_v12 }
 0x302   :  { %3536 = vst [vmem:[#allocation9] sm:$0xff] %v3038_v56  ;;  %v4178_v40 = vpop.eup %4177  ;;  %v3411_v6 = vmul.f32 %v4174_v10, %v3410_v4  ;;  %v3153_v34 = vmul.f32 %v4176_v39, %v6794_v12  ;;  %vm6829_vm11 = vcmp.eq.f32.partialorder %v3161_v22, 8.507059e+37  ;;  %v3164_v8 = vor.u32 1.1754944e-38, %v3163_v47  ;;  %vm3415_vm14 = vmor %vm3413_vm7, %vm3414_vm9  ;;  %v2949_v47 = vpop.xlane.xlu1 %2948 }
 0x303   :  { %3537 = vst [vmem:[#allocation9 + $0x8] sm:$0xff] %v3039_v60  ;;  %v3281_v36 = vmul.f32 %v4178_v40, %v6796_v53  ;;  %vm3285_vm12 = vweird.f32 %v6796_v53  ;;  %vm6835_vm13 = vcmp.eq.f32.partialorder %v3289_v20, 8.507059e+37  ;;  %v3292_v3 = vor.u32 1.1754944e-38, %v3291_v50 }
 0x304   :  { %v3412_v49 = vadd.f32 %v4174_v10, %v3411_v6  ;;  %v3154_v15 = vsub.f32 1.0, %v3153_v34  ;;  %v3433_v16 = vand.u32 2147483647, %v6807_v48  ;;  %v3435_v24 = vand.u32 2147483648, %v6807_v48  ;;  %v7490_v34 = vld [vmem:[#allocation15_spill] sm:$0xff] }
 0x305   :  { %v3282_v30 = vsub.f32 1.0, %v3281_v36  ;;  %v6843_v56 = vmax.f32 %v2925_v37, 1e-12  ;;  %v4180_v9 = vpop.eup %4179  ;;  %vm3158_vm15 = vweird.f32 %v4176_v39  ;;  %vm3286_vm0 = vweird.f32 %v4178_v40 }
 0x306   :  { %v3416_v60 = vsel %vm3415_vm14, %v4174_v10, %v3412_v49  ;;  %v3155_v22 = vmul.f32 %v4176_v39, %v3154_v15  ;;  %v3425_v57 = vmul.f32 %v4180_v9, %v6807_v48  ;;  %v3049_v6 = vand.u32 2147483647, %v6811_v61  ;;  %vm3159_vm1 = vmor %vm3157_vm10, %vm3158_vm15 }
 0x307   :  { %v4182_v4 = vpop.eup %4181  ;;  %v3421_v20 = vsel %vm6822_vm8, %v3420_v13, %v3416_v60  ;;  %v3283_v50 = vmul.f32 %v4178_v40, %v3282_v30  ;;  %v3051_v43 = vand.u32 2147483648, %v6811_v61  ;;  %4183 = vrcp.f32 %v6843_v56  ;;  %vm3287_vm2 = vmor %vm3285_vm12, %vm3286_vm0 }
 0x308   :  { %v3422_v36 = vmul.f32 %v3421_v20, %v7490_v34  ;;  %v3423_v37 = vmul.f32 %v3421_v20, %v7491_v25  ;;  %v3156_v14 = vadd.f32 %v4176_v39, %v3155_v22  ;;  %v3041_v10 = vmul.f32 %v4182_v4, %v6811_v61  ;;  %v7492_v20 = vld [vmem:[#allocation18_spill] sm:$0xff] }
 0x309   :  { %v3284_v49 = vadd.f32 %v4178_v40, %v3283_v50  ;;  %v3426_v15 = vsub.f32 1.0, %v3425_v57  ;;  %vm3430_vm3 = vweird.f32 %v4180_v9  ;;  %v6859_v30 = vmax.f32 %v2949_v47, 1e-12  ;;  %v7493_v57 = vld [vmem:[#allocation19_spill] sm:$0xff] }
 0x30a   :  { %3584 = vst [vmem:[#allocation9 + $0x180] sm:$0xff] %v3422_v36  ;;  %v3160_v13 = vsel %vm3159_vm1, %v4176_v39, %v3156_v14  ;;  %v3042_v25 = vsub.f32 1.0, %v3041_v10  ;;  %vm3046_vm4 = vweird.f32 %v4182_v4  ;;  %v2928_v39 = vpop.xlane.xlu0 %2927  ;;  %v2952_v36 = vpop.xlane.xlu2 %2951  ;;  %v7494_v10 = vld [vmem:[#allocation24_spill] sm:$0xff]  ;;  %vm3429_vm5 = vweird.f32 %v6807_v48 }
 0x30b   :  { %3585 = vst [vmem:[#allocation9 + $0x188] sm:$0xff] %v3423_v37  ;;  %v3165_v12 = vsel %vm6829_vm11, %v3164_v8, %v3160_v13  ;;  %v3288_v60 = vsel %vm3287_vm2, %v4178_v40, %v3284_v49  ;;  %v3427_v22 = vmul.f32 %v4180_v9, %v3426_v15  ;;  %vm3431_vm6 = vmor %vm3429_vm5, %vm3430_vm3  ;;  %v3436_v40 = vor.u32 1.1754944e-38, %v3435_v24  ;;  %v2904_v15 = vpop.xlane.xlu1 %2903 }
 0x30c   :  { %v3166_v50 = vmul.f32 %v3165_v12, %v7492_v20  ;;  %v3167_v34 = vmul.f32 %v3165_v12, %v7493_v57  ;;  %v3293_v14 = vsel %vm6835_vm13, %v3292_v3, %v3288_v60  ;;  %v3043_v53 = vmul.f32 %v4182_v4, %v3042_v25  ;;  %v7497_v25 = vld [vmem:[#allocation36_spill] sm:$0xff] }
 0x30d   :  { %v3294_v47 = vmul.f32 %v3293_v14, %v7494_v10  ;;  %v3295_v37 = vmul.f32 %v3293_v14, %v7495_v19  ;;  %v3428_v58 = vadd.f32 %v4180_v9, %v3427_v22  ;;  %vm3045_vm7 = vweird.f32 %v6811_v61  ;;  %v4184_v8 = vpop.eup %4183  ;;  %v7496_v61 = vld [vmem:[#allocation32_spill] sm:$0xff] }
 0x30e   :  { %3552 = vst [vmem:[#allocation9 + $0x80] sm:$0xff] %v3166_v50  ;;  %v3044_v17 = vadd.f32 %v4182_v4, %v3043_v53  ;;  %4185 = vrcp.f32 %v6859_v30  ;;  %vm3434_vm8 = vcmp.eq.f32.partialorder %v3433_v16, 8.507059e+37  ;;  %vm3047_vm9 = vmor %vm3045_vm7, %vm3046_vm4  ;;  %v3052_v3 = vor.u32 1.1754944e-38, %v3051_v43  ;;  %v7498_v16 = vld [vmem:[#allocation38_spill] sm:$0xff]  ;;  %v7499_v43 = vld [vmem:[#allocation39_spill] sm:$0xff] }
 0x30f   :  { %3553 = vst [vmem:[#allocation9 + $0x88] sm:$0xff] %v3167_v34  ;;  %v3432_v18 = vsel %vm3431_vm6, %v4180_v9, %v3428_v58  ;;  %v6874_v19 = vmax.f32 %v2928_v39, 1e-12  ;;  %vm3050_vm10 = vcmp.eq.f32.partialorder %v3049_v6, 8.507059e+37  ;;  %v3169_v24 = vmul.f32 %v4184_v8, %v6843_v56 }
 0x310   :  { %3568 = vst [vmem:[#allocation9 + $0x100] sm:$0xff] %v3294_v47  ;;  %v3437_v48 = vsel %vm3434_vm8, %v3436_v40, %v3432_v18  ;;  %v3048_v49 = vsel %vm3047_vm9, %v4182_v4, %v3044_v17  ;;  %v3177_v58 = vand.u32 2147483647, %v6843_v56  ;;  %v3179_v4 = vand.u32 2147483648, %v6843_v56 }
 0x311   :  { %3569 = vst [vmem:[#allocation9 + $0x108] sm:$0xff] %v3295_v37  ;;  %v3438_v13 = vmul.f32 %v3437_v48, %v7496_v61  ;;  %v3439_v12 = vmul.f32 %v3437_v48, %v7497_v25  ;;  %v3053_v60 = vsel %vm3050_vm10, %v3052_v3, %v3048_v49  ;;  %v3170_v20 = vsub.f32 1.0, %v3169_v24 }
 0x312   :  { %v3054_v9 = vmul.f32 %v3053_v60, %v7498_v16  ;;  %v3055_v22 = vmul.f32 %v3053_v60, %v7499_v43  ;;  %v3305_v6 = vand.u32 2147483647, %v6859_v30  ;;  %v3307_v50 = vand.u32 2147483648, %v6859_v30 }
 0x313   :  { %3586 = vst [vmem:[#allocation9 + $0x190] sm:$0xff] %v3438_v13  ;;  %4187 = vrcp.f32 %v6874_v19  ;;  %v3171_v34 = vmul.f32 %v4184_v8, %v3170_v20  ;;  %vm3174_vm11 = vweird.f32 %v4184_v8  ;;  %v6886_v14 = vmax.f32 %v2952_v36, 1e-12  ;;  %v2907_v36 = vpop.xlane.xlu2 %2906  ;;  %v7504_v13 = vld [vmem:[#allocation40_spill] sm:$0xff] }
 0x314   :  { %v4186_v57 = vpop.eup %4185  ;;  %3587 = vst [vmem:[#allocation9 + $0x198] sm:$0xff] %v3439_v12  ;;  %v6888_v53 = vmax.f32 %v2904_v15, 1e-12  ;;  %vm3173_vm12 = vweird.f32 %v6843_v56  ;;  %vm6891_vm13 = vcmp.eq.f32.partialorder %v3177_v58, 8.507059e+37  ;;  %v3193_v37 = vand.u32 2147483647, %v6874_v19 }
 0x315   :  { %3538 = vst [vmem:[#allocation9 + $0x10] sm:$0xff] %v3054_v9  ;;  %v3297_v10 = vmul.f32 %v4186_v57, %v6859_v30  ;;  %v3172_v47 = vadd.f32 %v4184_v8, %v3171_v34  ;;  %v3195_v40 = vand.u32 2147483648, %v6874_v19  ;;  %4189 = vrcp.f32 %v6886_v14  ;;  %vm3175_vm14 = vmor %vm3173_vm12, %vm3174_vm11  ;;  %v7505_v12 = vld [vmem:[#allocation43_spill] sm:$0xff]  ;;  %v2976_v9 = vpop.xlane.xlu1 %2975 }
 0x316   :  { %3539 = vst [vmem:[#allocation9 + $0x18] sm:$0xff] %v3055_v22  ;;  %v3180_v17 = vor.u32 1.1754944e-38, %v3179_v4  ;;  %vm3301_vm15 = vweird.f32 %v6859_v30  ;;  %4191 = vrcp.f32 %v6888_v53  ;;  %vm6901_vm0 = vcmp.eq.f32.partialorder %v3305_v6, 8.507059e+37 }
 0x317   :  { %v3298_v18 = vsub.f32 1.0, %v3297_v10  ;;  %v3176_v56 = vsel %vm3175_vm14, %v4184_v8, %v3172_v47  ;;  %v3308_v48 = vor.u32 1.1754944e-38, %v3307_v50  ;;  %vm3189_vm1 = vweird.f32 %v6874_v19 }
 0x318   :  { %v3181_v24 = vsel %vm6891_vm13, %v3180_v17, %v3176_v56  ;;  %vm3302_vm2 = vweird.f32 %v4186_v57  ;;  %v6908_v61 = vmax.f32 %v2907_v36, 1e-12  ;;  %vm6913_vm3 = vcmp.eq.f32.partialorder %v3193_v37, 8.507059e+37 }
 0x319   :  { %v4188_v49 = vpop.eup %4187  ;;  %v3299_v15 = vmul.f32 %v4186_v57, %v3298_v18  ;;  %v3182_v25 = vmul.f32 %v3181_v24, %v7504_v13  ;;  %v3183_v60 = vmul.f32 %v3181_v24, %v7505_v12  ;;  %v3196_v16 = vor.u32 1.1754944e-38, %v3195_v40  ;;  %vm3303_vm5 = vmor %vm3301_vm15, %vm3302_vm2  ;;  %v2955_v40 = vpop.xlane.xlu0 %2954  ;;  %v7508_v18 = vld [vmem:[#allocation44_spill] sm:$0xff]  ;;  %v7509_v24 = vld [vmem:[#allocation45_spill] sm:$0xff] }
 0x31a   :  { %v3185_v8 = vmul.f32 %v4188_v49, %v6874_v19  ;;  %vm3317_vm4 = vweird.f32 %v6886_v14  ;;  %v3321_v22 = vand.u32 2147483647, %v6886_v14  ;;  %4193 = vrcp.f32 %v6908_v61 }
 0x31b   :  { %v3300_v43 = vadd.f32 %v4186_v57, %v3299_v15  ;;  %v4190_v20 = vpop.eup %4189  ;;  %3554 = vst [vmem:[#allocation9 + $0x90] sm:$0xff] %v3182_v25  ;;  %v3323_v6 = vand.u32 2147483648, %v6886_v14  ;;  %vm3061_vm6 = vweird.f32 %v6888_v53  ;;  %v3065_v50 = vand.u32 2147483647, %v6888_v53 }
 0x31c   :  { %v3186_v4 = vsub.f32 1.0, %v3185_v8  ;;  %v4192_v34 = vpop.eup %4191  ;;  %3555 = vst [vmem:[#allocation9 + $0x98] sm:$0xff] %v3183_v60  ;;  %v3313_v10 = vmul.f32 %v4190_v20, %v6886_v14  ;;  %v3067_v47 = vand.u32 2147483648, %v6888_v53  ;;  %v6927_v37 = vmax.f32 %v2976_v9, 1e-12 }
 0x31d   :  { %v3304_v39 = vsel %vm3303_vm5, %v4186_v57, %v3300_v43  ;;  %vm3190_vm7 = vweird.f32 %v4188_v49  ;;  %v3057_v17 = vmul.f32 %v4192_v34, %v6888_v53  ;;  %vm6934_vm8 = vcmp.eq.f32.partialorder %v3321_v22, 8.507059e+37 }
 0x31e   :  { %v3309_v30 = vsel %vm6901_vm0, %v3308_v48, %v3304_v39  ;;  %v3187_v36 = vmul.f32 %v4188_v49, %v3186_v4  ;;  %v3314_v13 = vsub.f32 1.0, %v3313_v10  ;;  %v3324_v12 = vor.u32 1.1754944e-38, %v3323_v6  ;;  %vm3191_vm9 = vmor %vm3189_vm1, %vm3190_vm7  ;;  %v2979_v10 = vpop.xlane.xlu2 %2978 }
 0x31f   :  { %v3310_v56 = vmul.f32 %v3309_v30, %v7508_v18  ;;  %v3311_v15 = vmul.f32 %v3309_v30, %v7509_v24  ;;  %v3058_v60 = vsub.f32 1.0, %v3057_v17  ;;  %4195 = vrcp.f32 %v6927_v37 }
 0x320   :  { %v3188_v25 = vadd.f32 %v4188_v49, %v3187_v36  ;;  %v4194_v3 = vpop.eup %4193  ;;  %v3315_v48 = vmul.f32 %v4190_v20, %v3314_v13  ;;  %vm3318_vm10 = vweird.f32 %v4190_v20  ;;  %vm6941_vm11 = vcmp.eq.f32.partialorder %v3065_v50, 8.507059e+37  ;;  %v7514_v50 = vld [vmem:[#allocation46_spill] sm:$0xff]  ;;  %v7515_v36 = vld [vmem:[#allocation49_spill] sm:$0xff] }
 0x321   :  { %3570 = vst [vmem:[#allocation9 + $0x110] sm:$0xff] %v3310_v56  ;;  %v3068_v9 = vor.u32 1.1754944e-38, %v3067_v47  ;;  %v3059_v22 = vmul.f32 %v4192_v34, %v3058_v60  ;;  %vm3062_vm12 = vweird.f32 %v4192_v34  ;;  %v3073_v4 = vmul.f32 %v4194_v3, %v6908_v61  ;;  %vm3319_vm14 = vmor %vm3317_vm4, %vm3318_vm10 }
 0x322   :  { %3571 = vst [vmem:[#allocation9 + $0x118] sm:$0xff] %v3311_v15  ;;  %v3192_v43 = vsel %vm3191_vm9, %v4188_v49, %v3188_v25  ;;  %v3316_v39 = vadd.f32 %v4190_v20, %v3315_v48  ;;  %vm3077_vm13 = vweird.f32 %v6908_v61  ;;  %v3081_v19 = vand.u32 2147483647, %v6908_v61  ;;  %vm3063_vm15 = vmor %vm3061_vm6, %vm3062_vm12  ;;  %v2931_v25 = vpop.xlane.xlu1 %2930 }
 0x323   :  { %v3197_v6 = vsel %vm6913_vm3, %v3196_v16, %v3192_v43  ;;  %v3060_v49 = vadd.f32 %v4192_v34, %v3059_v22  ;;  %v3074_v47 = vsub.f32 1.0, %v3073_v4  ;;  %vm3078_vm0 = vweird.f32 %v4194_v3  ;;  %v2910_v43 = vpop.xlane.xlu0 %2909 }
 0x324   :  { %v3198_v30 = vmul.f32 %v3197_v6, %v7514_v50  ;;  %v3199_v17 = vmul.f32 %v3197_v6, %v7515_v36  ;;  %v3320_v18 = vsel %vm3319_vm14, %v4190_v20, %v3316_v39  ;;  %v3083_v58 = vand.u32 2147483648, %v6908_v61  ;;  %v7516_v20 = vld [vmem:[#allocation50_spill] sm:$0xff]  ;;  %vm3079_vm2 = vmor %vm3077_vm13, %vm3078_vm0 }
 0x325   :  { %v6958_v16 = vmax.f32 %v2955_v40, 1e-12  ;;  %v4196_v56 = vpop.eup %4195  ;;  %v3325_v24 = vsel %vm6934_vm8, %v3324_v12, %v3320_v18  ;;  %v3064_v15 = vsel %vm3063_vm15, %v4192_v34, %v3060_v49  ;;  %v3075_v13 = vmul.f32 %v4194_v3, %v3074_v47 }
 0x326   :  { %3556 = vst [vmem:[#allocation9 + $0xa0] sm:$0xff] %v3198_v30  ;;  %v6962_v14 = vmax.f32 %v2979_v10, 1e-12  ;;  %v3326_v60 = vmul.f32 %v3325_v24, %v7516_v20  ;;  %v3327_v53 = vmul.f32 %v3325_v24, %v5982_v45  ;;  %v3069_v48 = vsel %vm6941_vm11, %v3068_v9, %v3064_v15 }
 0x327   :  { %3557 = vst [vmem:[#allocation9 + $0xa8] sm:$0xff] %v3199_v17  ;;  %v3441_v40 = vmul.f32 %v4196_v56, %v6927_v37  ;;  %v3070_v22 = vmul.f32 %v3069_v48, %v5993_v63  ;;  %v3071_v57 = vmul.f32 %v3069_v48, %v6004_v29  ;;  %v3076_v34 = vadd.f32 %v4194_v3, %v3075_v13  ;;  %v2934_v13 = vpop.xlane.xlu2 %2933 }
 0x328   :  { %vm3082_vm1 = vcmp.eq.f32.partialorder %v3081_v19, 8.507059e+37  ;;  %3572 = vst [vmem:[#allocation9 + $0x120] sm:$0xff] %v3326_v60  ;;  %v3084_v12 = vor.u32 1.1754944e-38, %v3083_v58  ;;  %4197 = vrcp.f32 %v6958_v16  ;;  %v6975_v45 = vmax.f32 %v2931_v25, 1e-12  ;;  %v7517_v19 = vld [vmem:[#allocation54_spill] sm:$0xff] }
 0x329   :  { %v3442_v4 = vsub.f32 1.0, %v3441_v40  ;;  %3573 = vst [vmem:[#allocation9 + $0x128] sm:$0xff] %v3327_v53  ;;  %v3080_v8 = vsel %vm3079_vm2, %v4194_v3, %v3076_v34  ;;  %v3451_v9 = vand.u32 2147483648, %v6927_v37  ;;  %4199 = vrcp.f32 %v6962_v14  ;;  %v7520_v60 = vld [vmem:[#allocation55_spill] sm:$0xff] }
 0x32a   :  { %v6979_v63 = vmax.f32 %v2910_v43, 1e-12  ;;  %3540 = vst [vmem:[#allocation9 + $0x20] sm:$0xff] %v3070_v22  ;;  %v3085_v29 = vsel %vm3082_vm1, %v3084_v12, %v3080_v8  ;;  %vm3446_vm3 = vweird.f32 %v4196_v56  ;;  %v3449_v61 = vand.u32 2147483647, %v6927_v37  ;;  %v2958_v25 = vpop.xlane.xlu1 %2957 }
 0x32b   :  { %v3443_v6 = vmul.f32 %v4196_v56, %v3442_v4  ;;  %3541 = vst [vmem:[#allocation9 + $0x28] sm:$0xff] %v3071_v57  ;;  %v3086_v39 = vmul.f32 %v3085_v29, %v6039_v44  ;;  %v3087_v10 = vmul.f32 %v3085_v29, %v7517_v19  ;;  %v3337_v50 = vand.u32 2147483647, %v6958_v16  ;;  %v2982_v19 = vpop.xlane.xlu0 %2981 }
 0x32c   :  { %v3339_v3 = vand.u32 2147483648, %v6958_v16  ;;  %vm3445_vm4 = vweird.f32 %v6927_v37  ;;  %v3465_v36 = vand.u32 2147483647, %v6962_v14  ;;  %4201 = vrcp.f32 %v6975_v45 }
 0x32d   :  { %v3444_v30 = vadd.f32 %v4196_v56, %v3443_v6  ;;  %3542 = vst [vmem:[#allocation9 + $0x30] sm:$0xff] %v3086_v39  ;;  %vm3447_vm5 = vmor %vm3445_vm4, %vm3446_vm3  ;;  %v3452_v17 = vor.u32 1.1754944e-38, %v3451_v9  ;;  %v3467_v49 = vand.u32 2147483648, %v6962_v14  ;;  %4203 = vrcp.f32 %v6979_v63 }
 0x32e   :  { %v4198_v44 = vpop.eup %4197  ;;  %3543 = vst [vmem:[#allocation9 + $0x38] sm:$0xff] %v3087_v10  ;;  %vm3450_vm6 = vcmp.eq.f32.partialorder %v3449_v61, 8.507059e+37  ;;  %vm3333_vm7 = vweird.f32 %v6958_v16  ;;  %vm3461_vm8 = vweird.f32 %v6962_v14  ;;  %vm6994_vm9 = vcmp.eq.f32.partialorder %v3337_v50, 8.507059e+37 }
 0x32f   :  { %v3448_v47 = vsel %vm3447_vm5, %v4196_v56, %v3444_v30  ;;  %v4200_v37 = vpop.eup %4199  ;;  %v3329_v58 = vmul.f32 %v4198_v44, %v6958_v16  ;;  %v3340_v15 = vor.u32 1.1754944e-38, %v3339_v3  ;;  %vm7001_vm10 = vcmp.eq.f32.partialorder %v3465_v36, 8.507059e+37  ;;  %v7525_v16 = vld [vmem:[#allocation56_spill] sm:$0xff]  ;;  %v7533_v3 = vld [vmem:[#allocation22_spill] sm:$0xff] }
 0x330   :  { %v3453_v18 = vsel %vm3450_vm6, %v3452_v17, %v3448_v47  ;;  %v3457_v53 = vmul.f32 %v4200_v37, %v6962_v14  ;;  %v3468_v43 = vor.u32 1.1754944e-38, %v3467_v49  ;;  %vm3205_vm11 = vweird.f32 %v6975_v45 }
 0x331   :  { %v3454_v20 = vmul.f32 %v3453_v18, %v6084_v21  ;;  %v3455_v56 = vmul.f32 %v3453_v18, %v7520_v60  ;;  %v3330_v40 = vsub.f32 1.0, %v3329_v58  ;;  %v3209_v22 = vand.u32 2147483647, %v6975_v45 }
 0x332   :  { %v3211_v57 = vand.u32 2147483648, %v6975_v45  ;;  %v4202_v34 = vpop.eup %4201  ;;  %v3458_v12 = vsub.f32 1.0, %v3457_v53  ;;  %vm3093_vm12 = vweird.f32 %v6979_v63  ;;  %v7009_v21 = vmax.f32 %v2934_v13, 1e-12 }
 0x333   :  { %3588 = vst [vmem:[#allocation9 + $0x1a0] sm:$0xff] %v3454_v20  ;;  %v7011_v4 = vmax.f32 %v2958_v25, 1e-12  ;;  %v4204_v8 = vpop.eup %4203  ;;  %v3331_v9 = vmul.f32 %v4198_v44, %v3330_v40  ;;  %vm3334_vm13 = vweird.f32 %v4198_v44  ;;  %v3201_v29 = vmul.f32 %v4202_v34, %v6975_v45 }
 0x334   :  { %3589 = vst [vmem:[#allocation9 + $0x1a8] sm:$0xff] %v3455_v56  ;;  %v3097_v6 = vand.u32 2147483647, %v6979_v63  ;;  %v3459_v61 = vmul.f32 %v4200_v37, %v3458_v12  ;;  %vm3462_vm14 = vweird.f32 %v4200_v37  ;;  %v3089_v39 = vmul.f32 %v4204_v8, %v6979_v63  ;;  %vm3335_vm0 = vmor %vm3333_vm7, %vm3334_vm13  ;;  %v7526_v56 = vld [vmem:[#allocation17_spill] sm:$0xff] }
 0x335   :  { %4205 = vrcp.f32 %v7009_v21  ;;  %v3332_v10 = vadd.f32 %v4198_v44, %v3331_v9  ;;  %v3202_v50 = vsub.f32 1.0, %v3201_v29  ;;  %vm7017_vm15 = vcmp.eq.f32.partialorder %v3209_v22, 8.507059e+37  ;;  %vm3463_vm1 = vmor %vm3461_vm8, %vm3462_vm14  ;;  %v7527_v22 = vld [vmem:[#allocation21_spill] sm:$0xff] }
 0x336   :  { %v3099_v30 = vand.u32 2147483648, %v6979_v63  ;;  %v3460_v36 = vadd.f32 %v4200_v37, %v3459_v61  ;;  %v3212_v17 = vor.u32 1.1754944e-38, %v3211_v57  ;;  %v3090_v49 = vsub.f32 1.0, %v3089_v39  ;;  %v7528_v12 = vld [vmem:[#allocation57_spill] sm:$0xff]  ;;  %v7531_v63 = vld [vmem:[#allocation20_spill] sm:$0xff] }
 0x337   :  { %4207 = vrcp.f32 %v7011_v4  ;;  %v3336_v47 = vsel %vm3335_vm0, %v4198_v44, %v3332_v10  ;;  %v3203_v18 = vmul.f32 %v4202_v34, %v3202_v50  ;;  %vm3206_vm2 = vweird.f32 %v4202_v34 }
 0x338   :  { %v7027_v58 = vmax.f32 %v2982_v19, 1e-12  ;;  %v3341_v13 = vsel %vm6994_vm9, %v3340_v15, %v3336_v47  ;;  %v3464_v25 = vsel %vm3463_vm1, %v4200_v37, %v3460_v36  ;;  %v3091_v20 = vmul.f32 %v4204_v8, %v3090_v49  ;;  %vm3207_vm4 = vmor %vm3205_vm11, %vm3206_vm2  ;;  %v7532_v36 = vld [vmem:[#allocation23_spill] sm:$0xff]  ;;  %v2913_v47 = vpop.xlane.xlu1 %2912 }
 0x339   :  { %vm3094_vm3 = vweird.f32 %v4204_v8  ;;  %v3342_v60 = vmul.f32 %v3341_v13, %v7525_v16  ;;  %v3343_v53 = vmul.f32 %v3341_v13, %v7526_v56  ;;  %v3469_v44 = vsel %vm7001_vm10, %v3468_v43, %v3464_v25  ;;  %v2937_v16 = vpop.xlane.xlu0 %2936 }
 0x33a   :  { %v3204_v40 = vadd.f32 %v4202_v34, %v3203_v18  ;;  %v3470_v57 = vmul.f32 %v3469_v44, %v7527_v22  ;;  %v3471_v9 = vmul.f32 %v3469_v44, %v7528_v12  ;;  %v3092_v24 = vadd.f32 %v4204_v8, %v3091_v20  ;;  %vm3095_vm6 = vmor %vm3093_vm12, %vm3094_vm3 }
 0x33b   :  { %v4206_v14 = vpop.eup %4205  ;;  %vm7039_vm5 = vcmp.eq.f32.partialorder %v3097_v6, 8.507059e+37  ;;  %3574 = vst [vmem:[#allocation9 + $0x130] sm:$0xff] %v3342_v60  ;;  %v3100_v48 = vor.u32 1.1754944e-38, %v3099_v30  ;;  %v3225_v29 = vand.u32 2147483647, %v7009_v21  ;;  %v3227_v6 = vand.u32 2147483648, %v7009_v21  ;;  %v2961_v30 = vpop.xlane.xlu2 %2960 }
 0x33c   :  { %v3208_v15 = vsel %vm3207_vm4, %v4202_v34, %v3204_v40  ;;  %v3217_v43 = vmul.f32 %v4206_v14, %v7009_v21  ;;  %3575 = vst [vmem:[#allocation9 + $0x138] sm:$0xff] %v3343_v53  ;;  %v3096_v39 = vsel %vm3095_vm6, %v4204_v8, %v3092_v24  ;;  %4209 = vrcp.f32 %v7027_v58 }
 0x33d   :  { %v4208_v61 = vpop.eup %4207  ;;  %v3213_v45 = vsel %vm7017_vm15, %v3212_v17, %v3208_v15  ;;  %3590 = vst [vmem:[#allocation9 + $0x1b0] sm:$0xff] %v3470_v57  ;;  %v3101_v10 = vsel %vm7039_vm5, %v3100_v48, %v3096_v39  ;;  %vm3222_vm7 = vweird.f32 %v4206_v14  ;;  %vm3221_vm8 = vweird.f32 %v7009_v21  ;;  %v7536_v48 = vld [vmem:[#allocation26_spill] sm:$0xff] }
 0x33e   :  { %v3214_v34 = vmul.f32 %v3213_v45, %v6219_v51  ;;  %v3215_v19 = vmul.f32 %v3213_v45, %v7531_v63  ;;  %v3218_v50 = vsub.f32 1.0, %v3217_v43  ;;  %3591 = vst [vmem:[#allocation9 + $0x1b8] sm:$0xff] %v3471_v9  ;;  %v3102_v49 = vmul.f32 %v3101_v10, %v7532_v36  ;;  %vm3223_vm11 = vmor %vm3221_vm8, %vm3222_vm7 }
 0x33f   :  { %v3103_v17 = vmul.f32 %v3101_v10, %v7533_v3  ;;  %v3345_v8 = vmul.f32 %v4208_v61, %v7011_v4  ;;  %v3355_v51 = vand.u32 2147483648, %v7011_v4  ;;  %vm7060_vm9 = vcmp.eq.f32.partialorder %v3225_v29, 8.507059e+37  ;;  %v7537_v29 = vld [vmem:[#allocation25_spill] sm:$0xff] }
 0x340   :  { %3558 = vst [vmem:[#allocation9 + $0xb0] sm:$0xff] %v3214_v34  ;;  %v3219_v18 = vmul.f32 %v4206_v14, %v3218_v50  ;;  %v7064_v20 = vmax.f32 %v2961_v30, 1e-12  ;;  %v3228_v56 = vor.u32 1.1754944e-38, %v3227_v6  ;;  %vm3349_vm10 = vweird.f32 %v7011_v4 }
 0x341   :  { %3559 = vst [vmem:[#allocation9 + $0xb8] sm:$0xff] %v3215_v19  ;;  %v3346_v25 = vsub.f32 1.0, %v3345_v8  ;;  %v7067_v53 = vmax.f32 %v2913_v47, 1e-12  ;;  %vm3350_vm12 = vweird.f32 %v4208_v61  ;;  %v3353_v40 = vand.u32 2147483647, %v7011_v4 }
 0x342   :  { %3544 = vst [vmem:[#allocation9 + $0x40] sm:$0xff] %v3102_v49  ;;  %v3220_v60 = vadd.f32 %v4206_v14, %v3219_v18  ;;  %v4210_v44 = vpop.eup %4209  ;;  %4211 = vrcp.f32 %v7064_v20  ;;  %v3356_v57 = vor.u32 1.1754944e-38, %v3355_v51  ;;  %v7073_v9 = vmax.f32 %v2937_v16, 1e-12  ;;  %vm3351_vm13 = vmor %vm3349_vm10, %vm3350_vm12  ;;  %v2940_v13 = vpop.xlane.xlu1 %2939 }
 0x343   :  { %3545 = vst [vmem:[#allocation9 + $0x48] sm:$0xff] %v3103_v17  ;;  %v3347_v21 = vmul.f32 %v4208_v61, %v3346_v25  ;;  %v3473_v12 = vmul.f32 %v4210_v44, %v7027_v58  ;;  %v3481_v15 = vand.u32 2147483647, %v7027_v58  ;;  %4213 = vrcp.f32 %v7067_v53  ;;  %v2916_v19 = vpop.xlane.xlu2 %2915 }
 0x344   :  { %v3224_v22 = vsel %vm3223_vm11, %v4206_v14, %v3220_v60  ;;  %v3483_v39 = vand.u32 2147483648, %v7027_v58  ;;  %vm3354_vm14 = vcmp.eq.f32.partialorder %v3353_v40, 8.507059e+37  ;;  %vm3478_vm15 = vweird.f32 %v4210_v44  ;;  %v7538_v60 = vld [vmem:[#allocation29_spill] sm:$0xff] }
 0x345   :  { %v3229_v24 = vsel %vm7060_vm9, %v3228_v56, %v3224_v22  ;;  %v3348_v37 = vadd.f32 %v4208_v61, %v3347_v21  ;;  %v3474_v14 = vsub.f32 1.0, %v3473_v12  ;;  %4215 = vrcp.f32 %v7073_v9 }
 0x346   :  { %v3230_v43 = vmul.f32 %v3229_v24, %v7536_v48  ;;  %v3231_v45 = vmul.f32 %v3229_v24, %v7537_v29  ;;  %vm3477_vm0 = vweird.f32 %v7027_v58  ;;  %vm3482_vm1 = vcmp.eq.f32.partialorder %v3481_v15, 8.507059e+37 }
 0x347   :  { %v3352_v6 = vsel %vm3351_vm13, %v4208_v61, %v3348_v37  ;;  %v3475_v63 = vmul.f32 %v4210_v44, %v3474_v14  ;;  %v3484_v36 = vor.u32 1.1754944e-38, %v3483_v39  ;;  %vm3479_vm2 = vmor %vm3477_vm0, %vm3478_vm15  ;;  %vm3365_vm3 = vweird.f32 %v7064_v20 }
 0x348   :  { %3560 = vst [vmem:[#allocation9 + $0xc0] sm:$0xff] %v3230_v43  ;;  %v3357_v34 = vsel %vm3354_vm14, %v3356_v57, %v3352_v6  ;;  %v4212_v10 = vpop.eup %4211  ;;  %v3369_v3 = vand.u32 2147483647, %v7064_v20  ;;  %v3371_v17 = vand.u32 2147483648, %v7064_v20  ;;  %v7092_v8 = vmax.f32 %v2916_v19, 1e-12 }
 0x349   :  { %3561 = vst [vmem:[#allocation9 + $0xc8] sm:$0xff] %v3231_v45  ;;  %v3358_v50 = vmul.f32 %v3357_v34, %v6347_v5  ;;  %v3359_v30 = vmul.f32 %v3357_v34, %v6362_v59  ;;  %v3476_v4 = vadd.f32 %v4210_v44, %v3475_v63  ;;  %v3361_v61 = vmul.f32 %v4212_v10, %v7064_v20  ;;  %v4214_v49 = vpop.eup %4213 }
 0x34a   :  { %v3105_v58 = vmul.f32 %v4214_v49, %v7067_v53  ;;  %v3113_v47 = vand.u32 2147483647, %v7067_v53  ;;  %vm3366_vm4 = vweird.f32 %v4212_v10  ;;  %v3115_v51 = vand.u32 2147483648, %v7067_v53 }
 0x34b   :  { %3576 = vst [vmem:[#allocation9 + $0x140] sm:$0xff] %v3358_v50  ;;  %v3480_v5 = vsel %vm3479_vm2, %v4210_v44, %v3476_v4  ;;  %v3362_v59 = vsub.f32 1.0, %v3361_v61  ;;  %4217 = vrcp.f32 %v7092_v8  ;;  %v4216_v25 = vpop.eup %4215  ;;  %vm7100_vm5 = vcmp.eq.f32.partialorder %v3369_v3, 8.507059e+37  ;;  %vm3367_vm8 = vmor %vm3365_vm3, %vm3366_vm4 }
 0x34c   :  { %3577 = vst [vmem:[#allocation9 + $0x148] sm:$0xff] %v3359_v30  ;;  %v3485_v18 = vsel %vm3482_vm1, %v3484_v36, %v3480_v5  ;;  %v3106_v40 = vsub.f32 1.0, %v3105_v58  ;;  %v3372_v22 = vor.u32 1.1754944e-38, %v3371_v17  ;;  %vm3109_vm6 = vweird.f32 %v7067_v53 }
 0x34d   :  { %v3486_v16 = vmul.f32 %v3485_v18, %v6381_v27  ;;  %v3487_v56 = vmul.f32 %v3485_v18, %v7538_v60  ;;  %v3363_v21 = vmul.f32 %v4212_v10, %v3362_v59  ;;  %v3233_v57 = vmul.f32 %v4216_v25, %v7073_v9  ;;  %v2964_v27 = vpop.xlane.xlu0 %2963 }
 0x34e   :  { %v3107_v24 = vmul.f32 %v4214_v49, %v3106_v40  ;;  %vm3110_vm7 = vweird.f32 %v4214_v49  ;;  %v7106_v37 = vmax.f32 %v2940_v13, 1e-12  ;;  %vm7111_vm9 = vcmp.eq.f32.partialorder %v3113_v47, 8.507059e+37 }
 0x34f   :  { %3592 = vst [vmem:[#allocation9 + $0x1c0] sm:$0xff] %v3486_v16  ;;  %v3364_v12 = vadd.f32 %v4212_v10, %v3363_v21  ;;  %v3116_v48 = vor.u32 1.1754944e-38, %v3115_v51  ;;  %v3234_v43 = vsub.f32 1.0, %v3233_v57  ;;  %v3241_v29 = vand.u32 2147483647, %v7073_v9  ;;  %vm3111_vm10 = vmor %vm3109_vm6, %vm3110_vm7 }
 0x350   :  { %3593 = vst [vmem:[#allocation9 + $0x1c8] sm:$0xff] %v3487_v56  ;;  %v3108_v14 = vadd.f32 %v4214_v49, %v3107_v24  ;;  %v3243_v39 = vand.u32 2147483648, %v7073_v9  ;;  %4219 = vrcp.f32 %v7106_v37  ;;  %vm3238_vm11 = vweird.f32 %v4216_v25  ;;  %v2943_v5 = vpop.xlane.xlu2 %2942 }
 0x351   :  { %v3368_v45 = vsel %vm3367_vm8, %v4212_v10, %v3364_v12  ;;  %v4218_v6 = vpop.eup %4217  ;;  %v3235_v20 = vmul.f32 %v4216_v25, %v3234_v43  ;;  %v7123_v63 = vmax.f32 %v2964_v27, 1e-12  ;;  %vm3237_vm12 = vweird.f32 %v7073_v9 }
 0x352   :  { %v3373_v34 = vsel %vm7100_vm5, %v3372_v22, %v3368_v45  ;;  %v3112_v50 = vsel %vm3111_vm10, %v4214_v49, %v3108_v14  ;;  %v3121_v30 = vmul.f32 %v4218_v6, %v7092_v8  ;;  %vm3242_vm13 = vcmp.eq.f32.partialorder %v3241_v29, 8.507059e+37  ;;  %vm3239_vm14 = vmor %vm3237_vm12, %vm3238_vm11 }
 0x353   :  { %v3374_v19 = vmul.f32 %v3373_v34, %v6423_v26  ;;  %v3375_v10 = vmul.f32 %v3373_v34, %v6439_v42  ;;  %v3117_v4 = vsel %vm7111_vm9, %v3116_v48, %v3112_v50  ;;  %v3236_v36 = vadd.f32 %v4216_v25, %v3235_v20 }
 0x354   :  { %v3118_v53 = vmul.f32 %v3117_v4, %v6458_v35  ;;  %v3119_v61 = vmul.f32 %v3117_v4, %v6479_v28  ;;  %v3244_v3 = vor.u32 1.1754944e-38, %v3243_v39  ;;  %v3122_v26 = vsub.f32 1.0, %v3121_v30 }
 0x355   :  { %3578 = vst [vmem:[#allocation9 + $0x150] sm:$0xff] %v3374_v19  ;;  %v3240_v42 = vsel %vm3239_vm14, %v4216_v25, %v3236_v36  ;;  %v3129_v49 = vand.u32 2147483647, %v7092_v8  ;;  %v3131_v17 = vand.u32 2147483648, %v7092_v8  ;;  %4221 = vrcp.f32 %v7123_v63 }
 0x356   :  { %3579 = vst [vmem:[#allocation9 + $0x158] sm:$0xff] %v3375_v10  ;;  %v4220_v59 = vpop.eup %4219  ;;  %v3245_v9 = vsel %vm3242_vm13, %v3244_v3, %v3240_v42  ;;  %v3123_v58 = vmul.f32 %v4218_v6, %v3122_v26  ;;  %vm3126_vm15 = vweird.f32 %v4218_v6  ;;  %vm3125_vm0 = vweird.f32 %v7092_v8 }
 0x357   :  { %3546 = vst [vmem:[#allocation9 + $0x50] sm:$0xff] %v3118_v53  ;;  %v2967_v35 = vpop.xlane.xlu1 %2966  ;;  %v3246_v28 = vmul.f32 %v3245_v9, %v6502_v33  ;;  %v3247_v47 = vmul.f32 %v3245_v9, %v6517_v1  ;;  %v3249_v18 = vmul.f32 %v4220_v59, %v7106_v37  ;;  %v7140_v13 = vmax.f32 %v2943_v5, 1e-12  ;;  %vm3127_vm1 = vmor %vm3125_vm0, %vm3126_vm15 }
 0x358   :  { %3547 = vst [vmem:[#allocation9 + $0x58] sm:$0xff] %v3119_v61  ;;  %v3124_v51 = vadd.f32 %v4218_v6, %v3123_v58  ;;  %vm3130_vm2 = vcmp.eq.f32.partialorder %v3129_v49, 8.507059e+37  ;;  %v3132_v25 = vor.u32 1.1754944e-38, %v3131_v17  ;;  %v7142_v60 = vmax.f32 %v2967_v35, 1e-12 }
 0x359   :  { %3562 = vst [vmem:[#allocation9 + $0xd0] sm:$0xff] %v3246_v28  ;;  %v3250_v16 = vsub.f32 1.0, %v3249_v18  ;;  %v3257_v33 = vand.u32 2147483647, %v7106_v37  ;;  %v3259_v1 = vand.u32 2147483648, %v7106_v37  ;;  %4223 = vrcp.f32 %v7140_v13 }
 0x35a   :  { %3563 = vst [vmem:[#allocation9 + $0xd8] sm:$0xff] %v3247_v47  ;;  %v3128_v56 = vsel %vm3127_vm1, %v4218_v6, %v3124_v51  ;;  %vm3254_vm3 = vweird.f32 %v4220_v59  ;;  %4225 = vrcp.f32 %v7142_v60  ;;  %vm3253_vm4 = vweird.f32 %v7106_v37 }
 0x35b   :  { %v4222_v21 = vpop.eup %4221  ;;  %v3133_v40 = vsel %vm3130_vm2, %v3132_v25, %v3128_v56  ;;  %v3251_v8 = vmul.f32 %v4220_v59, %v3250_v16  ;;  %v3385_v27 = vand.u32 2147483647, %v7123_v63  ;;  %vm3255_vm5 = vmor %vm3253_vm4, %vm3254_vm3  ;;  %v3260_v15 = vor.u32 1.1754944e-38, %v3259_v1 }
 0x35c   :  { %v3134_v44 = vmul.f32 %v3133_v40, %v6531_v0  ;;  %v3135_v22 = vmul.f32 %v3133_v40, %v6542_v46  ;;  %v3377_v57 = vmul.f32 %v4222_v21, %v7123_v63  ;;  %vm3258_vm6 = vcmp.eq.f32.partialorder %v3257_v33, 8.507059e+37 }
 0x35d   :  { %v2919_v12 = vpop.xlane.xlu0 %2918  ;;  %v3252_v24 = vadd.f32 %v4220_v59, %v3251_v8  ;;  %v3387_v29 = vand.u32 2147483648, %v7123_v63  ;;  %vm3381_vm7 = vweird.f32 %v7123_v63  ;;  %vm3382_vm8 = vweird.f32 %v4222_v21 }
 0x35e   :  { %3548 = vst [vmem:[#allocation9 + $0x60] sm:$0xff] %v3134_v44  ;;  %v3378_v48 = vsub.f32 1.0, %v3377_v57  ;;  %v7154_v0 = vmax.f32 %v2919_v12, 1e-12  ;;  %vm7159_vm9 = vcmp.eq.f32.partialorder %v3385_v27, 8.507059e+37  ;;  %vm3383_vm10 = vmor %vm3381_vm7, %vm3382_vm8  ;;  %v3403_v61 = vand.u32 2147483648, %v7142_v60 }
 0x35f   :  { %3549 = vst [vmem:[#allocation9 + $0x68] sm:$0xff] %v3135_v22  ;;  %v3256_v43 = vsel %vm3255_vm5, %v4220_v59, %v3252_v24  ;;  %v4224_v46 = vpop.eup %4223  ;;  %v3273_v50 = vand.u32 2147483647, %v7140_v13  ;;  %v3388_v63 = vor.u32 1.1754944e-38, %v3387_v29  ;;  %v3401_v4 = vand.u32 2147483647, %v7142_v60 }
 0x360   :  { %v3261_v45 = vsel %vm3258_vm6, %v3260_v15, %v3256_v43  ;;  %v3379_v14 = vmul.f32 %v4222_v21, %v3378_v48  ;;  %v4226_v37 = vpop.eup %4225  ;;  %v3265_v20 = vmul.f32 %v4224_v46, %v7140_v13  ;;  %4227 = vrcp.f32 %v7154_v0 }
 0x361   :  { %v3262_v39 = vmul.f32 %v3261_v45, %v6558_v41  ;;  %v3263_v6 = vmul.f32 %v3261_v45, %v6573_v38  ;;  %v3393_v30 = vmul.f32 %v4226_v37, %v7142_v60  ;;  %v3275_v38 = vand.u32 2147483648, %v7140_v13 }
 0x362   :  { %v3380_v10 = vadd.f32 %v4222_v21, %v3379_v14  ;;  %v3266_v41 = vsub.f32 1.0, %v3265_v20  ;;  %vm3270_vm11 = vweird.f32 %v4224_v46  ;;  %vm3398_vm12 = vweird.f32 %v4226_v37 }
 0x363   :  { %3564 = vst [vmem:[#allocation9 + $0xe0] sm:$0xff] %v3262_v39  ;;  %v3394_v53 = vsub.f32 1.0, %v3393_v30  ;;  %vm3269_vm13 = vweird.f32 %v7140_v13  ;;  %vm3274_vm15 = vcmp.eq.f32.partialorder %v3273_v50, 8.507059e+37  ;;  %v3276_v58 = vor.u32 1.1754944e-38, %v3275_v38 }
 0x364   :  { %v2988_v19 = vpop.xlane.xlu2 %2987  ;;  %3565 = vst [vmem:[#allocation9 + $0xe8] sm:$0xff] %v3263_v6  ;;  %v3384_v36 = vsel %vm3383_vm10, %v4222_v21, %v3380_v10  ;;  %v3267_v42 = vmul.f32 %v4224_v46, %v3266_v41  ;;  %vm3271_vm14 = vmor %vm3269_vm13, %vm3270_vm11  ;;  %vm3397_vm0 = vweird.f32 %v7142_v60  ;;  %vm3402_vm2 = vcmp.eq.f32.partialorder %v3401_v4, 8.507059e+37  ;;  %v7545_v4 = vld [vmem:[#allocation27_spill] sm:$0xff] }
 0x365   :  { %v7170_v3 = vmax.f32 %v2988_v19, 1e-12  ;;  %v3389_v26 = vsel %vm7159_vm9, %v3388_v63, %v3384_v36  ;;  %v3395_v5 = vmul.f32 %v4226_v37, %v3394_v53  ;;  %vm3399_vm1 = vmor %vm3397_vm0, %vm3398_vm12  ;;  %v3145_v13 = vand.u32 2147483647, %v7154_v0  ;;  %v7546_v53 = vld [vmem:[#allocation30_spill] sm:$0xff] }
 0x366   :  { %v3390_v49 = vmul.f32 %v3389_v26, %v6593_v7  ;;  %v3391_v17 = vmul.f32 %v3389_v26, %v6610_v23  ;;  %v3268_v59 = vadd.f32 %v4224_v46, %v3267_v42  ;;  %v4228_v9 = vpop.eup %4227  ;;  %v3404_v7 = vor.u32 1.1754944e-38, %v3403_v61 }
 0x367   :  { %4229 = vrcp.f32 %v7170_v3  ;;  %v3396_v35 = vadd.f32 %v4226_v37, %v3395_v5  ;;  %v3137_v23 = vmul.f32 %v4228_v9, %v7154_v0  ;;  %v3147_v8 = vand.u32 2147483648, %v7154_v0 }
 0x368   :  { %3580 = vst [vmem:[#allocation9 + $0x160] sm:$0xff] %v3390_v49  ;;  %v3272_v47 = vsel %vm3271_vm14, %v4224_v46, %v3268_v59  ;;  %vm3142_vm3 = vweird.f32 %v4228_v9  ;;  %vm3141_vm4 = vweird.f32 %v7154_v0  ;;  %vm3146_vm6 = vcmp.eq.f32.partialorder %v3145_v13, 8.507059e+37  ;;  %v7547_v59 = vld [vmem:[#allocation34_spill] sm:$0xff] }
 0x369   :  { %3581 = vst [vmem:[#allocation9 + $0x168] sm:$0xff] %v3391_v17  ;;  %v3277_v18 = vsel %vm3274_vm15, %v3276_v58, %v3272_v47  ;;  %v3400_v51 = vsel %vm3399_vm1, %v4226_v37, %v3396_v35  ;;  %v3138_v60 = vsub.f32 1.0, %v3137_v23  ;;  %vm3143_vm5 = vmor %vm3141_vm4, %vm3142_vm3  ;;  %v3513_v24 = vand.u32 2147483647, %v7170_v3  ;;  %v7548_v58 = vld [vmem:[#allocation35_spill] sm:$0xff] }
 0x36a   :  { %v3278_v16 = vmul.f32 %v3277_v18, %v6623_v32  ;;  %v3279_v56 = vmul.f32 %v3277_v18, %v6639_v54  ;;  %v3405_v33 = vsel %vm3402_vm2, %v3404_v7, %v3400_v51  ;;  %vm3509_vm8 = vweird.f32 %v7170_v3 }
 0x36b   :  { %v2985_v28 = vpop.xlane.xlu1 %2984  ;;  %v3406_v21 = vmul.f32 %v3405_v33, %v6657_v55  ;;  %v3407_v40 = vmul.f32 %v3405_v33, %v6680_v31  ;;  %v3139_v44 = vmul.f32 %v4228_v9, %v3138_v60  ;;  %v3148_v55 = vor.u32 1.1754944e-38, %v3147_v8 }
 0x36c   :  { %v3021_v25 = vmax.f32 %v2985_v28, 1e-12  ;;  %3566 = vst [vmem:[#allocation9 + $0xf0] sm:$0xff] %v3278_v16  ;;  %v3515_v31 = vand.u32 2147483648, %v7170_v3  ;;  %vm3514_vm10 = vcmp.eq.f32.partialorder %v3513_v24, 8.507059e+37 }
 0x36d   :  { %v4230_v1 = vpop.eup %4229  ;;  %3567 = vst [vmem:[#allocation9 + $0xf8] sm:$0xff] %v3279_v56  ;;  %v3140_v32 = vadd.f32 %v4228_v9, %v3139_v44 }
 0x36e   :  { %4231 = vrcp.f32 %v3021_v25  ;;  %v3505_v22 = vmul.f32 %v4230_v1, %v7170_v3  ;;  %3582 = vst [vmem:[#allocation9 + $0x170] sm:$0xff] %v3406_v21  ;;  %vm3510_vm7 = vweird.f32 %v4230_v1  ;;  %v3516_v14 = vor.u32 1.1754944e-38, %v3515_v31 }
 0x36f   :  { %3583 = vst [vmem:[#allocation9 + $0x178] sm:$0xff] %v3407_v40  ;;  %v3144_v57 = vsel %vm3143_vm5, %v4228_v9, %v3140_v32  ;;  %vm3511_vm9 = vmor %vm3509_vm8, %vm3510_vm7  ;;  %v3497_v34 = vand.u32 2147483647, %v3021_v25  ;;  %v3499_v20 = vand.u32 2147483648, %v3021_v25  ;;  %vm3493_vm12 = vweird.f32 %v3021_v25 }
 0x370   :  { %v3506_v54 = vsub.f32 1.0, %v3505_v22  ;;  %v3149_v48 = vsel %vm3146_vm6, %v3148_v55, %v3144_v57 }
 0x371   :  { %v3150_v29 = vmul.f32 %v3149_v48, %v6695_v62  ;;  %v3151_v0 = vmul.f32 %v3149_v48, %v6709_v11  ;;  %v3500_v30 = vor.u32 1.1754944e-38, %v3499_v20  ;;  %vm3498_vm14 = vcmp.eq.f32.partialorder %v3497_v34, 8.507059e+37 }
 0x372   :  { %v3507_v12 = vmul.f32 %v4230_v1, %v3506_v54 }
 0x373   :  { %v2991_v27 = vpop.xlane.xlu0 %2990  ;;  %3550 = vst [vmem:[#allocation9 + $0x70] sm:$0xff] %v3150_v29 }
 0x374   :  { %v4232_v15 = vpop.eup %4231  ;;  %v3023_v43 = vmax.f32 %v2991_v27, 1e-12  ;;  %v3508_v46 = vadd.f32 %v4230_v1, %v3507_v12  ;;  %3551 = vst [vmem:[#allocation9 + $0x78] sm:$0xff] %v3151_v0 }
 0x375   :  { %v3489_v45 = vmul.f32 %v4232_v15, %v3021_v25  ;;  %vm3494_vm11 = vweird.f32 %v4232_v15 }
 0x376   :  { %4233 = vrcp.f32 %v3023_v43  ;;  %v3512_v37 = vsel %vm3511_vm9, %v4230_v1, %v3508_v46  ;;  %vm3495_vm13 = vmor %vm3493_vm12, %vm3494_vm11  ;;  %v3531_v3 = vand.u32 2147483648, %v3023_v43  ;;  %v3529_v26 = vand.u32 2147483647, %v3023_v43 }
 0x377   :  { %v3490_v39 = vsub.f32 1.0, %v3489_v45  ;;  %v3517_v6 = vsel %vm3514_vm10, %v3516_v14, %v3512_v37  ;;  %vm3525_vm0 = vweird.f32 %v3023_v43 }
 0x378   :  { %v3518_v19 = vmul.f32 %v3517_v6, %v6723_v52  ;;  %v3519_v10 = vmul.f32 %v3517_v6, %v6735_v2  ;;  %v3532_v49 = vor.u32 1.1754944e-38, %v3531_v3  ;;  %vm3530_vm2 = vcmp.eq.f32.partialorder %v3529_v26, 8.507059e+37 }
 0x379   :  { %v3491_v62 = vmul.f32 %v4232_v15, %v3490_v39 }
 0x37a   :  { %3596 = vst [vmem:[#allocation9 + $0x1e0] sm:$0xff] %v3518_v19 }
 0x37b   :  { %v3492_v11 = vadd.f32 %v4232_v15, %v3491_v62  ;;  %3597 = vst [vmem:[#allocation9 + $0x1e8] sm:$0xff] %v3519_v10 }
 0x37c   :  { %v4234_v50 = vpop.eup %4233 }
 0x37d   :  { %v3496_v63 = vsel %vm3495_vm13, %v4232_v15, %v3492_v11  ;;  %v3521_v41 = vmul.f32 %v4234_v50, %v3023_v43  ;;  %vm3526_vm15 = vweird.f32 %v4234_v50 }
 0x37e   :  { %v3501_v38 = vsel %vm3498_vm14, %v3500_v30, %v3496_v63  ;;  %vm3527_vm1 = vmor %vm3525_vm0, %vm3526_vm15 }
 0x37f   :  { %v3502_v36 = vmul.f32 %v3501_v38, %v7545_v4  ;;  %v3503_v61 = vmul.f32 %v3501_v38, %v7546_v53  ;;  %v3522_v52 = vsub.f32 1.0, %v3521_v41 }
 0x381   :  { %3594 = vst [vmem:[#allocation9 + $0x1d0] sm:$0xff] %v3502_v36  ;;  %v3523_v2 = vmul.f32 %v4234_v50, %v3522_v52 }
 0x382   :  { %3595 = vst [vmem:[#allocation9 + $0x1d8] sm:$0xff] %v3503_v61 }
 0x383   :  { %v3524_v42 = vadd.f32 %v4234_v50, %v3523_v2 }
 0x385   :  { %v3528_v17 = vsel %vm3527_vm1, %v4234_v50, %v3524_v42 }
 0x386   :  { %v3533_v5 = vsel %vm3530_vm2, %v3532_v49, %v3528_v17 }
 0x387   :  { %v3534_v9 = vmul.f32 %v3533_v5, %v7547_v59  ;;  %v3535_v35 = vmul.f32 %v3533_v5, %v7548_v58 }
 0x389   :  { %3598 = vst [vmem:[#allocation9 + $0x1f0] sm:$0xff] %v3534_v9 }
 0x38a   :  { %3599 = vst [vmem:[#allocation9 + $0x1f8] sm:$0xff] %v3535_v35 }
 0x38b   :  { %3612 = dma.vmem_to_hbm [thread:$0]  %s3605_s4, 8192, %s3607_s20, [#allocation5], %s4339_s7, %s4339_s7, %s4340_s8  }
 0x38c   :  { %4336 = dma.done.wait [#allocation5], 8192  }
 0x38d   :  { %4337 = vsyncadd [#allocation5], 4294959104 }
 0x38e   :  { %3617 = vsyncpa [#allocation4], 1 }
 0x38f   :  { %3618 = vsyncpa [#allocation7], 1 }
 0x390   :  { %3619 = vsyncpa [#allocation5], 1 }

</bundles_post_ra>
